<compile_context>
chip_gen: v5e
topology: v5e:2x2
jax: 0.10.0
libtpu: 0.0.40
codegen_flags: <defaults>
</compile_context>

<pallas_src>
import jax
import jax.numpy as jnp
from jax.experimental import pallas as pl
from jax.experimental.pallas import tpu as pltpu

ALTURA = 32
CANAIS = 1
LARGURA = 32
QTD_IMAGENS_REAIS = 7
IMG = CANAIS * LARGURA * ALTURA  # 1024

# TPU-friendly padded sizes (last two dims multiples of (8, 128)).
PB = 8        # padded batch (module implies batch 1 via the final .view)
P_IN = 128    # 7    -> 128
P_H1 = 128    # 120  -> 128
P_H2 = 256    # 256
P_H3 = 1024   # 1024
P_OUT = 1024  # 1024


def _generator_kernel(x_ref,
                      w1_ref, b1_ref,
                      w2_ref, b2_ref,
                      w3_ref, b3_ref,
                      w4_ref, b4_ref,
                      o_ref):
    """All four Linear+sigmoid layers, fused, single invocation.

    Weights are bf16 Refs; activations are cast to bf16 right at each MXU dot
    (tiny 8xN casts), accumulation / bias / sigmoid are f32.
    """
    def layer(h_f32, w_ref, b_ref):
        acc = jnp.dot(h_f32.astype(jnp.bfloat16), w_ref[...],
                      preferred_element_type=jnp.float32)
        return jax.nn.sigmoid(acc + b_ref[...])

    h = layer(x_ref[...], w1_ref, b1_ref)        # (8, 128)
    h = layer(h, w2_ref, b2_ref)                 # (8, 256)
    h = layer(h, w3_ref, b3_ref)                 # (8, 1024)
    o_ref[...] = layer(h, w4_ref, b4_ref)        # (8, 1024) f32, lane-dense


def _pad2(a, rows, cols):
    return jnp.pad(a, ((0, rows - a.shape[0]), (0, cols - a.shape[1])))


def init_params(key):
    """PyTorch nn.Linear-style init (uniform(-k, k), k = 1/sqrt(fan_in)).

    Returns:
      params     : padded bf16 weights / padded f32 biases (kernel inputs).
      params_f32 : the original un-padded f32 (w, b) pairs, used only for the
                   full-precision semantic sanity check.
    """
    dims = [(QTD_IMAGENS_REAIS, 120), (120, 256), (256, IMG), (IMG, IMG)]
    pads = [(P_IN, P_H1), (P_H1, P_H2), (P_H2, P_H3), (P_H3, P_OUT)]
    params, params_f32 = [], []
    for (fan_in, fan_out), (pr, pc) in zip(dims, pads):
        key, kw, kb = jax.random.split(key, 3)
        k = 1.0 / jnp.sqrt(jnp.float32(fan_in))
        # torch weight is (out, in); store transposed as (in, out): y = x @ W + b
        w = jax.random.uniform(kw, (fan_in, fan_out), jnp.float32, -k, k)
        b = jax.random.uniform(kb, (1, fan_out), jnp.float32, -k, k)
        params_f32.append((w, b))
        params.append((_pad2(w, pr, pc).astype(jnp.bfloat16),  # pad once, bf16
                       _pad2(b, 1, pc)))                        # bias stays f32
    return params, params_f32


@jax.jit
def generator_forward(x, params):
    """x: (1, QTD_IMAGENS_REAIS) f32 -> (1, CANAIS, LARGURA, ALTURA) f32."""
    (w1, b1), (w2, b2), (w3, b3), (w4, b4) = params
    xp = _pad2(x, PB, P_IN)

    vmem = pl.BlockSpec(memory_space=pltpu.MemorySpace.VMEM)  # whole array in VMEM
    out_padded = pl.pallas_call(
        _generator_kernel,
        out_shape=jax.ShapeDtypeStruct((PB, P_OUT), jnp.float32),
        in_specs=[vmem] * 9,
        out_specs=vmem,
    )(xp, w1, b1, w2, b2, w3, b3, w4, b4)

    return out_padded[0:1, 0:IMG].reshape(1, CANAIS, LARGURA, ALTURA)


def generator_forward_ref(x, params):
    """Pure-JAX reference mirroring the kernel math exactly (same padded bf16
    weights, same bf16 activation casts, f32 accumulation)."""
    h = _pad2(x, PB, P_IN)
    for (w, b) in params:
        h = jax.nn.sigmoid(
            jnp.dot(h.astype(jnp.bfloat16), w,
                    preferred_element_type=jnp.float32) + b)
    return h[0:1, 0:IMG].reshape(1, CANAIS, LARGURA, ALTURA)


def generator_forward_f32(x, params_f32):
    """Original-module semantics in full f32 (un-quantized weights)."""
    h = x
    for (w, b) in params_f32:
        h = jax.nn.sigmoid(jnp.dot(h, w) + b)
    return h.reshape(1, CANAIS, LARGURA, ALTURA)


if __name__ == "__main__":
    key = jax.random.PRNGKey(0)
    kp, kx = jax.random.split(key)
    params, params_f32 = init_params(kp)

    # Input: one "noise" vector of QTD_IMAGENS_REAIS = 7 values (the module's
    # final .view(1, CANAIS, LARGURA, ALTURA) implies batch 1).
    x = jax.random.uniform(kx, (1, QTD_IMAGENS_REAIS), jnp.float32)

    out = jax.block_until_ready(generator_forward(x, params))
    assert out.shape == (1, CANAIS, LARGURA, ALTURA), out.shape

    # Exact-math check against a reference doing the identical mixed-precision ops.
    ref = generator_forward_ref(x, params)
    assert jnp.allclose(out, ref, atol=1e-4, rtol=1e-4), float(
        jnp.max(jnp.abs(out - ref)))

    # Semantic check against the full-f32 PyTorch-equivalent forward
    # (bf16 weight/activation quantization keeps the error << 2e-2).
    ref32 = generator_forward_f32(x, params_f32)
    assert jnp.allclose(out, ref32, atol=2e-2), float(
        jnp.max(jnp.abs(out - ref32)))

    print("KERNEL_OK")
</pallas_src>

<mosaic_0001>
module attributes {stable_mosaic.version = 11 : i64} {
  func.func @_generator_kernel(%arg0: memref<8x128xf32, #tpu.memory_space<vmem>>, %arg1: memref<128x128xbf16, #tpu.memory_space<vmem>>, %arg2: memref<1x128xf32, #tpu.memory_space<vmem>>, %arg3: memref<128x256xbf16, #tpu.memory_space<vmem>>, %arg4: memref<1x256xf32, #tpu.memory_space<vmem>>, %arg5: memref<256x1024xbf16, #tpu.memory_space<vmem>>, %arg6: memref<1x1024xf32, #tpu.memory_space<vmem>>, %arg7: memref<1024x1024xbf16, #tpu.memory_space<vmem>>, %arg8: memref<1x1024xf32, #tpu.memory_space<vmem>>, %arg9: memref<8x1024xf32, #tpu.memory_space<vmem>>) attributes {dimension_semantics = [], scalar_prefetch = 0 : i64, scratch_operands = 0 : i64, tpu.core_type = #tpu.core_type<tc>} {
    %c0 = arith.constant 0 : index
    %c0_0 = arith.constant 0 : index
    %0 = vector.load %arg0[%c0, %c0_0] : memref<8x128xf32, #tpu.memory_space<vmem>>, vector<8x128xf32>
    %1 = arith.truncf %0 : vector<8x128xf32> to vector<8x128xbf16>
    %c0_1 = arith.constant 0 : index
    %c0_2 = arith.constant 0 : index
    %2 = vector.load %arg1[%c0_1, %c0_2] : memref<128x128xbf16, #tpu.memory_space<vmem>>, vector<128x128xbf16>
    %cst = arith.constant dense<0.000000e+00> : vector<8x128xf32>
    %3 = tpu.matmul %1, %2, %cst {dimension_numbers = #tpu.dot_dimension_numbers<[1], [0], [0], [1], [0, 0, 1, 1], [], []>} : vector<8x128xbf16>, vector<128x128xbf16>, vector<8x128xf32> -> vector<8x128xf32>
    %c0_3 = arith.constant 0 : index
    %c0_4 = arith.constant 0 : index
    %4 = vector.load %arg2[%c0_3, %c0_4] : memref<1x128xf32, #tpu.memory_space<vmem>>, vector<1x128xf32>
    %5 = vector.broadcast %4 : vector<1x128xf32> to vector<8x128xf32>
    %6 = arith.addf %3, %5 : vector<8x128xf32>
    %7 = arith.negf %6 : vector<8x128xf32>
    %8 = math.exp %7 : vector<8x128xf32>
    %cst_5 = arith.constant 1.000000e+00 : f32
    %9 = vector.broadcast %cst_5 : f32 to vector<8x128xf32>
    %10 = arith.addf %9, %8 : vector<8x128xf32>
    %11 = arith.divf %9, %10 : vector<8x128xf32>
    %12 = arith.truncf %11 : vector<8x128xf32> to vector<8x128xbf16>
    %c0_6 = arith.constant 0 : index
    %c0_7 = arith.constant 0 : index
    %13 = vector.load %arg3[%c0_6, %c0_7] : memref<128x256xbf16, #tpu.memory_space<vmem>>, vector<128x256xbf16>
    %cst_8 = arith.constant dense<0.000000e+00> : vector<8x256xf32>
    %14 = tpu.matmul %12, %13, %cst_8 {dimension_numbers = #tpu.dot_dimension_numbers<[1], [0], [0], [1], [0, 0, 1, 1], [], []>} : vector<8x128xbf16>, vector<128x256xbf16>, vector<8x256xf32> -> vector<8x256xf32>
    %c0_9 = arith.constant 0 : index
    %c0_10 = arith.constant 0 : index
    %15 = vector.load %arg4[%c0_9, %c0_10] : memref<1x256xf32, #tpu.memory_space<vmem>>, vector<1x256xf32>
    %16 = vector.broadcast %15 : vector<1x256xf32> to vector<8x256xf32>
    %17 = arith.addf %14, %16 : vector<8x256xf32>
    %18 = arith.negf %17 : vector<8x256xf32>
    %19 = math.exp %18 : vector<8x256xf32>
    %cst_11 = arith.constant 1.000000e+00 : f32
    %20 = vector.broadcast %cst_11 : f32 to vector<8x256xf32>
    %21 = arith.addf %20, %19 : vector<8x256xf32>
    %22 = arith.divf %20, %21 : vector<8x256xf32>
    %23 = arith.truncf %22 : vector<8x256xf32> to vector<8x256xbf16>
    %c0_12 = arith.constant 0 : index
    %c0_13 = arith.constant 0 : index
    %24 = vector.load %arg5[%c0_12, %c0_13] : memref<256x1024xbf16, #tpu.memory_space<vmem>>, vector<256x1024xbf16>
    %cst_14 = arith.constant dense<0.000000e+00> : vector<8x1024xf32>
    %25 = tpu.matmul %23, %24, %cst_14 {dimension_numbers = #tpu.dot_dimension_numbers<[1], [0], [0], [1], [0, 0, 1, 1], [], []>} : vector<8x256xbf16>, vector<256x1024xbf16>, vector<8x1024xf32> -> vector<8x1024xf32>
    %c0_15 = arith.constant 0 : index
    %c0_16 = arith.constant 0 : index
    %26 = vector.load %arg6[%c0_15, %c0_16] : memref<1x1024xf32, #tpu.memory_space<vmem>>, vector<1x1024xf32>
    %27 = vector.broadcast %26 : vector<1x1024xf32> to vector<8x1024xf32>
    %28 = arith.addf %25, %27 : vector<8x1024xf32>
    %29 = arith.negf %28 : vector<8x1024xf32>
    %30 = math.exp %29 : vector<8x1024xf32>
    %cst_17 = arith.constant 1.000000e+00 : f32
    %31 = vector.broadcast %cst_17 : f32 to vector<8x1024xf32>
    %32 = arith.addf %31, %30 : vector<8x1024xf32>
    %33 = arith.divf %31, %32 : vector<8x1024xf32>
    %34 = arith.truncf %33 : vector<8x1024xf32> to vector<8x1024xbf16>
    %c0_18 = arith.constant 0 : index
    %c0_19 = arith.constant 0 : index
    %35 = vector.load %arg7[%c0_18, %c0_19] : memref<1024x1024xbf16, #tpu.memory_space<vmem>>, vector<1024x1024xbf16>
    %cst_20 = arith.constant dense<0.000000e+00> : vector<8x1024xf32>
    %36 = tpu.matmul %34, %35, %cst_20 {dimension_numbers = #tpu.dot_dimension_numbers<[1], [0], [0], [1], [0, 0, 1, 1], [], []>} : vector<8x1024xbf16>, vector<1024x1024xbf16>, vector<8x1024xf32> -> vector<8x1024xf32>
    %c0_21 = arith.constant 0 : index
    %c0_22 = arith.constant 0 : index
    %37 = vector.load %arg8[%c0_21, %c0_22] : memref<1x1024xf32, #tpu.memory_space<vmem>>, vector<1x1024xf32>
    %38 = vector.broadcast %37 : vector<1x1024xf32> to vector<8x1024xf32>
    %39 = arith.addf %36, %38 : vector<8x1024xf32>
    %40 = arith.negf %39 : vector<8x1024xf32>
    %41 = math.exp %40 : vector<8x1024xf32>
    %cst_23 = arith.constant 1.000000e+00 : f32
    %42 = vector.broadcast %cst_23 : f32 to vector<8x1024xf32>
    %43 = arith.addf %42, %41 : vector<8x1024xf32>
    %44 = arith.divf %42, %43 : vector<8x1024xf32>
    %c0_24 = arith.constant 0 : index
    %c0_25 = arith.constant 0 : index
    %45 = vector.load %arg9[%c0_24, %c0_25] : memref<8x1024xf32, #tpu.memory_space<vmem>>, vector<8x1024xf32>
    tpu.vector_store %arg9[%c0_24, %c0_25], %44 {strides = array<i32>} : memref<8x1024xf32, #tpu.memory_space<vmem>>, vector<8x1024xf32>,
    return
  }
}

</mosaic_0001>

<bundles_post_ra>
// kernel: generator_forward.1
= control target key start
LH: loop header
LB: loop body
LE: loop exit
PB: predicated region body
PF: predicated region fallthrough
CT: control target
= control target key end

     0   :  { %14 = vsyncpa [#allocation3], 0  ;;  %s9799_s0 = inlined_call_operand.vmem [shape: f32[8,128], index: 0, kind: input, shape index: {}]   ;;  %s9800_s1 = inlined_call_operand.hbm [shape: bf16[128,128], index: 1, kind: input, shape index: {}]   ;;  %s9801_s2 = inlined_call_operand.hbm [shape: f32[1,128], index: 2, kind: input, shape index: {}]   ;;  %s9802_s3 = inlined_call_operand.hbm [shape: bf16[128,256], index: 3, kind: input, shape index: {}]   ;;  %s9803_s4 = inlined_call_operand.hbm [shape: f32[1,256], index: 4, kind: input, shape index: {}]   ;;  %s9804_s5 = inlined_call_operand.hbm [shape: bf16[256,1024], index: 5, kind: input, shape index: {}]   ;;  %s9805_s6 = inlined_call_operand.hbm [shape: f32[1,1024], index: 6, kind: input, shape index: {}]   ;;  %s9806_s7 = inlined_call_operand.hbm [shape: bf16[1024,1024], index: 7, kind: input, shape index: {}]   ;;  %s9807_s8 = inlined_call_operand.hbm [shape: f32[1,1024], index: 8, kind: input, shape index: {}]   ;;  %s9808_s9 = inlined_call_operand.vmem [shape: f32[8,1024], index: 9, kind: output, shape index: {}]  }
   0x1   :  { %15 = vsyncpa [#allocation5], 0 }
   0x2   :  { %16 = vsyncpa [#allocation8], 0 }
   0x3   :  { %17 = vsyncpa [#allocation11], 0  ;;  %s39_s11 = sshll.u32 %s9801_s2, 4  ;;  %s40_s11 = int_to_ptr.hbm [resolvable:$true] %s39_s11 }
   0x4   :  { %18 = vsyncpa [#allocation14], 0  ;;  %s9299_s12 = smov [#allocation4]   ;;  %s63_s16 = sshll.u32 %s9803_s4, 4  ;;  %s64_s16 = int_to_ptr.hbm [resolvable:$true] %s63_s16 }
   0x5   :  { %s41_s13 = sshll.u32 %s9299_s12, 4  ;;  %s9300_s17 = smov [#allocation7]   ;;  %s42_s13 = int_to_ptr.vmem [resolvable:$true] %s41_s13 }
   0x6   :  { %44 = dma.hbm_to_vmem [thread:$0]  %s40_s11, 16, %s42_s13, [#allocation5]  }
   0x7   :  { %s65_s18 = sshll.u32 %s9300_s17, 4  ;;  %s87_s21 = sshll.u32 %s9805_s6, 4  ;;  %s66_s18 = int_to_ptr.vmem [resolvable:$true] %s65_s18  ;;  %s88_s21 = int_to_ptr.hbm [resolvable:$true] %s87_s21 }
   0x8   :  { %68 = dma.hbm_to_vmem [thread:$0]  %s64_s16, 32, %s66_s18, [#allocation8]  }
   0x9   :  { %s25_s23 = sshll.u32 %s9800_s1, 4  ;;  %s9301_s24 = smov [#allocation10]   ;;  %s26_s23 = int_to_ptr.hbm [resolvable:$true] %s25_s23 }
   0xa   :  { %s89_s25 = sshll.u32 %s9301_s24, 4  ;;  %s9302_s4 = smov [#allocation2]   ;;  %s90_s25 = int_to_ptr.vmem [resolvable:$true] %s89_s25 }
   0xb   :  { %92 = dma.hbm_to_vmem [thread:$0]  %s88_s21, 128, %s90_s25, [#allocation11]  }
   0xc   :  { %s27_s26 = sshll.u32 %s9302_s4, 4  ;;  %s9303_s27 = smov 64   ;;  %s28_s26 = int_to_ptr.vmem [resolvable:$true] %s27_s26 }
   0xd   :  { %s9304_s28 = smov 4   ;;  %s49_s30 = sshll.u32 %s9802_s3, 4  ;;  %s50_s30 = int_to_ptr.hbm [resolvable:$true] %s49_s30 }
   0xe   :  { %33 = dma.hbm_to_vmem [thread:$0]  %s26_s23, 1024, %s28_s26, [#allocation3], %s9303_s27, %s9303_s27, %s9304_s28  }
   0xf   :  { %s9305_s10 = smov [#allocation6]   ;;  %s73_s13 = sshll.u32 %s9804_s5, 4  ;;  %s74_s13 = int_to_ptr.hbm [resolvable:$true] %s73_s13 }
  0x10   :  { %s51_s11 = sshll.u32 %s9305_s10, 4  ;;  %s9306_s14 = smov 128   ;;  %s52_s11 = int_to_ptr.vmem [resolvable:$true] %s51_s11 }
  0x11   :  { %s9307_s15 = smov 8   ;;  %s9308_s16 = smov [#allocation9]  }
  0x12   :  { %57 = dma.hbm_to_vmem [thread:$0]  %s50_s30, 2048, %s52_s11, [#allocation5], %s9306_s14, %s9306_s14, %s9307_s15  }
  0x13   :  { %s75_s17 = sshll.u32 %s9308_s16, 4  ;;  %s9309_s18 = smov 512   ;;  %s76_s17 = int_to_ptr.vmem [resolvable:$true] %s75_s17 }
  0x14   :  { %s9310_s19 = smov 32   ;;  %s97_s21 = sshll.u32 %s9806_s7, 4  ;;  %s98_s21 = int_to_ptr.hbm [resolvable:$true] %s97_s21 }
  0x15   :  { %81 = dma.hbm_to_vmem [thread:$0]  %s74_s13, 16384, %s76_s17, [#allocation8], %s9309_s18, %s9309_s18, %s9310_s19  }
  0x16   :  { %s9311_s2 = smov [#allocation12]   ;;  %s111_s24 = sshll.u32 %s9807_s8, 4  ;;  %s112_s24 = int_to_ptr.hbm [resolvable:$true] %s111_s24 }
  0x17   :  { %s99_s22 = sshll.u32 %s9311_s2, 4  ;;  %s9312_s25 = smov [#allocation13]   ;;  %s100_s22 = int_to_ptr.vmem [resolvable:$true] %s99_s22 }
  0x18   :  { %105 = dma.hbm_to_vmem [thread:$0]  %s98_s21, 65536, %s100_s22, [#allocation11], %s9309_s18, %s9309_s18, %s9310_s19  }
  0x19   :  { %s113_s4 = sshll.u32 %s9312_s25, 4  ;;  %s114_s4 = int_to_ptr.vmem [resolvable:$true] %s113_s4 }
  0x1a   :  { %116 = dma.hbm_to_vmem [thread:$0]  %s112_s24, 128, %s114_s4, [#allocation14]  }
  0x1b   :  { %9289 = dma.done.wait [#allocation3], 1024  }
  0x1c   :  { %9290 = vsyncadd [#allocation3], 4294966272 }
  0x1d   :  { %9291 = dma.done.wait [#allocation5], 2064  }
  0x1e   :  { %9292 = vsyncadd [#allocation5], 4294965232 }
  0x1f   :  { %9293 = dma.done.wait [#allocation8], 16416  }
  0x20   :  { %9294 = vsyncadd [#allocation8], 4294950880 }
  0x21   :  { %9295 = dma.done.wait [#allocation11], 65664  }
  0x22   :  { %9296 = vsyncadd [#allocation11], 4294901632 }
  0x23   :  { %9297 = dma.done.wait [#allocation14], 128  }
  0x24   :  { %9298 = vsyncadd [#allocation14], 4294967168  ;;  %v8347_v0 = vld [vmem:[#allocation2 + $0x38] sm:$0xff]  ;;  %v8346_v1 = vld [vmem:[#allocation2 + $0x30] sm:$0xff] }
  0x25   :  { %219 = vmatpush.bf16.msra.mxu0 %v8347_v0  ;;  %v8345_v2 = vld [vmem:[#allocation2 + $0x28] sm:$0xff]  ;;  %v8344_v3 = vld [vmem:[#allocation2 + $0x20] sm:$0xff]  ;;  %v8343_v4 = vld [vmem:[#allocation2 + $0x18] sm:$0xff] }
  0x26   :  { %v8342_v5 = vld [vmem:[#allocation2 + $0x10] sm:$0xff]  ;;  %v8341_v6 = vld [vmem:[#allocation2 + $0x8] sm:$0xff]  ;;  %v8340_v7 = vld [vmem:[#allocation2] sm:$0xff] }
  0x27   :  { %v149_v8 = vld [vmem:[%s9799_s0] sm:$0xff]  ;;  %v5756_v10 = vld [vmem:[#allocation6 + $0x70] sm:$0xf]  ;;  %v8363_v11 = vld [vmem:[#allocation6 + $0x74] sm:$0xf0] }
  0x28   :  { %v150_v9 = vpack.c.bf16 %v149_v8, %v149_v8  ;;  %v8362_v12 = vld [vmem:[#allocation6 + $0x74] sm:$0xf]  ;;  %v5757_v13 = vor.u32 %v8363_v11, %v5756_v10  ;;  %v5758_v14 = vld [vmem:[#allocation6 + $0x78] sm:$0xf0]  ;;  %v5748_v16 = vld [vmem:[#allocation6 + $0x60] sm:$0xf] }
  0x29   :  { %220 = vmatpush.bf16.msra.mxu0 %v8346_v1  ;;  %v5761_v15 = vor.u32 %v8362_v12, %v5758_v14  ;;  %v8361_v17 = vld [vmem:[#allocation6 + $0x64] sm:$0xf0]  ;;  %v8360_v18 = vld [vmem:[#allocation6 + $0x64] sm:$0xf]  ;;  %v5750_v20 = vld [vmem:[#allocation6 + $0x68] sm:$0xf0] }
  0x2a   :  { %354 = vmatpush.bf16.msra.mxu1 %v5757_v13  ;;  %v5749_v19 = vor.u32 %v8361_v17, %v5748_v16  ;;  %v5753_v21 = vor.u32 %v8360_v18, %v5750_v20  ;;  %v5740_v22 = vld [vmem:[#allocation6 + $0x50] sm:$0xf]  ;;  %v8359_v23 = vld [vmem:[#allocation6 + $0x54] sm:$0xf0]  ;;  %v8358_v24 = vld [vmem:[#allocation6 + $0x54] sm:$0xf] }
  0x2b   :  { %367 = vmatpush.bf16.msra.mxu2 %v5761_v15  ;;  %v5741_v25 = vor.u32 %v8359_v23, %v5740_v22  ;;  %v5742_v26 = vld [vmem:[#allocation6 + $0x58] sm:$0xf0]  ;;  %v5732_v28 = vld [vmem:[#allocation6 + $0x40] sm:$0xf]  ;;  %v8357_v29 = vld [vmem:[#allocation6 + $0x44] sm:$0xf0] }
  0x2c   :  { %v5745_v27 = vor.u32 %v8358_v24, %v5742_v26  ;;  %v8356_v30 = vld [vmem:[#allocation6 + $0x44] sm:$0xf]  ;;  %v5733_v31 = vor.u32 %v8357_v29, %v5732_v28  ;;  %v5734_v32 = vld [vmem:[#allocation6 + $0x48] sm:$0xf0]  ;;  %v5724_v34 = vld [vmem:[#allocation6 + $0x30] sm:$0xf] }
  0x2d   :  { %221 = vmatpush.bf16.msra.mxu0 %v8345_v2  ;;  %v5737_v33 = vor.u32 %v8356_v30, %v5734_v32  ;;  %v8355_v35 = vld [vmem:[#allocation6 + $0x34] sm:$0xf0]  ;;  %v8354_v36 = vld [vmem:[#allocation6 + $0x34] sm:$0xf]  ;;  %v5726_v38 = vld [vmem:[#allocation6 + $0x38] sm:$0xf0] }
  0x2e   :  { %355 = vmatpush.bf16.msra.mxu1 %v5749_v19  ;;  %v5725_v37 = vor.u32 %v8355_v35, %v5724_v34  ;;  %v5716_v39 = vld [vmem:[#allocation6 + $0x20] sm:$0xf]  ;;  %v8353_v40 = vld [vmem:[#allocation6 + $0x24] sm:$0xf0]  ;;  %v5729_v41 = vor.u32 %v8354_v36, %v5726_v38  ;;  %v8352_v42 = vld [vmem:[#allocation6 + $0x24] sm:$0xf] }
  0x2f   :  { %368 = vmatpush.bf16.msra.mxu2 %v5753_v21  ;;  %v5718_v43 = vld [vmem:[#allocation6 + $0x28] sm:$0xf0]  ;;  %v5717_v44 = vor.u32 %v8353_v40, %v5716_v39  ;;  %v5708_v46 = vld [vmem:[#allocation6 + $0x10] sm:$0xf]  ;;  %v8351_v47 = vld [vmem:[#allocation6 + $0x14] sm:$0xf0] }
  0x30   :  { %v5721_v45 = vor.u32 %v8352_v42, %v5718_v43  ;;  %v8350_v48 = vld [vmem:[#allocation6 + $0x14] sm:$0xf]  ;;  %v5710_v49 = vld [vmem:[#allocation6 + $0x18] sm:$0xf0]  ;;  %v5709_v50 = vor.u32 %v8351_v47, %v5708_v46  ;;  %v5700_v52 = vld [vmem:[#allocation6] sm:$0xf] }
  0x31   :  { %222 = vmatpush.bf16.msra.mxu0 %v8344_v3  ;;  %v5713_v51 = vor.u32 %v8350_v48, %v5710_v49  ;;  %v8349_v53 = vld [vmem:[#allocation6 + $0x4] sm:$0xf0]  ;;  %v8348_v54 = vld [vmem:[#allocation6 + $0x4] sm:$0xf]  ;;  %v5702_v55 = vld [vmem:[#allocation6 + $0x8] sm:$0xf0] }
  0x32   :  { %356 = vmatpush.bf16.msra.mxu1 %v5741_v25  ;;  %v5701_v56 = vor.u32 %v8349_v53, %v5700_v52  ;;  %v5705_v57 = vor.u32 %v8348_v54, %v5702_v55  ;;  %v9018_v58 = vld [vmem:[#allocation4] ss:$0 sm:$0xff]  ;;  %v5990_v61 = vld [vmem:[#allocation9 + $0x1c0] sm:$0xf]  ;;  %v8420_v63 = vld [vmem:[#allocation9 + $0x1c4] sm:$0xf] }
  0x33   :  { %369 = vmatpush.bf16.msra.mxu2 %v5745_v27  ;;  %v8424_v62 = vld [vmem:[#allocation9 + $0x1dc] sm:$0xf0]  ;;  %v5992_v1 = vld [vmem:[#allocation9 + $0x1e0] sm:$0xf0] }
  0x34   :  { %v5991_v0 = vor.u32 %v8424_v62, %v5990_v61  ;;  %v5958_v2 = vld [vmem:[#allocation9 + $0x180] sm:$0xf]  ;;  %v8484_v11 = vld [vmem:[#allocation9 + $0x3c4] sm:$0xf] }
  0x35   :  { %223 = vmatpush.bf16.msra.mxu0 %v8343_v4  ;;  %v8416_v3 = vld [vmem:[#allocation9 + $0x19c] sm:$0xf0]  ;;  %v6248_v14 = vld [vmem:[#allocation9 + $0x3e0] sm:$0xf0] }
  0x36   :  { %357 = vmatpush.bf16.msra.mxu1 %v5733_v31  ;;  %1206 = vmatpush.bf16.msra.mxu3 %v5991_v0  ;;  %v5959_v8 = vor.u32 %v8416_v3, %v5958_v2  ;;  %v8488_v10 = vld [vmem:[#allocation9 + $0x3dc] sm:$0xf0]  ;;  %v6251_v17 = vor.u32 %v8484_v11, %v6248_v14  ;;  %v8404_v18 = vld [vmem:[#allocation9 + $0x144] sm:$0xf] }
  0x37   :  { %370 = vmatpush.bf16.msra.mxu2 %v5737_v33  ;;  %v5926_v15 = vld [vmem:[#allocation9 + $0x140] sm:$0xf]  ;;  %v5928_v19 = vld [vmem:[#allocation9 + $0x160] sm:$0xf0] }
  0x38   :  { %v8408_v16 = vld [vmem:[#allocation9 + $0x15c] sm:$0xf0]  ;;  %v8476_v22 = vld [vmem:[#allocation9 + $0x384] sm:$0xf]  ;;  %v5931_v30 = vor.u32 %v8404_v18, %v5928_v19 }
  0x39   :  { %224 = vmatpush.bf16.msra.mxu0 %v8342_v5  ;;  %v5995_v5 = vor.u32 %v8420_v63, %v5992_v1  ;;  %v6214_v20 = vld [vmem:[#allocation9 + $0x380] sm:$0xf]  ;;  %v6216_v23 = vld [vmem:[#allocation9 + $0x3a0] sm:$0xf0]  ;;  %v5927_v25 = vor.u32 %v8408_v16, %v5926_v15 }
  0x3a   :  { %358 = vmatpush.bf16.msra.mxu1 %v5725_v37  ;;  %v8480_v21 = vld [vmem:[#allocation9 + $0x39c] sm:$0xf0]  ;;  %1207 = vmatpush.bf16.msra.mxu3 %v5959_v8  ;;  %v6219_v27 = vor.u32 %v8476_v22, %v6216_v23  ;;  %v8396_v31 = vld [vmem:[#allocation9 + $0x104] sm:$0xf] }
  0x3b   :  { %371 = vmatpush.bf16.msra.mxu2 %v5729_v41  ;;  %v6215_v26 = vor.u32 %v8480_v21, %v6214_v20  ;;  %v5894_v28 = vld [vmem:[#allocation9 + $0x100] sm:$0xf]  ;;  %v5896_v34 = vld [vmem:[#allocation9 + $0x120] sm:$0xf0] }
  0x3c   :  { %v8400_v29 = vld [vmem:[#allocation9 + $0x11c] sm:$0xf0]  ;;  %v8468_v35 = vld [vmem:[#allocation9 + $0x344] sm:$0xf] }
  0x3d   :  { %225 = vmatpush.bf16.msra.mxu0 %v8341_v6  ;;  %v8412_v6 = vld [vmem:[#allocation9 + $0x184] sm:$0xf]  ;;  %v6182_v32 = vld [vmem:[#allocation9 + $0x340] sm:$0xf]  ;;  %v5895_v41 = vor.u32 %v8400_v29, %v5894_v28 }
  0x3e   :  { %359 = vmatpush.bf16.msra.mxu1 %v5717_v44  ;;  %v8472_v33 = vld [vmem:[#allocation9 + $0x35c] sm:$0xf0]  ;;  %v6184_v36 = vld [vmem:[#allocation9 + $0x360] sm:$0xf0]  ;;  %1208 = vmatpush.bf16.msra.mxu3 %v5927_v25 }
  0x3f   :  { %372 = vmatpush.bf16.msra.mxu2 %v5721_v45  ;;  %v6183_v38 = vor.u32 %v8472_v33, %v6182_v32  ;;  %v5862_v39 = vld [vmem:[#allocation9 + $0xc0] sm:$0xf]  ;;  %v6187_v42 = vor.u32 %v8468_v35, %v6184_v36  ;;  %v5899_v45 = vor.u32 %v8396_v31, %v5896_v34  ;;  %v8460_v47 = vld [vmem:[#allocation9 + $0x304] sm:$0xf]  ;;  %v5998_v31 = vld [vmem:[#allocation9 + $0x1c8] sm:$0xf] }
  0x40   :  { %v6150_v43 = vld [vmem:[#allocation9 + $0x300] sm:$0xf]  ;;  %v6152_v48 = vld [vmem:[#allocation9 + $0x320] sm:$0xf0]  ;;  %v8425_v32 = vld [vmem:[#allocation9 + $0x1e4] sm:$0xf0] }
  0x41   :  { %226 = vmatpush.bf16.msra.mxu0 %v8340_v7  ;;  %v5960_v7 = vld [vmem:[#allocation9 + $0x1a0] sm:$0xf0]  ;;  %v8464_v44 = vld [vmem:[#allocation9 + $0x31c] sm:$0xf0]  ;;  %v6155_v53 = vor.u32 %v8460_v47, %v6152_v48  ;;  %v5999_v34 = vor.u32 %v8425_v32, %v5998_v31  ;;  %v8421_v35 = vld [vmem:[#allocation9 + $0x1cc] sm:$0xf] }
  0x42   :  { %360 = vmatpush.bf16.msra.mxu1 %v5709_v50  ;;  %v5963_v12 = vor.u32 %v8412_v6, %v5960_v7  ;;  %v8392_v46 = vld [vmem:[#allocation9 + $0xdc] sm:$0xf0]  ;;  %v8388_v49 = vld [vmem:[#allocation9 + $0xc4] sm:$0xf]  ;;  %1209 = vmatpush.bf16.msra.mxu3 %v5895_v41  ;;  %v6000_v36 = vld [vmem:[#allocation9 + $0x1e8] sm:$0xf0] }
  0x43   :  { %373 = vmatpush.bf16.msra.mxu2 %v5713_v51  ;;  %v5864_v50 = vld [vmem:[#allocation9 + $0xe0] sm:$0xf0]  ;;  %v6151_v51 = vor.u32 %v8464_v44, %v6150_v43  ;;  %v5863_v52 = vor.u32 %v8392_v46, %v5862_v39  ;;  %v5830_v54 = vld [vmem:[#allocation9 + $0x80] sm:$0xf]  ;;  %v5966_v44 = vld [vmem:[#allocation9 + $0x188] sm:$0xf] }
  0x44   :  { %227 = vmatmul.bf16.vlgmr.msra.gmra.mxu0 %v150_v9  ;;  %v6246_v9 = vld [vmem:[#allocation9 + $0x3c0] sm:$0xf]  ;;  %v8380_v61 = vld [vmem:[#allocation9 + $0x84] sm:$0xf]  ;;  %v8413_v47 = vld [vmem:[#allocation9 + $0x18c] sm:$0xf] }
  0x45   :  { %v6247_v13 = vor.u32 %v8488_v10, %v6246_v9  ;;  %v6118_v55 = vld [vmem:[#allocation9 + $0x2c0] sm:$0xf]  ;;  %v5832_v62 = vld [vmem:[#allocation9 + $0xa0] sm:$0xf0]  ;;  %v5968_v48 = vld [vmem:[#allocation9 + $0x1a8] sm:$0xf0] }
  0x46   :  { %361 = vmatpush.bf16.msra.mxu1 %v5701_v56  ;;  %v8456_v56 = vld [vmem:[#allocation9 + $0x2dc] sm:$0xf0]  ;;  %1210 = vmatpush.bf16.msra.mxu3 %v5863_v52  ;;  %v8372_v7 = vld [vmem:[#allocation9 + $0x44] sm:$0xf]  ;;  %v6160_v32 = vld [vmem:[#allocation9 + $0x328] sm:$0xf0] }
  0x47   :  { %374 = vmatpush.bf16.msra.mxu2 %v5705_v57  ;;  %1219 = vmatpush.bf16.msrb.mxu0 %v6247_v13  ;;  %v5867_v57 = vor.u32 %v8388_v49, %v5864_v50  ;;  %v6119_v63 = vor.u32 %v8456_v56, %v6118_v55  ;;  %v8376_v6 = vld [vmem:[#allocation9 + $0x5c] sm:$0xf0]  ;;  %v5800_v8 = vld [vmem:[#allocation9 + $0x60] sm:$0xf0]  ;;  %v5971_v50 = vor.u32 %v8413_v47, %v5968_v48  ;;  %v6254_v56 = vld [vmem:[#allocation9 + $0x3c8] sm:$0xf] }
  0x48   :  { %v5803_v14 = vor.u32 %v8372_v7, %v5800_v8  ;;  %v6086_v20 = vld [vmem:[#allocation9 + $0x280] sm:$0xf]  ;;  %v8444_v22 = vld [vmem:[#allocation9 + $0x284] sm:$0xf]  ;;  %v6224_v8 = vld [vmem:[#allocation9 + $0x3a8] sm:$0xf0] }
  0x49   :  { %v8448_v21 = vld [vmem:[#allocation9 + $0x29c] sm:$0xf0]  ;;  %v8364_v28 = vld [vmem:[#allocation9 + $0x4] sm:$0xf]  ;;  %v5806_v47 = vld [vmem:[#allocation9 + $0x48] sm:$0xf] }
  0x4a   :  { %1232 = vmatpush.bf16.msrb.mxu1 %v5995_v5  ;;  %v5798_v5 = vld [vmem:[#allocation9 + $0x40] sm:$0xf]  ;;  %v6087_v23 = vor.u32 %v8448_v21, %v6086_v20  ;;  %v6056_v41 = vld [vmem:[#allocation9 + $0x260] sm:$0xf0]  ;;  %v6192_v20 = vld [vmem:[#allocation9 + $0x368] sm:$0xf0] }
  0x4b   :  { %1245 = vmatpush.bf16.msrb.mxu2 %v6251_v17  ;;  %1220 = vmatpush.bf16.msrb.mxu0 %v6215_v26  ;;  %v5799_v11 = vor.u32 %v8376_v6, %v5798_v5  ;;  %v5766_v26 = vld [vmem:[#allocation9] sm:$0xf]  ;;  %v8428_v52 = vld [vmem:[#allocation9 + $0x204] sm:$0xf]  ;;  %v8481_v5 = vld [vmem:[#allocation9 + $0x3a4] sm:$0xf0] }
  0x4c   :  { %v8440_v39 = vld [vmem:[#allocation9 + $0x25c] sm:$0xf0]  ;;  %v8477_v6 = vld [vmem:[#allocation9 + $0x38c] sm:$0xf]  ;;  %v8377_v48 = vld [vmem:[#allocation9 + $0x64] sm:$0xf0] }
  0x4d   :  { %v6022_v49 = vld [vmem:[#allocation9 + $0x200] sm:$0xf] }
  0x4e   :  { %1233 = vmatpush.bf16.msrb.mxu1 %v5963_v12 }
  0x4f   :  { %1246 = vmatpush.bf16.msrb.mxu2 %v6219_v27  ;;  %1221 = vmatpush.bf16.msrb.mxu0 %v6183_v38  ;;  %v8368_v27 = vld [vmem:[#allocation9 + $0x1c] sm:$0xf0]  ;;  %v6003_v38 = vor.u32 %v8421_v35, %v6000_v36  ;;  %v8385_v35 = vld [vmem:[#allocation9 + $0xa4] sm:$0xf0]  ;;  %v8381_v36 = vld [vmem:[#allocation9 + $0x8c] sm:$0xf] }
  0x50   :  { %v5767_v29 = vor.u32 %v8368_v27, %v5766_v26  ;;  %v5872_v26 = vld [vmem:[#allocation9 + $0xe8] sm:$0xf0] }
  0x52   :  { %1234 = vmatpush.bf16.msrb.mxu1 %v5931_v30  ;;  %v5768_v30 = vld [vmem:[#allocation9 + $0x20] sm:$0xf0] }
  0x53   :  { %1247 = vmatpush.bf16.msrb.mxu2 %v6187_v42  ;;  %1222 = vmatpush.bf16.msrb.mxu0 %v6151_v51  ;;  %v5771_v33 = vor.u32 %v8364_v28, %v5768_v30  ;;  %v8432_v51 = vld [vmem:[#allocation9 + $0x21c] sm:$0xf0]  ;;  %v6158_v28 = vld [vmem:[#allocation9 + $0x308] sm:$0xf]  ;;  %v8461_v30 = vld [vmem:[#allocation9 + $0x30c] sm:$0xf] }
  0x56   :  { %1235 = vmatpush.bf16.msrb.mxu1 %v5899_v45  ;;  %v8417_v45 = vld [vmem:[#allocation9 + $0x1a4] sm:$0xf0] }
  0x57   :  { %1248 = vmatpush.bf16.msrb.mxu2 %v6155_v53  ;;  %1223 = vmatpush.bf16.msrb.mxu0 %v6119_v63  ;;  %v5967_v46 = vor.u32 %v8417_v45, %v5966_v44  ;;  %v6024_v53 = vld [vmem:[#allocation9 + $0x220] sm:$0xf0]  ;;  %v6128_v45 = vld [vmem:[#allocation9 + $0x2e8] sm:$0xf0] }
  0x58   :  { %v6027_v55 = vor.u32 %v8428_v52, %v6024_v53  ;;  %v6094_v53 = vld [vmem:[#allocation9 + $0x288] sm:$0xf] }
  0x5a   :  { %1236 = vmatpush.bf16.msrb.mxu1 %v5867_v57  ;;  %v8489_v57 = vld [vmem:[#allocation9 + $0x3e4] sm:$0xf0] }
  0x5b   :  { %1224 = vmatpush.bf16.msrb.mxu0 %v6087_v23  ;;  %v8393_v23 = vld [vmem:[#allocation9 + $0xe4] sm:$0xf0] }
  0xc1   :  { %v228_v59 = vpop.f32.mrf.mxu0 }
  0xc2   :  { %v229_v60 = vadd.f32 %v9018_v58, %v228_v59  ;;  %v8384_v58 = vld [vmem:[#allocation9 + $0x9c] sm:$0xf0]  ;;  %v8452_v59 = vld [vmem:[#allocation9 + $0x2c4] sm:$0xf] }
  0xc3   :  { %v5831_v1 = vor.u32 %v8384_v58, %v5830_v54  ;;  %v6023_v54 = vor.u32 %v8432_v51, %v6022_v49  ;;  %v8485_v58 = vld [vmem:[#allocation9 + $0x3cc] sm:$0xf] }
  0xc4   :  { %v5697_v4 = vmul.f32 -1.442695, %v229_v60  ;;  %v6120_v60 = vld [vmem:[#allocation9 + $0x2e0] sm:$0xf0]  ;;  %v8373_v49 = vld [vmem:[#allocation9 + $0x4c] sm:$0xf] }
  0xc5   :  { %v6123_v2 = vor.u32 %v8452_v59, %v6120_v60  ;;  %1211 = vmatpush.bf16.msra.mxu3 %v5831_v1  ;;  %v6255_v59 = vor.u32 %v8489_v57, %v6254_v56  ;;  %v6256_v60 = vld [vmem:[#allocation9 + $0x3e8] sm:$0xf0] }
  0xc6   :  { %9019 = vpow2.f32 %v5697_v4  ;;  %v5835_v4 = vor.u32 %v8380_v61, %v5832_v62  ;;  %v5934_v61 = vld [vmem:[#allocation9 + $0x148] sm:$0xf]  ;;  %v6259_v63 = vor.u32 %v8485_v58, %v6256_v60  ;;  %v8405_v1 = vld [vmem:[#allocation9 + $0x14c] sm:$0xf] }
  0xc7   :  { %1249 = vmatpush.bf16.msrb.mxu2 %v6123_v2  ;;  %v8409_v62 = vld [vmem:[#allocation9 + $0x164] sm:$0xf0]  ;;  %v5936_v2 = vld [vmem:[#allocation9 + $0x168] sm:$0xf0] }
  0xc8   :  { %1237 = vmatpush.bf16.msrb.mxu1 %v5835_v4  ;;  %v6222_v4 = vld [vmem:[#allocation9 + $0x388] sm:$0xf]  ;;  %v5808_v51 = vld [vmem:[#allocation9 + $0x68] sm:$0xf0] }
  0xc9   :  { %v230_v24 = vpop.f32.mrf.mxu0  ;;  %1212 = vmatpush.bf16.msra.mxu3 %v5799_v11  ;;  %v6223_v7 = vor.u32 %v8481_v5, %v6222_v4  ;;  %v8401_v11 = vld [vmem:[#allocation9 + $0x124] sm:$0xf0]  ;;  %v5811_v52 = vor.u32 %v8373_v49, %v5808_v51  ;;  %v6096_v58 = vld [vmem:[#allocation9 + $0x2a8] sm:$0xf0] }
  0xca   :  { %v6088_v24 = vld [vmem:[#allocation9 + $0x2a0] sm:$0xf0]  ;;  %v5774_v60 = vld [vmem:[#allocation9 + $0x8] sm:$0xf]  ;;  %v8437_v5 = vld [vmem:[#allocation9 + $0x24c] sm:$0xf] }
  0xcb   :  { %v6091_v25 = vor.u32 %v8444_v22, %v6088_v24  ;;  %v5870_v22 = vld [vmem:[#allocation9 + $0xc8] sm:$0xf]  ;;  %v8389_v24 = vld [vmem:[#allocation9 + $0xcc] sm:$0xf] }
  0xcc   :  { %v9020_v37 = vpop.eup %9019  ;;  %1238 = vmatpush.bf16.msrb.mxu1 %v5803_v14  ;;  %v5904_v14 = vld [vmem:[#allocation9 + $0x128] sm:$0xf0]  ;;  %v5875_v27 = vor.u32 %v8389_v24, %v5872_v26  ;;  %v8441_v4 = vld [vmem:[#allocation9 + $0x264] sm:$0xf0] }
  0xcd   :  { %v9390_v40 = vadd.f32 1.0, %v9020_v37  ;;  %1250 = vmatpush.bf16.msrb.mxu2 %v6091_v25  ;;  %v6054_v37 = vld [vmem:[#allocation9 + $0x240] sm:$0xf]  ;;  %1213 = vmatpush.bf16.msra.mxu3 %v5767_v29  ;;  %v5871_v25 = vor.u32 %v8393_v23, %v5870_v22  ;;  %v8465_v29 = vld [vmem:[#allocation9 + $0x324] sm:$0xf0] }
  0xce   :  { %v6055_v42 = vor.u32 %v8440_v39, %v6054_v37  ;;  %v6159_v31 = vor.u32 %v8465_v29, %v6158_v28 }
  0xcf   :  { %9021 = vrcp.f32 %v9390_v40  ;;  %v247_v10 = vand.u32 2147483648, %v9390_v40  ;;  %v245_v13 = vand.u32 2147483647, %v9390_v40  ;;  %vm241_vm1 = vweird.f32 %v9390_v40 }
  0xd0   :  { %1239 = vmatpush.bf16.msrb.mxu1 %v5771_v33  ;;  %1225 = vmatpush.bf16.msrb.mxu0 %v6055_v42  ;;  %v6163_v33 = vor.u32 %v8461_v30, %v6160_v32  ;;  %v8453_v42 = vld [vmem:[#allocation9 + $0x2cc] sm:$0xf] }
  0xd1   :  { %v248_v16 = vor.u32 1.1754944e-38, %v247_v10  ;;  %vm246_vm3 = vcmp.eq.f32.partialorder %v245_v13, 8.507059e+37  ;;  %1258 = vmatpush.bf16.msrb.mxu3 %v5999_v34  ;;  %v5902_v10 = vld [vmem:[#allocation9 + $0x108] sm:$0xf] }
  0xd2   :  { %v5903_v13 = vor.u32 %v8401_v11, %v5902_v10  ;;  %v5838_v34 = vld [vmem:[#allocation9 + $0x88] sm:$0xf] }
  0xd3   :  { %v5839_v37 = vor.u32 %v8385_v35, %v5838_v34  ;;  %v6006_v34 = vld [vmem:[#allocation9 + $0x1d0] sm:$0xf] }
  0xd4   :  { %1226 = vmatpush.bf16.msrb.mxu0 %v6023_v54  ;;  %v8449_v54 = vld [vmem:[#allocation9 + $0x2a4] sm:$0xf0] }
  0xd5   :  { %v9022_v0 = vpop.eup %9021  ;;  %1259 = vmatpush.bf16.msrb.mxu3 %v5967_v46  ;;  %v6131_v46 = vor.u32 %v8453_v42, %v6128_v45  ;;  %v6095_v57 = vor.u32 %v8449_v54, %v6094_v53  ;;  %v5976_v53 = vld [vmem:[#allocation9 + $0x1b0] sm:$0xf0]  ;;  %v6262_v54 = vld [vmem:[#allocation9 + $0x3d0] sm:$0xf] }
  0xd6   :  { %v237_v3 = vmul.f32 %v9022_v0, %v9390_v40  ;;  %vm242_vm0 = vweird.f32 %v9022_v0  ;;  %v8436_v40 = vld [vmem:[#allocation9 + $0x244] sm:$0xf] }
  0xd7   :  { %vm243_vm2 = vmor %vm241_vm1, %vm242_vm0  ;;  %v6059_v43 = vor.u32 %v8436_v40, %v6056_v41  ;;  %v6126_v40 = vld [vmem:[#allocation9 + $0x2c8] sm:$0xf] }
  0xd8   :  { %v238_v9 = vsub.f32 1.0, %v237_v3  ;;  %1271 = vmatpush.bf16.msra.mxu0 %v6255_v59  ;;  %v5939_v3 = vor.u32 %v8405_v1, %v5936_v2  ;;  %v8457_v41 = vld [vmem:[#allocation9 + $0x2e4] sm:$0xf0] }
  0xd9   :  { %1251 = vmatpush.bf16.msrb.mxu2 %v6059_v43  ;;  %v268_v43 = vld [vmem:[#allocation7] sm:$0x3]  ;;  %v6127_v44 = vor.u32 %v8457_v41, %v6126_v40 }
  0xda   :  { %v239_v12 = vmul.f32 %v9022_v0, %v238_v9  ;;  %v6227_v9 = vor.u32 %v8477_v6, %v6224_v8  ;;  %v270_v56 = vperm.slane %v268_v43, 0  ;;  %v6064_v8 = vld [vmem:[#allocation9 + $0x268] sm:$0xf0]  ;;  %v271_v11 = vperm.slane %v268_v43, 1 }
  0xdc   :  { %v240_v15 = vadd.f32 %v9022_v0, %v239_v12  ;;  %v8397_v12 = vld [vmem:[#allocation9 + $0x10c] sm:$0xf]  ;;  %1272 = vmatpush.bf16.msra.mxu0 %v6223_v7 }
  0xdd   :  { %1252 = vmatpush.bf16.msrb.mxu2 %v6027_v55  ;;  %v8445_v55 = vld [vmem:[#allocation9 + $0x28c] sm:$0xf] }
  0xde   :  { %v244_v17 = vsel %vm243_vm2, %v9022_v0, %v240_v15  ;;  %v5935_v0 = vor.u32 %v8409_v62, %v5934_v61  ;;  %v5907_v15 = vor.u32 %v8397_v12, %v5904_v14  ;;  %v6099_v59 = vor.u32 %v8445_v55, %v6096_v58  ;;  %v8369_v61 = vld [vmem:[#allocation9 + $0x24] sm:$0xf0]  ;;  %v8365_v62 = vld [vmem:[#allocation9 + $0xc] sm:$0xf]  ;;  %v6264_v58 = vld [vmem:[#allocation9 + $0x3f0] sm:$0xf0] }
  0xdf   :  { %v249_v18 = vsel %vm246_vm3, %v248_v16, %v244_v17  ;;  %v6190_v16 = vld [vmem:[#allocation9 + $0x348] sm:$0xf]  ;;  %v8429_v14 = vld [vmem:[#allocation9 + $0x20c] sm:$0xf] }
  0xe0   :  { %v251_v19 = vpack.c.bf16 %v249_v18, %v249_v18  ;;  %1260 = vmatpush.bf16.msrb.mxu3 %v5935_v0  ;;  %v8473_v17 = vld [vmem:[#allocation9 + $0x364] sm:$0xf0]  ;;  %v8469_v18 = vld [vmem:[#allocation9 + $0x34c] sm:$0xf] }
  0xe1   :  { %v6195_v21 = vor.u32 %v8469_v18, %v6192_v20  ;;  %v5776_v0 = vld [vmem:[#allocation9 + $0x28] sm:$0xf0]  ;;  %v6030_v12 = vld [vmem:[#allocation9 + $0x208] sm:$0xf] }
  0xe2   :  { %362 = vmatmul.bf16.vlgmr.msra.gmra.mxu1 %v251_v19  ;;  %375 = vmatmul.bf16.vlgmr.msra.gmra.mxu2 %v251_v19  ;;  %v6191_v19 = vor.u32 %v8473_v17, %v6190_v16  ;;  %v5779_v1 = vor.u32 %v8365_v62, %v5776_v0  ;;  %v5942_v62 = vld [vmem:[#allocation9 + $0x150] sm:$0xf] }
  0xe3   :  { %1284 = vmatpush.bf16.msra.mxu1 %v6003_v38  ;;  %1297 = vmatpush.bf16.msra.mxu2 %v6259_v63  ;;  %v5840_v38 = vld [vmem:[#allocation9 + $0xa8] sm:$0xf0]  ;;  %v5775_v63 = vor.u32 %v8369_v61, %v5774_v60 }
  0xe4   :  { %1261 = vmatpush.bf16.msrb.mxu3 %v5903_v13  ;;  %1273 = vmatpush.bf16.msra.mxu0 %v6191_v19  ;;  %v5843_v39 = vor.u32 %v8381_v36, %v5840_v38  ;;  %v8433_v13 = vld [vmem:[#allocation9 + $0x224] sm:$0xf0]  ;;  %v8422_v38 = vld [vmem:[#allocation9 + $0x1d4] sm:$0xf] }
  0xe5   :  { %v6031_v17 = vor.u32 %v8433_v13, %v6030_v12  ;;  %v5910_v13 = vld [vmem:[#allocation9 + $0x110] sm:$0xf] }
  0xe7   :  { %1285 = vmatpush.bf16.msra.mxu1 %v5971_v50  ;;  %1298 = vmatpush.bf16.msra.mxu2 %v6227_v9  ;;  %v5807_v50 = vor.u32 %v8377_v48, %v5806_v47  ;;  %v6067_v9 = vor.u32 %v8437_v5, %v6064_v8  ;;  %v5974_v47 = vld [vmem:[#allocation9 + $0x190] sm:$0xf] }
  0xe8   :  { %1262 = vmatpush.bf16.msrb.mxu3 %v5871_v25  ;;  %1274 = vmatpush.bf16.msra.mxu0 %v6159_v31  ;;  %v8418_v48 = vld [vmem:[#allocation9 + $0x1ac] sm:$0xf0] }
  0xe9   :  { %v5975_v60 = vor.u32 %v8418_v48, %v5974_v47  ;;  %v8482_v8 = vld [vmem:[#allocation9 + $0x3ac] sm:$0xf0] }
  0xeb   :  { %1286 = vmatpush.bf16.msra.mxu1 %v5939_v3  ;;  %1299 = vmatpush.bf16.msra.mxu2 %v6195_v21  ;;  %v6062_v3 = vld [vmem:[#allocation9 + $0x248] sm:$0xf] }
  0xec   :  { %1263 = vmatpush.bf16.msrb.mxu3 %v5839_v37  ;;  %1275 = vmatpush.bf16.msra.mxu0 %v6127_v44  ;;  %v6063_v7 = vor.u32 %v8441_v4, %v6062_v3  ;;  %v8426_v37 = vld [vmem:[#allocation9 + $0x1ec] sm:$0xf0] }
  0xed   :  { %v6007_v45 = vor.u32 %v8426_v37, %v6006_v34  ;;  %v6168_v34 = vld [vmem:[#allocation9 + $0x330] sm:$0xf0]  ;;  %v5846_v37 = vld [vmem:[#allocation9 + $0x90] sm:$0xf] }
  0xef   :  { %1287 = vmatpush.bf16.msra.mxu1 %v5907_v15  ;;  %1300 = vmatpush.bf16.msra.mxu2 %v6163_v33  ;;  %v6032_v15 = vld [vmem:[#allocation9 + $0x228] sm:$0xf0] }
  0xf0   :  { %1264 = vmatpush.bf16.msrb.mxu3 %v5807_v50  ;;  %1276 = vmatpush.bf16.msra.mxu0 %v6095_v57  ;;  %v6035_v18 = vor.u32 %v8429_v14, %v6032_v15  ;;  %v8486_v57 = vld [vmem:[#allocation9 + $0x3d4] sm:$0xf]  ;;  %v8402_v14 = vld [vmem:[#allocation9 + $0x12c] sm:$0xf0] }
  0xf1   :  { %v6267_v5 = vor.u32 %v8486_v57, %v6264_v58  ;;  %v8398_v15 = vld [vmem:[#allocation9 + $0x114] sm:$0xf]  ;;  %v8450_v57 = vld [vmem:[#allocation9 + $0x2ac] sm:$0xf0] }
  0xf2   :  { %v8446_v58 = vld [vmem:[#allocation9 + $0x294] sm:$0xf] }
  0xf3   :  { %1288 = vmatpush.bf16.msra.mxu1 %v5875_v27  ;;  %1301 = vmatpush.bf16.msra.mxu2 %v6131_v46 }
  0xf4   :  { %1265 = vmatpush.bf16.msrb.mxu3 %v5775_v63  ;;  %1277 = vmatpush.bf16.msra.mxu0 %v6063_v7  ;;  %v8410_v63 = vld [vmem:[#allocation9 + $0x16c] sm:$0xf0] }
  0xf7   :  { %1289 = vmatpush.bf16.msra.mxu1 %v5843_v39  ;;  %1302 = vmatpush.bf16.msra.mxu2 %v6099_v59  ;;  %v6008_v39 = vld [vmem:[#allocation9 + $0x1f0] sm:$0xf0] }
  0xf8   :  { %1278 = vmatpush.bf16.msra.mxu0 %v6031_v17  ;;  %v6011_v46 = vor.u32 %v8422_v38, %v6008_v39  ;;  %v8386_v38 = vld [vmem:[#allocation9 + $0xac] sm:$0xf0]  ;;  %v8382_v39 = vld [vmem:[#allocation9 + $0x94] sm:$0xf] }
  0xf9   :  { %v5847_v47 = vor.u32 %v8386_v38, %v5846_v37  ;;  %v8407_v37 = vld [vmem:[#allocation9 + $0x15c] sm:$0xf] }
  0xfa   :  { %v5952_v38 = vld [vmem:[#allocation9 + $0x178] sm:$0xf0] }
  0xfb   :  { %1290 = vmatpush.bf16.msra.mxu1 %v5811_v52  ;;  %1303 = vmatpush.bf16.msra.mxu2 %v6067_v9  ;;  %v8414_v52 = vld [vmem:[#allocation9 + $0x194] sm:$0xf] }
  0xfc   :  { %v5979_v61 = vor.u32 %v8414_v52, %v5976_v53  ;;  %v8478_v9 = vld [vmem:[#allocation9 + $0x394] sm:$0xf] }
  0xfd   :  { %v8374_v52 = vld [vmem:[#allocation9 + $0x54] sm:$0xf] }
  0xfe   :  { %v5816_v53 = vld [vmem:[#allocation9 + $0x70] sm:$0xf0] }
  0xff   :  { %1291 = vmatpush.bf16.msra.mxu1 %v5779_v1  ;;  %1304 = vmatpush.bf16.msra.mxu2 %v6035_v18  ;;  %v8406_v1 = vld [vmem:[#allocation9 + $0x154] sm:$0xf] }
 0x15f   :  { %v363_v2 = vpop.f32.mrf.mxu1 }
 0x160   :  { %v364_v6 = vadd.f32 %v363_v2, %v270_v56  ;;  %v8490_v56 = vld [vmem:[#allocation9 + $0x3ec] sm:$0xf0]  ;;  %v5944_v2 = vld [vmem:[#allocation9 + $0x170] sm:$0xf0] }
 0x161   :  { %v6263_v4 = vor.u32 %v8490_v56, %v6262_v54  ;;  %v5947_v12 = vor.u32 %v8406_v1, %v5944_v2  ;;  %v6102_v56 = vld [vmem:[#allocation9 + $0x290] sm:$0xf]  ;;  %v5784_v1 = vld [vmem:[#allocation9 + $0x30] sm:$0xf0]  ;;  %v6014_v2 = vld [vmem:[#allocation9 + $0x1d8] sm:$0xf] }
 0x162   :  { %v5762_v10 = vmul.f32 -1.442695, %v364_v6  ;;  %v6230_v6 = vld [vmem:[#allocation9 + $0x390] sm:$0xf] }
 0x163   :  { %v6231_v17 = vor.u32 %v8482_v8, %v6230_v6  ;;  %v8423_v6 = vld [vmem:[#allocation9 + $0x1dc] sm:$0xf] }
 0x164   :  { %9023 = vpow2.f32 %v5762_v10  ;;  %v6232_v10 = vld [vmem:[#allocation9 + $0x3b0] sm:$0xf0]  ;;  %v6016_v8 = vld [vmem:[#allocation9 + $0x1f8] sm:$0xf0] }
 0x165   :  { %v376_v16 = vpop.f32.mrf.mxu2  ;;  %v6235_v18 = vor.u32 %v8478_v9, %v6232_v10  ;;  %v6070_v9 = vld [vmem:[#allocation9 + $0x250] sm:$0xf] }
 0x166   :  { %v377_v19 = vadd.f32 %v376_v16, %v271_v11  ;;  %v5943_v11 = vor.u32 %v8410_v63, %v5942_v62  ;;  %v5912_v16 = vld [vmem:[#allocation9 + $0x130] sm:$0xf0]  ;;  %v5782_v62 = vld [vmem:[#allocation9 + $0x10] sm:$0xf] }
 0x167   :  { %v365_v20 = vpop.f32.mrf.mxu1  ;;  %v8370_v63 = vld [vmem:[#allocation9 + $0x2c] sm:$0xf0] }
 0x168   :  { %v5763_v21 = vmul.f32 -1.442695, %v377_v19  ;;  %v6198_v19 = vld [vmem:[#allocation9 + $0x350] sm:$0xf] }
 0x169   :  { %v8474_v20 = vld [vmem:[#allocation9 + $0x36c] sm:$0xf0] }
 0x16a   :  { %v9024_v22 = vpop.eup %9023  ;;  %9025 = vpow2.f32 %v5763_v21  ;;  %v8470_v21 = vld [vmem:[#allocation9 + $0x354] sm:$0xf]  ;;  %v8442_v10 = vld [vmem:[#allocation9 + $0x26c] sm:$0xf0] }
 0x16b   :  { %v386_v23 = vadd.f32 1.0, %v9024_v22  ;;  %v6200_v22 = vld [vmem:[#allocation9 + $0x370] sm:$0xf0] }
 0x16d   :  { %9027 = vrcp.f32 %v386_v23  ;;  %v378_v24 = vpop.f32.mrf.mxu2  ;;  %v399_v30 = vand.u32 2147483648, %v386_v23  ;;  %v397_v32 = vand.u32 2147483647, %v386_v23  ;;  %vm393_vm5 = vweird.f32 %v386_v23 }
 0x16e   :  { %v5915_v24 = vor.u32 %v8398_v15, %v5912_v16  ;;  %v6019_v16 = vor.u32 %v8423_v6, %v6016_v8 }
 0x16f   :  { %v400_v40 = vor.u32 1.1754944e-38, %v399_v30  ;;  %vm398_vm7 = vcmp.eq.f32.partialorder %v397_v32, 8.507059e+37  ;;  %v6203_v30 = vor.u32 %v8470_v21, %v6200_v22  ;;  %v8466_v32 = vld [vmem:[#allocation9 + $0x32c] sm:$0xf0]  ;;  %v5984_v22 = vld [vmem:[#allocation9 + $0x1b8] sm:$0xf0] }
 0x170   :  { %v9026_v25 = vpop.eup %9025 }
 0x171   :  { %v387_v26 = vadd.f32 1.0, %v9026_v25  ;;  %v5878_v25 = vld [vmem:[#allocation9 + $0xd0] sm:$0xf] }
 0x173   :  { %v9028_v27 = vpop.eup %9027  ;;  %9029 = vrcp.f32 %v387_v26  ;;  %v414_v44 = vand.u32 2147483648, %v387_v26  ;;  %v412_v51 = vand.u32 2147483647, %v387_v26  ;;  %vm408_vm9 = vweird.f32 %v387_v26 }
 0x174   :  { %v389_v28 = vmul.f32 %v9028_v27, %v386_v23  ;;  %vm394_vm4 = vweird.f32 %v9028_v27  ;;  %v5911_v23 = vor.u32 %v8402_v14, %v5910_v13  ;;  %v5783_v13 = vor.u32 %v8370_v63, %v5782_v62  ;;  %v8391_v62 = vld [vmem:[#allocation9 + $0xdc] sm:$0xf] }
 0x175   :  { %vm395_vm6 = vmor %vm393_vm5, %vm394_vm4  ;;  %v415_v59 = vor.u32 1.1754944e-38, %v414_v44  ;;  %vm413_vm11 = vcmp.eq.f32.partialorder %v412_v51, 8.507059e+37  ;;  %v8458_v44 = vld [vmem:[#allocation9 + $0x2ec] sm:$0xf0]  ;;  %v5888_v63 = vld [vmem:[#allocation9 + $0xf8] sm:$0xf0] }
 0x176   :  { %v390_v29 = vsub.f32 1.0, %v389_v28  ;;  %v5880_v28 = vld [vmem:[#allocation9 + $0xf0] sm:$0xf0]  ;;  %v8378_v51 = vld [vmem:[#allocation9 + $0x6c] sm:$0xf0]  ;;  %v5891_v8 = vor.u32 %v8391_v62, %v5888_v63 }
 0x177   :  { %v6446_v63 = vld [vmem:[#allocation12 + $0x140] sm:$0xf] }
 0x178   :  { %v391_v31 = vmul.f32 %v9028_v27, %v390_v29  ;;  %v6199_v29 = vor.u32 %v8474_v20, %v6198_v19  ;;  %v8415_v19 = vld [vmem:[#allocation9 + $0x19c] sm:$0xf]  ;;  %v6071_v20 = vor.u32 %v8442_v10, %v6070_v9  ;;  %v5854_v9 = vld [vmem:[#allocation9 + $0x98] sm:$0xf] }
 0x179   :  { %v9030_v33 = vpop.eup %9029  ;;  %v8387_v10 = vld [vmem:[#allocation9 + $0xb4] sm:$0xf0] }
 0x17a   :  { %v392_v35 = vadd.f32 %v9028_v27, %v391_v31  ;;  %v404_v36 = vmul.f32 %v9030_v33, %v387_v26  ;;  %vm409_vm8 = vweird.f32 %v9030_v33  ;;  %v8394_v26 = vld [vmem:[#allocation9 + $0xec] sm:$0xf0] }
 0x17b   :  { %vm410_vm10 = vmor %vm408_vm9, %vm409_vm8  ;;  %v6166_v31 = vld [vmem:[#allocation9 + $0x310] sm:$0xf] }
 0x17c   :  { %v396_v41 = vsel %vm395_vm6, %v9028_v27, %v392_v35  ;;  %v405_v42 = vsub.f32 1.0, %v404_v36  ;;  %v8390_v27 = vld [vmem:[#allocation9 + $0xd4] sm:$0xf]  ;;  %v5879_v35 = vor.u32 %v8394_v26, %v5878_v25 }
 0x17d   :  { %v401_v43 = vsel %vm398_vm7, %v400_v40, %v396_v41  ;;  %v5883_v36 = vor.u32 %v8390_v27, %v5880_v28  ;;  %v5848_v40 = vld [vmem:[#allocation9 + $0xb0] sm:$0xf0]  ;;  %v6167_v41 = vor.u32 %v8466_v32, %v6166_v31  ;;  %v6270_v27 = vld [vmem:[#allocation9 + $0x3d8] sm:$0xf]  ;;  %v5987_v32 = vor.u32 %v8415_v19, %v5984_v22 }
 0x17e   :  { %v9397_v49 = vpack.c.bf16 %v401_v43, %v401_v43  ;;  %v406_v50 = vmul.f32 %v9030_v33, %v405_v42  ;;  %v6134_v43 = vld [vmem:[#allocation9 + $0x2d0] sm:$0xf]  ;;  %v5851_v48 = vor.u32 %v8382_v39, %v5848_v40  ;;  %v8430_v25 = vld [vmem:[#allocation9 + $0x214] sm:$0xf]  ;;  %v8491_v28 = vld [vmem:[#allocation9 + $0x3f4] sm:$0xf0]  ;;  %v5855_v19 = vor.u32 %v8387_v10, %v5854_v9 }
 0x17f   :  { %v6135_v54 = vor.u32 %v8458_v44, %v6134_v43  ;;  %v6040_v26 = vld [vmem:[#allocation9 + $0x230] sm:$0xf0]  ;;  %v6271_v39 = vor.u32 %v8491_v28, %v6270_v27  ;;  %v8479_v43 = vld [vmem:[#allocation9 + $0x39c] sm:$0xf]  ;;  %v8379_v22 = vld [vmem:[#allocation9 + $0x74] sm:$0xf0] }
 0x180   :  { %v407_v55 = vadd.f32 %v9030_v33, %v406_v50  ;;  %1214 = vmatmul.bf16.vlgmr.msra.gmra.mxu3 %v9397_v49  ;;  %1240 = vmatmul.bf16.vlgmr.msrb.gmra.mxu1 %v9397_v49  ;;  %v5814_v50 = vld [vmem:[#allocation9 + $0x50] sm:$0xf]  ;;  %v6240_v44 = vld [vmem:[#allocation9 + $0x3b8] sm:$0xf0]  ;;  %v6110_v27 = vld [vmem:[#allocation9 + $0x298] sm:$0xf] }
 0x181   :  { %1310 = vmatpush.bf16.msra.mxu3 %v6007_v45  ;;  %1336 = vmatpush.bf16.msrb.mxu1 %v6011_v46  ;;  %v8454_v45 = vld [vmem:[#allocation9 + $0x2d4] sm:$0xf]  ;;  %v8451_v28 = vld [vmem:[#allocation9 + $0x2b4] sm:$0xf0]  ;;  %v8600_v9 = vld [vmem:[#allocation12 + $0x35c] sm:$0xf0] }
 0x182   :  { %v411_v0 = vsel %vm410_vm10, %v9030_v33, %v407_v55  ;;  %v8462_v33 = vld [vmem:[#allocation9 + $0x314] sm:$0xf] }
 0x183   :  { %v416_v3 = vsel %vm413_vm11, %v415_v59, %v411_v0  ;;  %v6171_v42 = vor.u32 %v8462_v33, %v6168_v34  ;;  %v6136_v46 = vld [vmem:[#allocation9 + $0x2f0] sm:$0xf0]  ;;  %v5950_v33 = vld [vmem:[#allocation9 + $0x158] sm:$0xf] }
 0x184   :  { %v9401_v7 = vpack.c.bf16 %v416_v3, %v416_v3  ;;  %v6139_v55 = vor.u32 %v8454_v45, %v6136_v46  ;;  %v6104_v59 = vld [vmem:[#allocation9 + $0x2b0] sm:$0xf0]  ;;  %v8427_v3 = vld [vmem:[#allocation9 + $0x1f4] sm:$0xf0]  ;;  %v5955_v46 = vor.u32 %v8407_v37, %v5952_v38  ;;  %v6111_v37 = vor.u32 %v8451_v28, %v6110_v27  ;;  %v6286_v28 = vld [vmem:[#allocation12] sm:$0xf] }
 0x185   :  { %1311 = vmatpush.bf16.msra.mxu3 %v5975_v60  ;;  %1337 = vmatpush.bf16.msrb.mxu1 %v5979_v61  ;;  %v5815_v60 = vor.u32 %v8378_v51, %v5814_v50  ;;  %v5819_v61 = vor.u32 %v8374_v52, %v5816_v53  ;;  %v8366_v0 = vld [vmem:[#allocation9 + $0x14] sm:$0xf]  ;;  %v6015_v15 = vor.u32 %v8427_v3, %v6014_v2  ;;  %v8399_v50 = vld [vmem:[#allocation9 + $0x11c] sm:$0xf]  ;;  %v6174_v2 = vld [vmem:[#allocation9 + $0x318] sm:$0xf] }
 0x186   :  { %1227 = vmatmul.bf16.vlgmr.msrb.gmra.mxu0 %v9401_v7  ;;  %1253 = vmatmul.bf16.vlgmr.msrb.gmra.mxu2 %v9401_v7  ;;  %v5787_v14 = vor.u32 %v8366_v0, %v5784_v1  ;;  %v5920_v51 = vld [vmem:[#allocation9 + $0x138] sm:$0xf0]  ;;  %v6243_v53 = vor.u32 %v8479_v43, %v6240_v44  ;;  %v8467_v3 = vld [vmem:[#allocation9 + $0x334] sm:$0xf0] }
 0x187   :  { %1323 = vmatpush.bf16.msrb.mxu0 %v6263_v4  ;;  %1349 = vmatpush.bf16.msrb.mxu2 %v6267_v5  ;;  %v6103_v4 = vor.u32 %v8450_v57, %v6102_v56  ;;  %v6107_v5 = vor.u32 %v8446_v58, %v6104_v59  ;;  %v8471_v56 = vld [vmem:[#allocation9 + $0x35c] sm:$0xf]  ;;  %v5923_v59 = vor.u32 %v8399_v50, %v5920_v51  ;;  %v6046_v51 = vld [vmem:[#allocation9 + $0x218] sm:$0xf] }
 0x188   :  { %v6208_v57 = vld [vmem:[#allocation9 + $0x378] sm:$0xf0] }
 0x189   :  { %1312 = vmatpush.bf16.msra.mxu3 %v5943_v11  ;;  %1338 = vmatpush.bf16.msrb.mxu1 %v5947_v12  ;;  %v8438_v11 = vld [vmem:[#allocation9 + $0x254] sm:$0xf]  ;;  %v6211_v1 = vor.u32 %v8471_v56, %v6208_v57  ;;  %v8439_v43 = vld [vmem:[#allocation9 + $0x25c] sm:$0xf]  ;;  %v6766_v57 = vld [vmem:[#allocation12 + $0x3c0] sm:$0xf] }
 0x18a   :  { %v6072_v12 = vld [vmem:[#allocation9 + $0x270] sm:$0xf0]  ;;  %v6080_v44 = vld [vmem:[#allocation9 + $0x278] sm:$0xf0] }
 0x18b   :  { %1324 = vmatpush.bf16.msrb.mxu0 %v6231_v17  ;;  %1350 = vmatpush.bf16.msrb.mxu2 %v6235_v18  ;;  %v5982_v17 = vld [vmem:[#allocation9 + $0x198] sm:$0xf]  ;;  %v6075_v21 = vor.u32 %v8438_v11, %v6072_v12  ;;  %v8383_v11 = vld [vmem:[#allocation9 + $0x9c] sm:$0xf]  ;;  %v6083_v50 = vor.u32 %v8439_v43, %v6080_v44  ;;  %v6990_v43 = vld [vmem:[#allocation12 + $0x580] sm:$0xf] }
 0x18c   :  { %v8419_v18 = vld [vmem:[#allocation9 + $0x1b4] sm:$0xf0]  ;;  %v5856_v12 = vld [vmem:[#allocation9 + $0xb8] sm:$0xf0]  ;;  %v8672_v44 = vld [vmem:[#allocation12 + $0x59c] sm:$0xf0] }
 0x18d   :  { %1313 = vmatpush.bf16.msra.mxu3 %v5911_v23  ;;  %1339 = vmatpush.bf16.msrb.mxu1 %v5915_v24  ;;  %v6038_v23 = vld [vmem:[#allocation9 + $0x210] sm:$0xf]  ;;  %v5983_v31 = vor.u32 %v8419_v18, %v5982_v17  ;;  %v8455_v17 = vld [vmem:[#allocation9 + $0x2dc] sm:$0xf] }
 0x18e   :  { %v8434_v24 = vld [vmem:[#allocation9 + $0x22c] sm:$0xf0]  ;;  %v6144_v18 = vld [vmem:[#allocation9 + $0x2f8] sm:$0xf0] }
 0x18f   :  { %1325 = vmatpush.bf16.msrb.mxu0 %v6199_v29  ;;  %1351 = vmatpush.bf16.msrb.mxu2 %v6203_v30  ;;  %v8487_v29 = vld [vmem:[#allocation9 + $0x3dc] sm:$0xf]  ;;  %v6039_v34 = vor.u32 %v8434_v24, %v6038_v23 }
 0x190   :  { %1266 = vmatmul.bf16.vlgmr.msrb.gmra.mxu3 %v9397_v49  ;;  %1292 = vmatmul.bf16.vlgmr.msra.gmra.mxu1 %v9397_v49  ;;  %v6272_v30 = vld [vmem:[#allocation9 + $0x3f8] sm:$0xf0] }
 0x191   :  { %1314 = vmatpush.bf16.msra.mxu3 %v5879_v35  ;;  %1340 = vmatpush.bf16.msrb.mxu1 %v5883_v36  ;;  %v6043_v35 = vor.u32 %v8430_v25, %v6040_v26  ;;  %v8411_v36 = vld [vmem:[#allocation9 + $0x174] sm:$0xf0]  ;;  %v6275_v40 = vor.u32 %v8487_v29, %v6272_v30  ;;  %v8375_v23 = vld [vmem:[#allocation9 + $0x5c] sm:$0xf]  ;;  %v6147_v26 = vor.u32 %v8455_v17, %v6144_v18  ;;  %v6350_v17 = vld [vmem:[#allocation12 + $0x80] sm:$0xf] }
 0x192   :  { %v5951_v45 = vor.u32 %v8411_v36, %v5950_v33  ;;  %v5824_v24 = vld [vmem:[#allocation9 + $0x78] sm:$0xf0]  ;;  %v5790_v33 = vld [vmem:[#allocation9 + $0x18] sm:$0xf]  ;;  %v8512_v18 = vld [vmem:[#allocation12 + $0x9c] sm:$0xf0] }
 0x193   :  { %1326 = vmatpush.bf16.msrb.mxu0 %v6167_v41  ;;  %1352 = vmatpush.bf16.msrb.mxu2 %v6171_v42  ;;  %v6238_v41 = vld [vmem:[#allocation9 + $0x398] sm:$0xf]  ;;  %v8447_v29 = vld [vmem:[#allocation9 + $0x29c] sm:$0xf] }
 0x194   :  { %v8483_v42 = vld [vmem:[#allocation9 + $0x3b4] sm:$0xf0]  ;;  %v6112_v30 = vld [vmem:[#allocation9 + $0x2b8] sm:$0xf0] }
 0x195   :  { %1315 = vmatpush.bf16.msra.mxu3 %v5847_v47  ;;  %1341 = vmatpush.bf16.msrb.mxu1 %v5851_v48  ;;  %v5918_v47 = vld [vmem:[#allocation9 + $0x118] sm:$0xf]  ;;  %v6239_v52 = vor.u32 %v8483_v42, %v6238_v41  ;;  %v5792_v36 = vld [vmem:[#allocation9 + $0x38] sm:$0xf0]  ;;  %v6115_v38 = vor.u32 %v8447_v29, %v6112_v30  ;;  %v8552_v41 = vld [vmem:[#allocation12 + $0x1dc] sm:$0xf0] }
 0x196   :  { %1279 = vmatmul.bf16.vlgmr.msra.gmra.mxu0 %v9401_v7  ;;  %1305 = vmatmul.bf16.vlgmr.msra.gmra.mxu2 %v9401_v7  ;;  %v8403_v48 = vld [vmem:[#allocation9 + $0x134] sm:$0xf0]  ;;  %v6048_v56 = vld [vmem:[#allocation9 + $0x238] sm:$0xf0]  ;;  %v8496_v29 = vld [vmem:[#allocation12 + $0x1c] sm:$0xf0] }
 0x197   :  { %1327 = vmatpush.bf16.msrb.mxu0 %v6135_v54  ;;  %1353 = vmatpush.bf16.msrb.mxu2 %v6139_v55  ;;  %v6206_v54 = vld [vmem:[#allocation9 + $0x358] sm:$0xf]  ;;  %v5919_v58 = vor.u32 %v8403_v48, %v5918_v47  ;;  %v6574_v30 = vld [vmem:[#allocation12 + $0x240] sm:$0xf] }
 0x198   :  { %v8475_v55 = vld [vmem:[#allocation9 + $0x374] sm:$0xf0] }
 0x199   :  { %1316 = vmatpush.bf16.msra.mxu3 %v5815_v60  ;;  %1342 = vmatpush.bf16.msrb.mxu1 %v5819_v61  ;;  %v5886_v60 = vld [vmem:[#allocation9 + $0xd8] sm:$0xf]  ;;  %v6207_v0 = vor.u32 %v8475_v55, %v6206_v54  ;;  %v8431_v55 = vld [vmem:[#allocation9 + $0x21c] sm:$0xf] }
 0x19a   :  { %v8395_v61 = vld [vmem:[#allocation9 + $0xf4] sm:$0xf0] }
 0x19b   :  { %1328 = vmatpush.bf16.msrb.mxu0 %v6103_v4  ;;  %1354 = vmatpush.bf16.msrb.mxu2 %v6107_v5  ;;  %v8463_v4 = vld [vmem:[#allocation9 + $0x31c] sm:$0xf]  ;;  %v5887_v6 = vor.u32 %v8395_v61, %v5886_v60  ;;  %v8443_v42 = vld [vmem:[#allocation9 + $0x274] sm:$0xf0]  ;;  %v6051_v61 = vor.u32 %v8431_v55, %v6048_v56  ;;  %v6958_v56 = vld [vmem:[#allocation12 + $0x540] sm:$0xf] }
 0x19c   :  { %v6176_v5 = vld [vmem:[#allocation9 + $0x338] sm:$0xf0]  ;;  %v8435_v54 = vld [vmem:[#allocation9 + $0x234] sm:$0xf0] }
 0x19d   :  { %1317 = vmatpush.bf16.msra.mxu3 %v5783_v13  ;;  %1343 = vmatpush.bf16.msrb.mxu1 %v5787_v14  ;;  %v6175_v13 = vor.u32 %v8467_v3, %v6174_v2  ;;  %v6179_v14 = vor.u32 %v8463_v4, %v6176_v5  ;;  %v6047_v60 = vor.u32 %v8435_v54, %v6046_v51  ;;  %v8608_v2 = vld [vmem:[#allocation12 + $0x39c] sm:$0xf0] }
 0x19e   :  { %v6414_v5 = vld [vmem:[#allocation12 + $0x100] sm:$0xf] }
 0x19f   :  { %1329 = vmatpush.bf16.msrb.mxu0 %v6071_v20  ;;  %1355 = vmatpush.bf16.msrb.mxu2 %v6075_v21  ;;  %v5859_v20 = vor.u32 %v8383_v11, %v5856_v12  ;;  %v5822_v21 = vld [vmem:[#allocation9 + $0x58] sm:$0xf]  ;;  %v6382_v11 = vld [vmem:[#allocation12 + $0xc0] sm:$0xf] }
 0x1a0   :  { %1318 = vmatmul.bf16.vlgmr.msra.gmra.mxu3 %v9397_v49  ;;  %1344 = vmatmul.bf16.vlgmr.msrb.gmra.mxu1 %v9397_v49  ;;  %v8520_v12 = vld [vmem:[#allocation12 + $0xdc] sm:$0xf0] }
 0x1a1   :  { %1362 = vmatpush.bf16.msrb.mxu3 %v6015_v15  ;;  %1388 = vmatpush.bf16.msra.mxu1 %v6019_v16  ;;  %v6142_v15 = vld [vmem:[#allocation9 + $0x2d8] sm:$0xf]  ;;  %v8872_v54 = vld [vmem:[#allocation12 + $0xbdc] sm:$0xf0] }
 0x1a2   :  { %v8459_v16 = vld [vmem:[#allocation9 + $0x2f4] sm:$0xf0] }
 0x1a3   :  { %1330 = vmatpush.bf16.msrb.mxu0 %v6039_v34  ;;  %1356 = vmatpush.bf16.msrb.mxu2 %v6043_v35  ;;  %v6143_v25 = vor.u32 %v8459_v16, %v6142_v15  ;;  %v8371_v34 = vld [vmem:[#allocation9 + $0x34] sm:$0xf0]  ;;  %v8367_v35 = vld [vmem:[#allocation9 + $0x1c] sm:$0xf]  ;;  %v8592_v15 = vld [vmem:[#allocation12 + $0x31c] sm:$0xf0] }
 0x1a5   :  { %1363 = vmatpush.bf16.msrb.mxu3 %v5983_v31  ;;  %1389 = vmatpush.bf16.msra.mxu1 %v5987_v32  ;;  %v5823_v31 = vor.u32 %v8379_v22, %v5822_v21  ;;  %v5827_v32 = vor.u32 %v8375_v23, %v5824_v24  ;;  %v8584_v21 = vld [vmem:[#allocation12 + $0x2dc] sm:$0xf0] }
 0x1a6   :  { %1331 = vmatmul.bf16.vlgmr.msrb.gmra.mxu0 %v9401_v7  ;;  %1357 = vmatmul.bf16.vlgmr.msrb.gmra.mxu2 %v9401_v7  ;;  %v6318_v22 = vld [vmem:[#allocation12 + $0x40] sm:$0xf] }
 0x1a7   :  { %1375 = vmatpush.bf16.msra.mxu0 %v6271_v39  ;;  %1401 = vmatpush.bf16.msra.mxu2 %v6275_v40  ;;  %v6078_v39 = vld [vmem:[#allocation9 + $0x258] sm:$0xf]  ;;  %v6510_v40 = vld [vmem:[#allocation12 + $0x1c0] sm:$0xf] }
 0x1a8   :  { %v6511_v47 = vor.u32 %v8552_v41, %v6510_v40  ;;  %v6079_v48 = vor.u32 %v8443_v42, %v6078_v39  ;;  %v8504_v23 = vld [vmem:[#allocation12 + $0x5c] sm:$0xf0] }
 0x1a9   :  { %1364 = vmatpush.bf16.msrb.mxu3 %v5951_v45  ;;  %1390 = vmatpush.bf16.msra.mxu1 %v5955_v46  ;;  %v5791_v45 = vor.u32 %v8371_v34, %v5790_v33  ;;  %v5795_v46 = vor.u32 %v8367_v35, %v5792_v36  ;;  %v6606_v24 = vld [vmem:[#allocation12 + $0x280] sm:$0xf] }
 0x1aa   :  { %v7022_v33 = vld [vmem:[#allocation12 + $0x5c0] sm:$0xf] }
 0x1ab   :  { %1376 = vmatpush.bf16.msra.mxu0 %v6239_v52  ;;  %1402 = vmatpush.bf16.msra.mxu2 %v6243_v53  ;;  %v6478_v52 = vld [vmem:[#allocation12 + $0x180] sm:$0xf] }
 0x1ac   :  { %v8544_v53 = vld [vmem:[#allocation12 + $0x19c] sm:$0xf0] }
 0x1ad   :  { %1365 = vmatpush.bf16.msrb.mxu3 %v5919_v58  ;;  %1391 = vmatpush.bf16.msra.mxu1 %v5923_v59  ;;  %v8616_v58 = vld [vmem:[#allocation12 + $0x3dc] sm:$0xf0]  ;;  %v6479_v59 = vor.u32 %v8544_v53, %v6478_v52 }
 0x1ae   :  { %v6767_v62 = vor.u32 %v8616_v58, %v6766_v57  ;;  %v8680_v34 = vld [vmem:[#allocation12 + $0x5dc] sm:$0xf0] }
 0x1af   :  { %1377 = vmatpush.bf16.msra.mxu0 %v6207_v0  ;;  %1403 = vmatpush.bf16.msra.mxu2 %v6211_v1  ;;  %v8536_v0 = vld [vmem:[#allocation12 + $0x15c] sm:$0xf0]  ;;  %v7023_v36 = vor.u32 %v8680_v34, %v7022_v33 }
 0x1b0   :  { %v6734_v1 = vld [vmem:[#allocation12 + $0x380] sm:$0xf]  ;;  %v6447_v3 = vor.u32 %v8536_v0, %v6446_v63 }
 0x1b1   :  { %1366 = vmatpush.bf16.msrb.mxu3 %v5887_v6  ;;  %1392 = vmatpush.bf16.msra.mxu1 %v5891_v8  ;;  %v6735_v4 = vor.u32 %v8608_v2, %v6734_v1  ;;  %v8528_v6 = vld [vmem:[#allocation12 + $0x11c] sm:$0xf0] }
 0x1b2   :  { %v6702_v8 = vld [vmem:[#allocation12 + $0x340] sm:$0xf] }
 0x1b3   :  { %1378 = vmatpush.bf16.msra.mxu0 %v6175_v13  ;;  %1404 = vmatpush.bf16.msra.mxu2 %v6179_v14  ;;  %v6703_v10 = vor.u32 %v8600_v9, %v6702_v8  ;;  %v6670_v13 = vld [vmem:[#allocation12 + $0x300] sm:$0xf]  ;;  %v6383_v14 = vor.u32 %v8520_v12, %v6382_v11 }
 0x1b4   :  { %v6671_v16 = vor.u32 %v8592_v15, %v6670_v13  ;;  %v6542_v40 = vld [vmem:[#allocation12 + $0x200] sm:$0xf] }
 0x1b5   :  { %1367 = vmatpush.bf16.msrb.mxu3 %v5855_v19  ;;  %1393 = vmatpush.bf16.msra.mxu1 %v5859_v20  ;;  %v6638_v19 = vld [vmem:[#allocation12 + $0x2c0] sm:$0xf]  ;;  %v6351_v20 = vor.u32 %v8512_v18, %v6350_v17 }
 0x1b6   :  { %v8560_v41 = vld [vmem:[#allocation12 + $0x21c] sm:$0xf0] }
 0x1b7   :  { %1379 = vmatpush.bf16.msra.mxu0 %v6143_v25  ;;  %1405 = vmatpush.bf16.msra.mxu2 %v6147_v26  ;;  %v6319_v25 = vor.u32 %v8504_v23, %v6318_v22  ;;  %v8576_v26 = vld [vmem:[#allocation12 + $0x29c] sm:$0xf0]  ;;  %v6543_v42 = vor.u32 %v8560_v41, %v6542_v40 }
 0x1b8   :  { %v6607_v27 = vor.u32 %v8576_v26, %v6606_v24  ;;  %v7790_v53 = vld [vmem:[#allocation12 + $0xbc0] sm:$0xf] }
 0x1b9   :  { %1368 = vmatpush.bf16.msrb.mxu3 %v5823_v31  ;;  %1394 = vmatpush.bf16.msra.mxu1 %v5827_v32  ;;  %v6287_v31 = vor.u32 %v8496_v29, %v6286_v28  ;;  %v8568_v32 = vld [vmem:[#allocation12 + $0x25c] sm:$0xf0]  ;;  %v7791_v55 = vor.u32 %v8872_v54, %v7790_v53 }
 0x1ba   :  { %v6575_v35 = vor.u32 %v8568_v32, %v6574_v30  ;;  %v8664_v57 = vld [vmem:[#allocation12 + $0x55c] sm:$0xf0] }
 0x1bb   :  { %1380 = vmatpush.bf16.msra.mxu0 %v6111_v37  ;;  %1406 = vmatpush.bf16.msra.mxu2 %v6115_v38  ;;  %v7534_v37 = vld [vmem:[#allocation12 + $0x9c0] sm:$0xf] }
 0x1bc   :  { %v8808_v38 = vld [vmem:[#allocation12 + $0x9dc] sm:$0xf0] }
 0x1bd   :  { %1369 = vmatpush.bf16.msrb.mxu3 %v5791_v45  ;;  %1395 = vmatpush.bf16.msra.mxu1 %v5795_v46  ;;  %v7535_v39 = vor.u32 %v8808_v38, %v7534_v37  ;;  %v7278_v45 = vld [vmem:[#allocation12 + $0x7c0] sm:$0xf]  ;;  %v6991_v46 = vor.u32 %v8672_v44, %v6990_v43 }
 0x1be   :  { %v7246_v58 = vld [vmem:[#allocation12 + $0x780] sm:$0xf] }
 0x1bf   :  { %1381 = vmatpush.bf16.msra.mxu0 %v6079_v48  ;;  %1407 = vmatpush.bf16.msra.mxu2 %v6083_v50  ;;  %v7502_v48 = vld [vmem:[#allocation12 + $0x980] sm:$0xf] }
 0x1c0   :  { %1370 = vmatmul.bf16.vlgmr.msrb.gmra.mxu3 %v9397_v49  ;;  %1396 = vmatmul.bf16.vlgmr.msra.gmra.mxu1 %v9397_v49  ;;  %v6415_v49 = vor.u32 %v8528_v6, %v6414_v5  ;;  %v8800_v50 = vld [vmem:[#allocation12 + $0x99c] sm:$0xf0] }
 0x1c1   :  { %4664 = vmatpush.bf16.msra.mxu3 %v6511_v47  ;;  %4690 = vmatpush.bf16.msrb.mxu1 %v7023_v36  ;;  %v8744_v47 = vld [vmem:[#allocation12 + $0x7dc] sm:$0xf0]  ;;  %v7503_v52 = vor.u32 %v8800_v50, %v7502_v48 }
 0x1c2   :  { %v7279_v51 = vor.u32 %v8744_v47, %v7278_v45  ;;  %v7758_v1 = vld [vmem:[#allocation12 + $0xb80] sm:$0xf] }
 0x1c3   :  { %1382 = vmatpush.bf16.msra.mxu0 %v6047_v60  ;;  %1408 = vmatpush.bf16.msra.mxu2 %v6051_v61  ;;  %v8736_v60 = vld [vmem:[#allocation12 + $0x79c] sm:$0xf0] }
 0x1c4   :  { %v7470_v61 = vld [vmem:[#allocation12 + $0x940] sm:$0xf]  ;;  %v7247_v63 = vor.u32 %v8736_v60, %v7246_v58 }
 0x1c5   :  { %4665 = vmatpush.bf16.msra.mxu3 %v6479_v59  ;;  %4691 = vmatpush.bf16.msrb.mxu1 %v6991_v46  ;;  %v6959_v59 = vor.u32 %v8664_v57, %v6958_v56  ;;  %v8864_v2 = vld [vmem:[#allocation12 + $0xb9c] sm:$0xf0] }
 0x1c6   :  { %1383 = vmatmul.bf16.vlgmr.msra.gmra.mxu0 %v9401_v7  ;;  %1409 = vmatmul.bf16.vlgmr.msra.gmra.mxu2 %v9401_v7  ;;  %v6639_v7 = vor.u32 %v8584_v21, %v6638_v19  ;;  %v8656_v5 = vld [vmem:[#allocation12 + $0x51c] sm:$0xf0] }
 0x1c7   :  { %4677 = vmatpush.bf16.msrb.mxu0 %v6767_v62  ;;  %4703 = vmatpush.bf16.msrb.mxu2 %v7279_v51  ;;  %v8792_v62 = vld [vmem:[#allocation12 + $0x95c] sm:$0xf0] }
 0x1c8   :  { %v7471_v0 = vor.u32 %v8792_v62, %v7470_v61  ;;  %v7214_v6 = vld [vmem:[#allocation12 + $0x740] sm:$0xf] }
 0x1c9   :  { %4666 = vmatpush.bf16.msra.mxu3 %v6447_v3  ;;  %v7759_v3 = vor.u32 %v8864_v2, %v7758_v1  ;;  %4692 = vmatpush.bf16.msrb.mxu1 %v6959_v59  ;;  %v8728_v9 = vld [vmem:[#allocation12 + $0x75c] sm:$0xf0] }
 0x1ca   :  { %v7215_v11 = vor.u32 %v8728_v9, %v7214_v6  ;;  %v7726_v13 = vld [vmem:[#allocation12 + $0xb40] sm:$0xf] }
 0x1cb   :  { %4678 = vmatpush.bf16.msrb.mxu0 %v6735_v4  ;;  %v6926_v4 = vld [vmem:[#allocation12 + $0x500] sm:$0xf]  ;;  %4704 = vmatpush.bf16.msrb.mxu2 %v7247_v63 }
 0x1cc   :  { %v6927_v8 = vor.u32 %v8656_v5, %v6926_v4  ;;  %v8648_v17 = vld [vmem:[#allocation12 + $0x4dc] sm:$0xf0] }
 0x1cd   :  { %4667 = vmatpush.bf16.msra.mxu3 %v6415_v49  ;;  %v7438_v49 = vld [vmem:[#allocation12 + $0x900] sm:$0xf] }
 0x1ce   :  { %4693 = vmatpush.bf16.msrb.mxu1 %v6927_v8  ;;  %v7182_v18 = vld [vmem:[#allocation12 + $0x700] sm:$0xf] }
 0x1cf   :  { %4679 = vmatpush.bf16.msrb.mxu0 %v6703_v10  ;;  %v8784_v10 = vld [vmem:[#allocation12 + $0x91c] sm:$0xf0]  ;;  %4705 = vmatpush.bf16.msrb.mxu2 %v7215_v11 }
 0x1d0   :  { %v7439_v12 = vor.u32 %v8784_v10, %v7438_v49  ;;  %v7406_v21 = vld [vmem:[#allocation12 + $0x8c0] sm:$0xf] }
 0x1d1   :  { %4668 = vmatpush.bf16.msra.mxu3 %v6383_v14  ;;  %v8856_v14 = vld [vmem:[#allocation12 + $0xb5c] sm:$0xf0] }
 0x1d2   :  { %v7727_v15 = vor.u32 %v8856_v14, %v7726_v13  ;;  %v7694_v24 = vld [vmem:[#allocation12 + $0xb00] sm:$0xf] }
 0x1d3   :  { %4680 = vmatpush.bf16.msrb.mxu0 %v6671_v16  ;;  %v6894_v16 = vld [vmem:[#allocation12 + $0x4c0] sm:$0xf] }
 0x1d4   :  { %v6895_v19 = vor.u32 %v8648_v17, %v6894_v16  ;;  %v6862_v29 = vld [vmem:[#allocation12 + $0x480] sm:$0xf] }
 0x1d5   :  { %4669 = vmatpush.bf16.msra.mxu3 %v6351_v20  ;;  %v8720_v20 = vld [vmem:[#allocation12 + $0x71c] sm:$0xf0] }
 0x1d6   :  { %v7183_v22 = vor.u32 %v8720_v20, %v7182_v18  ;;  %4694 = vmatpush.bf16.msrb.mxu1 %v6895_v19  ;;  %v8640_v30 = vld [vmem:[#allocation12 + $0x49c] sm:$0xf0] }
 0x1d7   :  { %4681 = vmatpush.bf16.msrb.mxu0 %v6639_v7  ;;  %v8776_v7 = vld [vmem:[#allocation12 + $0x8dc] sm:$0xf0] }
 0x1d8   :  { %v7407_v23 = vor.u32 %v8776_v7, %v7406_v21  ;;  %4706 = vmatpush.bf16.msrb.mxu2 %v7183_v22  ;;  %v7150_v32 = vld [vmem:[#allocation12 + $0x6c0] sm:$0xf] }
 0x1d9   :  { %4670 = vmatpush.bf16.msra.mxu3 %v6319_v25  ;;  %v8848_v25 = vld [vmem:[#allocation12 + $0xb1c] sm:$0xf0] }
 0x1da   :  { %v7695_v26 = vor.u32 %v8848_v25, %v7694_v24  ;;  %v8712_v33 = vld [vmem:[#allocation12 + $0x6dc] sm:$0xf0] }
 0x1db   :  { %4682 = vmatpush.bf16.msrb.mxu0 %v6607_v27  ;;  %v9417_v27 = vld [vmem:[#allocation10] sm:$0xff]  ;;  %v7374_v34 = vld [vmem:[#allocation12 + $0x880] sm:$0xf] }
 0x1dc   :  { %v8768_v36 = vld [vmem:[#allocation12 + $0x89c] sm:$0xf0]  ;;  %v551_v56 = vperm.slane %v9417_v27, 1 }
 0x1dd   :  { %4671 = vmatpush.bf16.msra.mxu3 %v6287_v31  ;;  %v6863_v31 = vor.u32 %v8640_v30, %v6862_v29  ;;  %v7662_v37 = vld [vmem:[#allocation12 + $0xac0] sm:$0xf]  ;;  %v7375_v40 = vor.u32 %v8768_v36, %v7374_v34  ;;  %v552_v36 = vperm.slane %v9417_v27, 2 }
 0x1de   :  { %v8840_v38 = vld [vmem:[#allocation12 + $0xadc] sm:$0xf0] }
 0x1df   :  { %4683 = vmatpush.bf16.msrb.mxu0 %v6575_v35  ;;  %v7151_v35 = vor.u32 %v8712_v33, %v7150_v32  ;;  %v7663_v41 = vor.u32 %v8840_v38, %v7662_v37  ;;  %4695 = vmatpush.bf16.msrb.mxu1 %v6863_v31  ;;  %v8632_v43 = vld [vmem:[#allocation12 + $0x45c] sm:$0xf0] }
 0x1e0   :  { %v7118_v44 = vld [vmem:[#allocation12 + $0x680] sm:$0xf] }
 0x1e1   :  { %4716 = vmatpush.bf16.msrb.mxu3 %v7535_v39  ;;  %v550_v39 = vperm.slane %v9417_v27, 0  ;;  %4707 = vmatpush.bf16.msrb.mxu2 %v7151_v35  ;;  %v8704_v46 = vld [vmem:[#allocation12 + $0x69c] sm:$0xf0] }
 0x1e2   :  { %v7342_v47 = vld [vmem:[#allocation12 + $0x840] sm:$0xf] }
 0x1e3   :  { %4684 = vmatpush.bf16.msrb.mxu0 %v6543_v42  ;;  %v6830_v42 = vld [vmem:[#allocation12 + $0x440] sm:$0xf] }
 0x1e4   :  { %v6831_v45 = vor.u32 %v8632_v43, %v6830_v42  ;;  %v8760_v48 = vld [vmem:[#allocation12 + $0x85c] sm:$0xf0]  ;;  %v553_v42 = vperm.slane %v9417_v27, 3 }
 0x1e5   :  { %4717 = vmatpush.bf16.msrb.mxu3 %v7503_v52  ;;  %v7119_v52 = vor.u32 %v8704_v46, %v7118_v44  ;;  %v7343_v53 = vor.u32 %v8760_v48, %v7342_v47  ;;  %v7630_v54 = vld [vmem:[#allocation12 + $0xa80] sm:$0xf] }
 0x1e6   :  { %4696 = vmatpush.bf16.msrb.mxu1 %v6831_v45  ;;  %v6798_v60 = vld [vmem:[#allocation12 + $0x400] sm:$0xf] }
 0x1e7   :  { %4729 = vmatpush.bf16.msra.mxu0 %v7791_v55  ;;  %v8832_v55 = vld [vmem:[#allocation12 + $0xa9c] sm:$0xf0]  ;;  %4708 = vmatpush.bf16.msrb.mxu2 %v7119_v52 }
 0x1e8   :  { %v7631_v58 = vor.u32 %v8832_v55, %v7630_v54  ;;  %v8624_v61 = vld [vmem:[#allocation12 + $0x41c] sm:$0xf0] }
 0x1e9   :  { %4718 = vmatpush.bf16.msrb.mxu3 %v7471_v0  ;;  %v7086_v62 = vld [vmem:[#allocation12 + $0x640] sm:$0xf]  ;;  %v6799_v0 = vor.u32 %v8624_v61, %v6798_v60 }
 0x1ea   :  { %v8696_v1 = vld [vmem:[#allocation12 + $0x65c] sm:$0xf0] }
 0x1eb   :  { %4730 = vmatpush.bf16.msra.mxu0 %v7759_v3  ;;  %v7310_v2 = vld [vmem:[#allocation12 + $0x800] sm:$0xf]  ;;  %v7087_v4 = vor.u32 %v8696_v1, %v7086_v62  ;;  %4697 = vmatpush.bf16.msrb.mxu1 %v6799_v0 }
 0x1ec   :  { %v8752_v3 = vld [vmem:[#allocation12 + $0x81c] sm:$0xf0] }
 0x1ed   :  { %4719 = vmatpush.bf16.msrb.mxu3 %v7439_v12  ;;  %v7311_v5 = vor.u32 %v8752_v3, %v7310_v2  ;;  %v7598_v6 = vld [vmem:[#allocation12 + $0xa40] sm:$0xf]  ;;  %4709 = vmatpush.bf16.msrb.mxu2 %v7087_v4 }
 0x1ee   :  { %v8824_v8 = vld [vmem:[#allocation12 + $0xa5c] sm:$0xf0] }
 0x1ef   :  { %4731 = vmatpush.bf16.msra.mxu0 %v7727_v15  ;;  %v8046_v9 = vld [vmem:[#allocation12 + $0xdc0] sm:$0xf]  ;;  %v7599_v11 = vor.u32 %v8824_v8, %v7598_v6 }
 0x1f0   :  { %v8936_v12 = vld [vmem:[#allocation12 + $0xddc] sm:$0xf0] }
 0x1f1   :  { %4720 = vmatpush.bf16.msrb.mxu3 %v7407_v23  ;;  %v8047_v14 = vor.u32 %v8936_v12, %v8046_v9  ;;  %v7054_v16 = vld [vmem:[#allocation12 + $0x600] sm:$0xf] }
 0x1f2   :  { %v8688_v17 = vld [vmem:[#allocation12 + $0x61c] sm:$0xf0] }
 0x1f3   :  { %4732 = vmatpush.bf16.msra.mxu0 %v7695_v26  ;;  %4742 = vmatpush.bf16.msra.mxu1 %v8047_v14  ;;  %v7055_v20 = vor.u32 %v8688_v17, %v7054_v16  ;;  %v7566_v21 = vld [vmem:[#allocation12 + $0xa00] sm:$0xf]  ;;  %v554_v17 = vperm.slane %v9417_v27, 4 }
 0x1f4   :  { %v8816_v7 = vld [vmem:[#allocation12 + $0xa1c] sm:$0xf0] }
 0x1f5   :  { %4721 = vmatpush.bf16.msrb.mxu3 %v7375_v40  ;;  %v8014_v22 = vld [vmem:[#allocation12 + $0xd80] sm:$0xf]  ;;  %v7567_v24 = vor.u32 %v8816_v7, %v7566_v21  ;;  %4710 = vmatpush.bf16.msrb.mxu2 %v7055_v20  ;;  %v8548_v21 = vld [vmem:[#allocation12 + $0x1c4] sm:$0xf] }
 0x1f6   :  { %v8928_v25 = vld [vmem:[#allocation12 + $0xd9c] sm:$0xf0]  ;;  %v6512_v7 = vld [vmem:[#allocation12 + $0x1e0] sm:$0xf0] }
 0x1f7   :  { %4733 = vmatpush.bf16.msra.mxu0 %v7663_v41  ;;  %v8302_v26 = vld [vmem:[#allocation12 + $0xfc0] sm:$0xf]  ;;  %v8015_v29 = vor.u32 %v8928_v25, %v8014_v22 }
 0x1f8   :  { %v9000_v30 = vld [vmem:[#allocation12 + $0xfdc] sm:$0xf0] }
 0x1f9   :  { %4722 = vmatpush.bf16.msrb.mxu3 %v7343_v53  ;;  %v8303_v31 = vor.u32 %v9000_v30, %v8302_v26  ;;  %4743 = vmatpush.bf16.msra.mxu1 %v8015_v29  ;;  %v7982_v32 = vld [vmem:[#allocation12 + $0xd40] sm:$0xf] }
 0x1fa   :  { %v8920_v33 = vld [vmem:[#allocation12 + $0xd5c] sm:$0xf0] }
 0x1fb   :  { %4734 = vmatpush.bf16.msra.mxu0 %v7631_v58  ;;  %v8270_v34 = vld [vmem:[#allocation12 + $0xf80] sm:$0xf]  ;;  %4755 = vmatpush.bf16.msra.mxu2 %v8303_v31  ;;  %v7983_v37 = vor.u32 %v8920_v33, %v7982_v32 }
 0x1fc   :  { %v8992_v38 = vld [vmem:[#allocation12 + $0xf9c] sm:$0xf0] }
 0x1fd   :  { %v1241_v28 = vpop.f32.mrf.mxu1  ;;  %4723 = vmatpush.bf16.msrb.mxu3 %v7311_v5  ;;  %v8271_v41 = vor.u32 %v8992_v38, %v8270_v34  ;;  %4744 = vmatpush.bf16.msra.mxu1 %v7983_v37  ;;  %v7950_v45 = vld [vmem:[#allocation12 + $0xd00] sm:$0xf] }
 0x1fe   :  { %v1242_v49 = vadd.f32 %v1241_v28, %v551_v56  ;;  %v8912_v48 = vld [vmem:[#allocation12 + $0xd1c] sm:$0xf0] }
 0x1ff   :  { %4735 = vmatpush.bf16.msra.mxu0 %v7599_v11  ;;  %4756 = vmatpush.bf16.msra.mxu2 %v8271_v41  ;;  %v7951_v54 = vor.u32 %v8912_v48, %v7950_v45  ;;  %v8904_v60 = vld [vmem:[#allocation12 + $0xcdc] sm:$0xf0]  ;;  %v8540_v41 = vld [vmem:[#allocation12 + $0x184] sm:$0xf]  ;;  %v6515_v45 = vor.u32 %v8548_v21, %v6512_v7 }
 0x200   :  { %v8206_v61 = vld [vmem:[#allocation12 + $0xf00] sm:$0xf]  ;;  %v8524_v7 = vld [vmem:[#allocation12 + $0x104] sm:$0xf] }
 0x201   :  { %4745 = vmatpush.bf16.msra.mxu1 %v7951_v54  ;;  %v8976_v1 = vld [vmem:[#allocation12 + $0xf1c] sm:$0xf0] }
 0x202   :  { %v8207_v8 = vor.u32 %v8976_v1, %v8206_v61  ;;  %v7886_v9 = vld [vmem:[#allocation12 + $0xc80] sm:$0xf]  ;;  %v555_v61 = vperm.slane %v9417_v27, 5 }
 0x203   :  { %v1215_v50 = vpop.f32.mrf.mxu3  ;;  %v1228_v51 = vpop.f32.mrf.mxu0  ;;  %4736 = vmatpush.bf16.msra.mxu0 %v7567_v24  ;;  %v8888_v24 = vld [vmem:[#allocation12 + $0xc5c] sm:$0xf0] }
 0x204   :  { %v1216_v57 = vadd.f32 %v1215_v50, %v550_v39  ;;  %v8238_v50 = vld [vmem:[#allocation12 + $0xf40] sm:$0xf] }
 0x205   :  { %v1243_v59 = vpop.f32.mrf.mxu1  ;;  %v8142_v31 = vld [vmem:[#allocation12 + $0xe80] sm:$0xf] }
 0x206   :  { %v1229_v63 = vadd.f32 %v1228_v51, %v1216_v57  ;;  %v8984_v51 = vld [vmem:[#allocation12 + $0xf5c] sm:$0xf0] }
 0x207   :  { %v8239_v56 = vor.u32 %v8984_v51, %v8238_v50  ;;  %v7918_v57 = vld [vmem:[#allocation12 + $0xcc0] sm:$0xf] }
 0x208   :  { %v6276_v10 = vmul.f32 -1.442695, %v1229_v63  ;;  %v7919_v0 = vor.u32 %v8904_v60, %v7918_v57  ;;  %v8960_v32 = vld [vmem:[#allocation12 + $0xe9c] sm:$0xf0] }
 0x209   :  { %v1254_v13 = vpop.f32.mrf.mxu2  ;;  %4757 = vmatpush.bf16.msra.mxu2 %v8239_v56  ;;  %v8143_v37 = vor.u32 %v8960_v32, %v8142_v31  ;;  %v8880_v48 = vld [vmem:[#allocation12 + $0xc1c] sm:$0xf0]  ;;  %v6768_v56 = vld [vmem:[#allocation12 + $0x3e0] sm:$0xf0] }
 0x20a   :  { %9031 = vpow2.f32 %v6276_v10  ;;  %v1255_v15 = vadd.f32 %v1254_v13, %v1242_v49  ;;  %4746 = vmatpush.bf16.msra.mxu1 %v7919_v0  ;;  %v8896_v49 = vld [vmem:[#allocation12 + $0xc9c] sm:$0xf0] }
 0x20b   :  { %v1217_v18 = vpop.f32.mrf.mxu3  ;;  %v1230_v19 = vpop.f32.mrf.mxu0  ;;  %v7887_v12 = vor.u32 %v8896_v49, %v7886_v9  ;;  %v8174_v13 = vld [vmem:[#allocation12 + $0xec0] sm:$0xf]  ;;  %v8604_v49 = vld [vmem:[#allocation12 + $0x384] sm:$0xf] }
 0x20c   :  { %v6277_v23 = vmul.f32 -1.442695, %v1255_v15  ;;  %v8968_v18 = vld [vmem:[#allocation12 + $0xedc] sm:$0xf0] }
 0x20d   :  { %v1293_v28 = vpop.f32.mrf.mxu1  ;;  %4758 = vmatpush.bf16.msra.mxu2 %v8207_v8  ;;  %v8175_v22 = vor.u32 %v8968_v18, %v8174_v13  ;;  %v8110_v57 = vld [vmem:[#allocation12 + $0xe40] sm:$0xf] }
 0x20e   :  { %9033 = vpow2.f32 %v6277_v23  ;;  %v1294_v58 = vadd.f32 %v1293_v28, %v553_v42  ;;  %4747 = vmatpush.bf16.msra.mxu1 %v7887_v12  ;;  %v7854_v23 = vld [vmem:[#allocation12 + $0xc40] sm:$0xf]  ;;  %v6480_v42 = vld [vmem:[#allocation12 + $0x1a0] sm:$0xf0] }
 0x20f   :  { %v7855_v30 = vor.u32 %v8888_v24, %v7854_v23  ;;  %v8078_v13 = vld [vmem:[#allocation12 + $0xe00] sm:$0xf]  ;;  %v8596_v23 = vld [vmem:[#allocation12 + $0x344] sm:$0xf] }
 0x210   :  { %v9032_v35 = vpop.eup %9031  ;;  %v8944_v18 = vld [vmem:[#allocation12 + $0xe1c] sm:$0xf0] }
 0x211   :  { %v9422_v39 = vadd.f32 1.0, %v9032_v35  ;;  %v1256_v40 = vpop.f32.mrf.mxu2  ;;  %4759 = vmatpush.bf16.msra.mxu2 %v8175_v22  ;;  %v6416_v22 = vld [vmem:[#allocation12 + $0x120] sm:$0xf0]  ;;  %v8079_v24 = vor.u32 %v8944_v18, %v8078_v13 }
 0x212   :  { %4748 = vmatpush.bf16.msra.mxu1 %v7855_v30  ;;  %v6320_v13 = vld [vmem:[#allocation12 + $0x60] sm:$0xf0] }
 0x213   :  { %9035 = vrcp.f32 %v9422_v39  ;;  %v1267_v43 = vpop.f32.mrf.mxu3  ;;  %v1280_v44 = vpop.f32.mrf.mxu0  ;;  %v1455_v4 = vand.u32 2147483647, %v9422_v39  ;;  %v1457_v15 = vand.u32 2147483648, %v9422_v39  ;;  %vm1451_vm13 = vweird.f32 %v9422_v39 }
 0x214   :  { %v9034_v46 = vpop.eup %9033  ;;  %v1268_v47 = vadd.f32 %v1267_v43, %v552_v36 }
 0x215   :  { %v9426_v52 = vadd.f32 1.0, %v9034_v46  ;;  %v1295_v53 = vpop.f32.mrf.mxu1  ;;  %vm9440_vm14 = vcmp.eq.f32.partialorder %v1455_v4, 8.507059e+37  ;;  %v1458_v33 = vor.u32 1.1754944e-38, %v1457_v15  ;;  %v8612_v46 = vld [vmem:[#allocation12 + $0x3c4] sm:$0xf]  ;;  %4760 = vmatpush.bf16.msra.mxu2 %v8143_v37 }
 0x216   :  { %v1281_v55 = vadd.f32 %v1280_v44, %v1268_v47  ;;  %v7822_v47 = vld [vmem:[#allocation12 + $0xc00] sm:$0xf]  ;;  %v6771_v4 = vor.u32 %v8612_v46, %v6768_v56  ;;  %v8516_v37 = vld [vmem:[#allocation12 + $0xc4] sm:$0xf] }
 0x217   :  { %9037 = vrcp.f32 %v9426_v52  ;;  %v1472_v34 = vand.u32 2147483648, %v9426_v52  ;;  %v1470_v40 = vand.u32 2147483647, %v9426_v52  ;;  %vm1466_vm1 = vweird.f32 %v9426_v52 }
 0x218   :  { %v6278_v59 = vmul.f32 -1.442695, %v1281_v55 }
 0x219   :  { %v9036_v62 = vpop.eup %9035  ;;  %v1306_v63 = vpop.f32.mrf.mxu2  ;;  %vm1471_vm3 = vcmp.eq.f32.partialorder %v1470_v40, 8.507059e+37 }
 0x21a   :  { %v1447_v2 = vmul.f32 %v9036_v62, %v9422_v39  ;;  %9039 = vpow2.f32 %v6278_v59  ;;  %v1307_v3 = vadd.f32 %v1306_v63, %v1294_v58  ;;  %vm1452_vm12 = vweird.f32 %v9036_v62  ;;  %v8952_v58 = vld [vmem:[#allocation12 + $0xe5c] sm:$0xf0] }
 0x21b   :  { %v1269_v5 = vpop.f32.mrf.mxu3  ;;  %v1282_v6 = vpop.f32.mrf.mxu0  ;;  %vm1453_vm15 = vmor %vm1451_vm13, %vm1452_vm12  ;;  %v1473_v59 = vor.u32 1.1754944e-38, %v1472_v34  ;;  %v7823_v63 = vor.u32 %v8880_v48, %v7822_v47  ;;  %v8111_v1 = vor.u32 %v8952_v58, %v8110_v57  ;;  %v6419_v34 = vor.u32 %v8524_v7, %v6416_v22  ;;  %v8676_v47 = vld [vmem:[#allocation12 + $0x5c4] sm:$0xf] }
 0x21c   :  { %v1448_v10 = vsub.f32 1.0, %v1447_v2  ;;  %v6279_v11 = vmul.f32 -1.442695, %v1307_v3  ;;  %v6483_v3 = vor.u32 %v8540_v41, %v6480_v42  ;;  %v8532_v5 = vld [vmem:[#allocation12 + $0x144] sm:$0xf] }
 0x21d   :  { %v9431_v14 = vpop.eup %9037  ;;  %v9434_v16 = vpop.f32.mrf.mxu1  ;;  %v6448_v6 = vld [vmem:[#allocation12 + $0x160] sm:$0xf0]  ;;  %4749 = vmatpush.bf16.msra.mxu1 %v7823_v63  ;;  %4761 = vmatpush.bf16.msra.mxu2 %v8111_v1 }
 0x21e   :  { %v1449_v19 = vmul.f32 %v9036_v62, %v1448_v10  ;;  %v1462_v20 = vmul.f32 %v9431_v14, %v9426_v52  ;;  %9041 = vpow2.f32 %v6279_v11  ;;  %vm1467_vm0 = vweird.f32 %v9431_v14  ;;  %v6736_v10 = vld [vmem:[#allocation12 + $0x3a0] sm:$0xf0] }
 0x21f   :  { %vm1468_vm2 = vmor %vm1466_vm1, %vm1467_vm0  ;;  %v1346_v12 = vadd.f32 %v9434_v16, %v555_v61  ;;  %v6739_v21 = vor.u32 %v8604_v49, %v6736_v10  ;;  %v7024_v48 = vld [vmem:[#allocation12 + $0x5e0] sm:$0xf0] }
 0x220   :  { %v9040_v25 = vpop.eup %9039  ;;  %v1450_v26 = vadd.f32 %v9036_v62, %v1449_v19  ;;  %v1463_v29 = vsub.f32 1.0, %v1462_v20  ;;  %v8508_v58 = vld [vmem:[#allocation12 + $0x84] sm:$0xf] }
 0x221   :  { %v9446_v35 = vadd.f32 1.0, %v9040_v25  ;;  %v1308_v36 = vpop.f32.mrf.mxu2  ;;  %4762 = vmatpush.bf16.msra.mxu2 %v8079_v24  ;;  %v8580_v61 = vld [vmem:[#allocation12 + $0x2c4] sm:$0xf] }
 0x222   :  { %v1454_v38 = vsel %vm1453_vm15, %v9036_v62, %v1450_v26  ;;  %v1464_v39 = vmul.f32 %v9431_v14, %v1463_v29  ;;  %v6704_v29 = vld [vmem:[#allocation12 + $0x360] sm:$0xf0] }
 0x223   :  { %v1459_v43 = vsel %vm9440_vm14, %v1458_v33, %v1454_v38  ;;  %9043 = vrcp.f32 %v9446_v35  ;;  %v1319_v44 = vpop.f32.mrf.mxu3  ;;  %v1332_v55 = vpop.f32.mrf.mxu0  ;;  %v1485_v25 = vand.u32 2147483647, %v9446_v35  ;;  %v1487_v26 = vand.u32 2147483648, %v9446_v35  ;;  %v6384_v38 = vld [vmem:[#allocation12 + $0xe0] sm:$0xf0] }
 0x224   :  { %v9042_v50 = vpop.eup %9041  ;;  %v9454_v51 = vpack.c.bf16 %v1459_v43, %v1459_v43  ;;  %v1465_v53 = vadd.f32 %v9431_v14, %v1464_v39  ;;  %v1320_v54 = vadd.f32 %v1319_v44, %v554_v17  ;;  %v6451_v17 = vor.u32 %v8532_v5, %v6448_v6  ;;  %v8588_v39 = vld [vmem:[#allocation12 + $0x304] sm:$0xf] }
 0x225   :  { %v9460_v60 = vadd.f32 1.0, %v9042_v50  ;;  %v1347_v62 = vpop.f32.mrf.mxu1  ;;  %vm1481_vm5 = vweird.f32 %v9446_v35  ;;  %v6707_v36 = vor.u32 %v8596_v23, %v6704_v29  ;;  %vm1486_vm6 = vcmp.eq.f32.partialorder %v1485_v25, 8.507059e+37  ;;  %v6672_v44 = vld [vmem:[#allocation12 + $0x320] sm:$0xf0] }
 0x226   :  { %v1469_v0 = vsel %vm1468_vm2, %v9431_v14, %v1465_v53  ;;  %v1333_v52 = vadd.f32 %v1332_v55, %v1320_v54  ;;  %4672 = vmatmul.bf16.vlgmr.msra.gmra.mxu3 %v9454_v51  ;;  %v1488_v42 = vor.u32 1.1754944e-38, %v1487_v26  ;;  %v6387_v57 = vor.u32 %v8516_v37, %v6384_v38  ;;  %v8668_v1 = vld [vmem:[#allocation12 + $0x584] sm:$0xf] }
 0x227   :  { %v1474_v2 = vsel %vm1471_vm3, %v1473_v59, %v1469_v0  ;;  %9045 = vrcp.f32 %v9460_v60  ;;  %4768 = vmatpush.bf16.msra.mxu3 %v6515_v45  ;;  %v1502_v45 = vand.u32 2147483648, %v9460_v60  ;;  %v1500_v54 = vand.u32 2147483647, %v9460_v60  ;;  %v6352_v59 = vld [vmem:[#allocation12 + $0xa0] sm:$0xf0] }
 0x228   :  { %v9466_v8 = vpack.c.bf16 %v1474_v2, %v1474_v2  ;;  %v6280_v9 = vmul.f32 -1.442695, %v1333_v52  ;;  %vm1496_vm9 = vweird.f32 %v9460_v60  ;;  %v6640_v0 = vld [vmem:[#allocation12 + $0x2e0] sm:$0xf0]  ;;  %v7027_v52 = vor.u32 %v8676_v47, %v7024_v48 }
 0x229   :  { %v9044_v11 = vpop.eup %9043  ;;  %v1358_v15 = vpop.f32.mrf.mxu2  ;;  %v6992_v2 = vld [vmem:[#allocation12 + $0x5a0] sm:$0xf0]  ;;  %vm1501_vm11 = vcmp.eq.f32.partialorder %v1500_v54, 8.507059e+37 }
 0x22a   :  { %v1477_v14 = vmul.f32 %v9044_v11, %v9446_v35  ;;  %9047 = vpow2.f32 %v6280_v9  ;;  %4685 = vmatmul.bf16.vlgmr.msrb.gmra.mxu0 %v9466_v8  ;;  %v1359_v19 = vadd.f32 %v1358_v15, %v1346_v12  ;;  %vm1482_vm4 = vweird.f32 %v9044_v11  ;;  %v8740_v5 = vld [vmem:[#allocation12 + $0x7c4] sm:$0xf] }
 0x22b   :  { %v1321_v20 = vpop.f32.mrf.mxu3  ;;  %4769 = vmatpush.bf16.msra.mxu3 %v6483_v3  ;;  %4781 = vmatpush.bf16.msrb.mxu0 %v6771_v4  ;;  %v1334_v28 = vpop.f32.mrf.mxu0  ;;  %vm1483_vm7 = vmor %vm1481_vm5, %vm1482_vm4  ;;  %v6675_v35 = vor.u32 %v8588_v39, %v6672_v44  ;;  %v1503_v4 = vor.u32 1.1754944e-38, %v1502_v45  ;;  %v7280_v6 = vld [vmem:[#allocation12 + $0x7e0] sm:$0xf0]  ;;  %v6995_v18 = vor.u32 %v8668_v1, %v6992_v2 }
 0x22c   :  { %v1478_v16 = vsub.f32 1.0, %v1477_v14  ;;  %v6281_v31 = vmul.f32 -1.442695, %v1359_v19  ;;  %v8500_v12 = vld [vmem:[#allocation12 + $0x44] sm:$0xf]  ;;  %v7283_v19 = vor.u32 %v8740_v5, %v7280_v6 }
 0x22d   :  { %v9046_v30 = vpop.eup %9045  ;;  %v8572_v15 = vld [vmem:[#allocation12 + $0x284] sm:$0xf]  ;;  %v6323_v29 = vor.u32 %v8500_v12, %v6320_v13 }
 0x22e   :  { %v1479_v32 = vmul.f32 %v9044_v11, %v1478_v16  ;;  %v1492_v33 = vmul.f32 %v9046_v30, %v9460_v60  ;;  %9049 = vpow2.f32 %v6281_v31  ;;  %vm1497_vm8 = vweird.f32 %v9046_v30  ;;  %v8660_v20 = vld [vmem:[#allocation12 + $0x544] sm:$0xf] }
 0x22f   :  { %4770 = vmatpush.bf16.msra.mxu3 %v6451_v17  ;;  %4782 = vmatpush.bf16.msrb.mxu0 %v6739_v21  ;;  %vm1498_vm10 = vmor %vm1496_vm9, %vm1497_vm8  ;;  %v6355_v60 = vor.u32 %v8508_v58, %v6352_v59  ;;  %v6608_v17 = vld [vmem:[#allocation12 + $0x2a0] sm:$0xf0] }
 0x230   :  { %v9048_v40 = vpop.eup %9047  ;;  %v1480_v41 = vadd.f32 %v9044_v11, %v1479_v32  ;;  %v1493_v43 = vsub.f32 1.0, %v1492_v33  ;;  %v6960_v7 = vld [vmem:[#allocation12 + $0x560] sm:$0xf0] }
 0x231   :  { %v9479_v46 = vadd.f32 1.0, %v9048_v40  ;;  %v1360_v55 = vpop.f32.mrf.mxu2  ;;  %v8732_v22 = vld [vmem:[#allocation12 + $0x784] sm:$0xf] }
 0x232   :  { %v1484_v50 = vsel %vm1483_vm7, %v9044_v11, %v1480_v41  ;;  %v1494_v53 = vmul.f32 %v9046_v30, %v1493_v43  ;;  %v6643_v11 = vor.u32 %v8580_v61, %v6640_v0  ;;  %v7248_v23 = vld [vmem:[#allocation12 + $0x7a0] sm:$0xf0]  ;;  %v556_v41 = vperm.slane %v9417_v27, 6 }
 0x233   :  { %v1489_v56 = vsel %vm1486_vm6, %v1488_v42, %v1484_v50  ;;  %9051 = vrcp.f32 %v9479_v46  ;;  %4771 = vmatpush.bf16.msra.mxu3 %v6419_v34  ;;  %4783 = vmatpush.bf16.msrb.mxu0 %v6707_v36  ;;  %v8492_v25 = vld [vmem:[#allocation12 + $0x4] sm:$0xf]  ;;  %v6963_v36 = vor.u32 %v8660_v20, %v6960_v7  ;;  %v7251_v37 = vor.u32 %v8732_v22, %v7248_v23 }
 0x234   :  { %v9483_v62 = vpack.c.bf16 %v1489_v56, %v1489_v56  ;;  %v1495_v63 = vadd.f32 %v9046_v30, %v1494_v53  ;;  %v9050_v3 = vpop.eup %9049  ;;  %v6288_v26 = vld [vmem:[#allocation12 + $0x20] sm:$0xf0]  ;;  %v1517_v40 = vand.u32 2147483648, %v9479_v46  ;;  %v1515_v47 = vand.u32 2147483647, %v9479_v46 }
 0x235   :  { %v9487_v49 = vadd.f32 1.0, %v9050_v3  ;;  %v8564_v28 = vld [vmem:[#allocation12 + $0x244] sm:$0xf]  ;;  %v6291_v48 = vor.u32 %v8492_v25, %v6288_v26  ;;  %v557_v55 = vperm.slane %v9417_v27, 7  ;;  %vm1511_vm13 = vweird.f32 %v9479_v46 }
 0x236   :  { %v1499_v9 = vsel %vm1498_vm10, %v9046_v30, %v1495_v63  ;;  %4698 = vmatmul.bf16.vlgmr.msrb.gmra.mxu1 %v9483_v62  ;;  %v6611_v30 = vor.u32 %v8572_v15, %v6608_v17  ;;  %v6576_v31 = vld [vmem:[#allocation12 + $0x260] sm:$0xf0]  ;;  %v1518_v27 = vor.u32 1.1754944e-38, %v1517_v40  ;;  %vm1516_vm15 = vcmp.eq.f32.partialorder %v1515_v47, 8.507059e+37 }
 0x237   :  { %v1504_v10 = vsel %vm1501_vm11, %v1503_v4, %v1499_v9  ;;  %4772 = vmatpush.bf16.msra.mxu3 %v6387_v57  ;;  %4784 = vmatpush.bf16.msrb.mxu0 %v6675_v35  ;;  %9053 = vrcp.f32 %v9487_v49  ;;  %v9500_v32 = vld [vmem:[#allocation12 + $0x9c4] sm:$0xf]  ;;  %v6579_v56 = vor.u32 %v8564_v28, %v6576_v31  ;;  %v1530_v6 = vand.u32 2147483647, %v9487_v49 }
 0x238   :  { %v9490_v14 = vpack.c.bf16 %v1504_v10, %v1504_v10  ;;  %4794 = vmatpush.bf16.msrb.mxu1 %v7027_v52  ;;  %v9502_v33 = vld [vmem:[#allocation12 + $0x9e0] sm:$0xf0]  ;;  %v1532_v9 = vand.u32 2147483648, %v9487_v49  ;;  %vm1526_vm1 = vweird.f32 %v9487_v49 }
 0x239   :  { %v9493_v21 = vpop.eup %9051  ;;  %v8652_v38 = vld [vmem:[#allocation12 + $0x504] sm:$0xf]  ;;  %v7539_v57 = vor.u32 %v9500_v32, %v9502_v33  ;;  %vm1531_vm3 = vcmp.eq.f32.partialorder %v1530_v6, 8.507059e+37 }
 0x23a   :  { %v1507_v24 = vmul.f32 %v9493_v21, %v9479_v46  ;;  %4711 = vmatmul.bf16.vlgmr.msrb.gmra.mxu2 %v9490_v14  ;;  %v6928_v39 = vld [vmem:[#allocation12 + $0x520] sm:$0xf0]  ;;  %vm1512_vm12 = vweird.f32 %v9493_v21  ;;  %v1533_v26 = vor.u32 1.1754944e-38, %v1532_v9 }
 0x23b   :  { %4773 = vmatpush.bf16.msra.mxu3 %v6355_v60  ;;  %4785 = vmatpush.bf16.msrb.mxu0 %v6643_v11  ;;  %v8724_v42 = vld [vmem:[#allocation12 + $0x744] sm:$0xf]  ;;  %v6931_v61 = vor.u32 %v8652_v38, %v6928_v39  ;;  %vm1513_vm14 = vmor %vm1511_vm13, %vm1512_vm12 }
 0x23c   :  { %v1508_v34 = vsub.f32 1.0, %v1507_v24  ;;  %4795 = vmatpush.bf16.msrb.mxu1 %v6995_v18  ;;  %4807 = vmatpush.bf16.msrb.mxu2 %v7283_v19  ;;  %v7216_v43 = vld [vmem:[#allocation12 + $0x760] sm:$0xf0] }
 0x23d   :  { %v9497_v16 = vpop.f32.mrf.mxu1  ;;  %v9506_v44 = vpop.eup %9053  ;;  %v9511_v50 = vld [vmem:[#allocation12 + $0x204] sm:$0xf]  ;;  %v7219_v63 = vor.u32 %v8724_v42, %v7216_v43 }
 0x23e   :  { %v1509_v45 = vmul.f32 %v9493_v21, %v1508_v34  ;;  %v6544_v53 = vld [vmem:[#allocation12 + $0x220] sm:$0xf0]  ;;  %v1522_v54 = vmul.f32 %v9506_v44, %v9487_v49  ;;  %vm1527_vm0 = vweird.f32 %v9506_v44  ;;  %v1398_v22 = vadd.f32 %v9497_v16, %v557_v55 }
 0x23f   :  { %4774 = vmatpush.bf16.msra.mxu3 %v6323_v29  ;;  %4786 = vmatpush.bf16.msrb.mxu0 %v6611_v30  ;;  %v8644_v0 = vld [vmem:[#allocation12 + $0x4c4] sm:$0xf]  ;;  %v6547_v3 = vor.u32 %v9511_v50, %v6544_v53  ;;  %vm1528_vm2 = vmor %vm1526_vm1, %vm1527_vm0 }
 0x240   :  { %v1510_v35 = vadd.f32 %v9493_v21, %v1509_v45  ;;  %4796 = vmatpush.bf16.msrb.mxu1 %v6963_v36  ;;  %4808 = vmatpush.bf16.msrb.mxu2 %v7251_v37  ;;  %v6896_v52 = vld [vmem:[#allocation12 + $0x4e0] sm:$0xf0]  ;;  %v1523_v1 = vsub.f32 1.0, %v1522_v54 }
 0x241   :  { %v8716_v4 = vld [vmem:[#allocation12 + $0x704] sm:$0xf]  ;;  %v6899_v20 = vor.u32 %v8644_v0, %v6896_v52 }
 0x242   :  { %v7184_v5 = vld [vmem:[#allocation12 + $0x720] sm:$0xf0]  ;;  %v1514_v46 = vsel %vm1513_vm14, %v9493_v21, %v1510_v35  ;;  %v1524_v11 = vmul.f32 %v9506_v44, %v1523_v1 }
 0x243   :  { %v1371_v58 = vpop.f32.mrf.mxu3  ;;  %v1384_v59 = vpop.f32.mrf.mxu0  ;;  %v1519_v60 = vsel %vm1516_vm15, %v1518_v27, %v1514_v46  ;;  %4775 = vmatpush.bf16.msra.mxu3 %v6291_v48  ;;  %4787 = vmatpush.bf16.msrb.mxu0 %v6579_v56  ;;  %v8796_v13 = vld [vmem:[#allocation12 + $0x984] sm:$0xf]  ;;  %v7187_v21 = vor.u32 %v8716_v4, %v7184_v5 }
 0x244   :  { %v1372_v2 = vadd.f32 %v1371_v58, %v556_v41  ;;  %v7504_v15 = vld [vmem:[#allocation12 + $0x9a0] sm:$0xf0]  ;;  %v9528_v17 = vpack.c.bf16 %v1519_v60, %v1519_v60  ;;  %4797 = vmatpush.bf16.msrb.mxu1 %v6931_v61  ;;  %4809 = vmatpush.bf16.msrb.mxu2 %v7219_v63  ;;  %v1525_v7 = vadd.f32 %v9506_v44, %v1524_v11 }
 0x245   :  { %v1399_v10 = vpop.f32.mrf.mxu1  ;;  %v8868_v18 = vld [vmem:[#allocation12 + $0xbc4] sm:$0xf]  ;;  %v7507_v29 = vor.u32 %v8796_v13, %v7504_v15 }
 0x246   :  { %v1385_v12 = vadd.f32 %v1384_v59, %v1372_v2  ;;  %v7792_v19 = vld [vmem:[#allocation12 + $0xbe0] sm:$0xf0]  ;;  %4724 = vmatmul.bf16.vlgmr.msrb.gmra.mxu3 %v9528_v17  ;;  %v1529_v32 = vsel %vm1528_vm2, %v9506_v44, %v1525_v7 }
 0x247   :  { %v8636_v24 = vld [vmem:[#allocation12 + $0x484] sm:$0xf]  ;;  %4820 = vmatpush.bf16.msrb.mxu3 %v7539_v57  ;;  %4788 = vmatpush.bf16.msrb.mxu0 %v6547_v3  ;;  %v1534_v33 = vsel %vm1531_vm3, %v1533_v26, %v1529_v32  ;;  %v7795_v37 = vor.u32 %v8868_v18, %v7792_v19 }
 0x248   :  { %v6282_v23 = vmul.f32 -1.442695, %v1385_v12  ;;  %v6864_v25 = vld [vmem:[#allocation12 + $0x4a0] sm:$0xf0]  ;;  %4798 = vmatpush.bf16.msrb.mxu1 %v6899_v20  ;;  %4810 = vmatpush.bf16.msrb.mxu2 %v7187_v21  ;;  %v9537_v42 = vpack.c.bf16 %v1534_v33, %v1534_v33 }
 0x249   :  { %v1410_v28 = vpop.f32.mrf.mxu2  ;;  %v8708_v30 = vld [vmem:[#allocation12 + $0x6c4] sm:$0xf]  ;;  %v6867_v41 = vor.u32 %v8636_v24, %v6864_v25 }
 0x24a   :  { %v7152_v31 = vld [vmem:[#allocation12 + $0x6e0] sm:$0xf0]  ;;  %9055 = vpow2.f32 %v6282_v23  ;;  %v1411_v49 = vadd.f32 %v1410_v28, %v1398_v22  ;;  %4737 = vmatmul.bf16.vlgmr.msra.gmra.mxu0 %v9537_v42 }
 0x24b   :  { %v8788_v16 = vld [vmem:[#allocation12 + $0x944] sm:$0xf]  ;;  %v1373_v34 = vpop.f32.mrf.mxu3  ;;  %v1386_v36 = vpop.f32.mrf.mxu0  ;;  %v7155_v44 = vor.u32 %v8708_v30, %v7152_v31  ;;  %4821 = vmatpush.bf16.msrb.mxu3 %v7507_v29  ;;  %4833 = vmatpush.bf16.msra.mxu0 %v7795_v37 }
 0x24c   :  { %v7472_v38 = vld [vmem:[#allocation12 + $0x960] sm:$0xf0]  ;;  %v6283_v43 = vmul.f32 -1.442695, %v1411_v49  ;;  %4799 = vmatpush.bf16.msrb.mxu1 %v6867_v41 }
 0x24d   :  { %v8860_v39 = vld [vmem:[#allocation12 + $0xb84] sm:$0xf]  ;;  %v7475_v53 = vor.u32 %v8788_v16, %v7472_v38  ;;  %4811 = vmatpush.bf16.msrb.mxu2 %v7155_v44 }
 0x24e   :  { %v7760_v40 = vld [vmem:[#allocation12 + $0xba0] sm:$0xf0]  ;;  %9057 = vpow2.f32 %v6283_v43 }
 0x24f   :  { %v8628_v45 = vld [vmem:[#allocation12 + $0x444] sm:$0xf]  ;;  %v7763_v54 = vor.u32 %v8860_v39, %v7760_v40  ;;  %4822 = vmatpush.bf16.msrb.mxu3 %v7475_v53  ;;  %v6518_v53 = vld [vmem:[#allocation12 + $0x1c8] sm:$0xf] }
 0x250   :  { %v6832_v47 = vld [vmem:[#allocation12 + $0x460] sm:$0xf0]  ;;  %v9056_v58 = vpop.eup %9055 }
 0x251   :  { %v8700_v48 = vld [vmem:[#allocation12 + $0x684] sm:$0xf]  ;;  %v6835_v35 = vor.u32 %v8628_v45, %v6832_v47  ;;  %v9540_v52 = vadd.f32 1.0, %v9056_v58  ;;  %v1412_v27 = vpop.f32.mrf.mxu2  ;;  %4834 = vmatpush.bf16.msra.mxu0 %v7763_v54 }
 0x252   :  { %v7120_v50 = vld [vmem:[#allocation12 + $0x6a0] sm:$0xf0] }
 0x253   :  { %v8780_v55 = vld [vmem:[#allocation12 + $0x904] sm:$0xf]  ;;  %v7123_v61 = vor.u32 %v8700_v48, %v7120_v50  ;;  %9059 = vrcp.f32 %v9540_v52  ;;  %4800 = vmatpush.bf16.msrb.mxu1 %v6835_v35  ;;  %v1545_v33 = vand.u32 2147483647, %v9540_v52  ;;  %v1547_v34 = vand.u32 2147483648, %v9540_v52 }
 0x254   :  { %v7440_v56 = vld [vmem:[#allocation12 + $0x920] sm:$0xf0]  ;;  %v9058_v9 = vpop.eup %9057  ;;  %vm1541_vm5 = vweird.f32 %v9540_v52 }
 0x255   :  { %v8852_v57 = vld [vmem:[#allocation12 + $0xb44] sm:$0xf]  ;;  %v7443_v3 = vor.u32 %v8780_v55, %v7440_v56  ;;  %4812 = vmatpush.bf16.msrb.mxu2 %v7123_v61  ;;  %v9543_v12 = vadd.f32 1.0, %v9058_v9  ;;  %vm1546_vm7 = vcmp.eq.f32.partialorder %v1545_v33, 8.507059e+37  ;;  %v1548_v54 = vor.u32 1.1754944e-38, %v1547_v34 }
 0x256   :  { %v7728_v59 = vld [vmem:[#allocation12 + $0xb60] sm:$0xf0]  ;;  %4776 = vmatmul.bf16.vlgmr.msra.gmra.mxu3 %v9454_v51 }
 0x257   :  { %v8620_v63 = vld [vmem:[#allocation12 + $0x404] sm:$0xf]  ;;  %v7731_v4 = vor.u32 %v8852_v57, %v7728_v59  ;;  %4823 = vmatpush.bf16.msrb.mxu3 %v7443_v3  ;;  %9061 = vrcp.f32 %v9543_v12  ;;  %v1562_v55 = vand.u32 2147483648, %v9543_v12  ;;  %v8553_v57 = vld [vmem:[#allocation12 + $0x1e4] sm:$0xf0]  ;;  %vm1556_vm9 = vweird.f32 %v9543_v12 }
 0x258   :  { %v6800_v0 = vld [vmem:[#allocation12 + $0x420] sm:$0xf0]  ;;  %v1560_v59 = vand.u32 2147483647, %v9543_v12 }
 0x259   :  { %v8692_v1 = vld [vmem:[#allocation12 + $0x644] sm:$0xf]  ;;  %v6803_v6 = vor.u32 %v8620_v63, %v6800_v0  ;;  %4835 = vmatpush.bf16.msra.mxu0 %v7731_v4  ;;  %v9060_v24 = vpop.eup %9059  ;;  %v6519_v4 = vor.u32 %v8553_v57, %v6518_v53  ;;  %v1563_v9 = vor.u32 1.1754944e-38, %v1562_v55  ;;  %v8521_v57 = vld [vmem:[#allocation12 + $0xe4] sm:$0xf0] }
 0x25a   :  { %v7088_v2 = vld [vmem:[#allocation12 + $0x660] sm:$0xf0]  ;;  %v1537_v25 = vmul.f32 %v9060_v24, %v9540_v52  ;;  %vm1542_vm4 = vweird.f32 %v9060_v24  ;;  %4789 = vmatmul.bf16.vlgmr.msrb.gmra.mxu0 %v9466_v8  ;;  %vm1561_vm11 = vcmp.eq.f32.partialorder %v1560_v59, 8.507059e+37 }
 0x25b   :  { %v8772_v5 = vld [vmem:[#allocation12 + $0x8c4] sm:$0xf]  ;;  %v7091_v11 = vor.u32 %v8692_v1, %v7088_v2  ;;  %4801 = vmatpush.bf16.msrb.mxu1 %v6803_v6  ;;  %vm1543_vm6 = vmor %vm1541_vm5, %vm1542_vm4 }
 0x25c   :  { %v7408_v46 = vld [vmem:[#allocation12 + $0x8e0] sm:$0xf0]  ;;  %v1538_v31 = vsub.f32 1.0, %v1537_v25 }
 0x25d   :  { %v8844_v10 = vld [vmem:[#allocation12 + $0xb04] sm:$0xf]  ;;  %v7411_v18 = vor.u32 %v8772_v5, %v7408_v46  ;;  %4813 = vmatpush.bf16.msrb.mxu2 %v7091_v11  ;;  %v9062_v16 = vpop.eup %9061 }
 0x25e   :  { %v7696_v60 = vld [vmem:[#allocation12 + $0xb20] sm:$0xf0]  ;;  %v1539_v36 = vmul.f32 %v9060_v24, %v1538_v31  ;;  %v1552_v37 = vmul.f32 %v9062_v16, %v9543_v12  ;;  %vm1557_vm8 = vweird.f32 %v9062_v16  ;;  %v8609_v31 = vld [vmem:[#allocation12 + $0x3a4] sm:$0xf0] }
 0x25f   :  { %v8684_v13 = vld [vmem:[#allocation12 + $0x604] sm:$0xf]  ;;  %v7699_v19 = vor.u32 %v8844_v10, %v7696_v60  ;;  %4824 = vmatpush.bf16.msrb.mxu3 %v7411_v18  ;;  %vm1558_vm10 = vmor %vm1556_vm9, %vm1557_vm8  ;;  %v6486_v10 = vld [vmem:[#allocation12 + $0x188] sm:$0xf] }
 0x260   :  { %v7056_v15 = vld [vmem:[#allocation12 + $0x620] sm:$0xf0]  ;;  %v1540_v47 = vadd.f32 %v9060_v24, %v1539_v36  ;;  %v1553_v48 = vsub.f32 1.0, %v1552_v37  ;;  %v8545_v60 = vld [vmem:[#allocation12 + $0x1a4] sm:$0xf0] }
 0x261   :  { %v8764_v20 = vld [vmem:[#allocation12 + $0x884] sm:$0xf]  ;;  %v7059_v23 = vor.u32 %v8684_v13, %v7056_v15  ;;  %4836 = vmatpush.bf16.msra.mxu0 %v7699_v19  ;;  %v6774_v13 = vld [vmem:[#allocation12 + $0x3c8] sm:$0xf] }
 0x262   :  { %v7376_v21 = vld [vmem:[#allocation12 + $0x8a0] sm:$0xf0]  ;;  %v1544_v35 = vsel %vm1543_vm6, %v9060_v24, %v1540_v47  ;;  %v1554_v58 = vmul.f32 %v9062_v16, %v1553_v48  ;;  %v8617_v15 = vld [vmem:[#allocation12 + $0x3e4] sm:$0xf0] }
 0x263   :  { %v8836_v7 = vld [vmem:[#allocation12 + $0xac4] sm:$0xf]  ;;  %v7379_v26 = vor.u32 %v8764_v20, %v7376_v21  ;;  %4814 = vmatpush.bf16.msrb.mxu2 %v7059_v23  ;;  %v1549_v61 = vsel %vm1546_vm7, %v1548_v54, %v1544_v35  ;;  %v6775_v25 = vor.u32 %v8617_v15, %v6774_v13  ;;  %v6678_v35 = vld [vmem:[#allocation12 + $0x308] sm:$0xf] }
 0x264   :  { %v7664_v22 = vld [vmem:[#allocation12 + $0xae0] sm:$0xf0]  ;;  %v9556_v2 = vpack.c.bf16 %v1549_v61, %v1549_v61  ;;  %v1555_v3 = vadd.f32 %v9062_v16, %v1554_v58  ;;  %v8593_v58 = vld [vmem:[#allocation12 + $0x324] sm:$0xf0] }
 0x265   :  { %v7667_v28 = vor.u32 %v8836_v7, %v7664_v22  ;;  %v8756_v29 = vld [vmem:[#allocation12 + $0x844] sm:$0xf]  ;;  %4825 = vmatpush.bf16.msrb.mxu3 %v7379_v26  ;;  %v6487_v7 = vor.u32 %v8545_v60, %v6486_v10 }
 0x266   :  { %v7344_v30 = vld [vmem:[#allocation12 + $0x860] sm:$0xf0]  ;;  %v1559_v11 = vsel %vm1558_vm10, %v9062_v16, %v1555_v3  ;;  %4750 = vmatmul.bf16.vlgmr.msra.gmra.mxu1 %v9556_v2 }
 0x267   :  { %v8828_v32 = vld [vmem:[#allocation12 + $0xa84] sm:$0xf]  ;;  %v7347_v38 = vor.u32 %v8756_v29, %v7344_v30  ;;  %4837 = vmatpush.bf16.msra.mxu0 %v7667_v28  ;;  %v1564_v18 = vsel %vm1561_vm11, %v1563_v9, %v1559_v11  ;;  %v6454_v28 = vld [vmem:[#allocation12 + $0x148] sm:$0xf] }
 0x268   :  { %v7632_v49 = vld [vmem:[#allocation12 + $0xaa0] sm:$0xf0]  ;;  %v9561_v20 = vpack.c.bf16 %v1564_v18, %v1564_v18  ;;  %v8537_v29 = vld [vmem:[#allocation12 + $0x164] sm:$0xf0] }
 0x269   :  { %v8748_v39 = vld [vmem:[#allocation12 + $0x804] sm:$0xf]  ;;  %v7635_v41 = vor.u32 %v8828_v32, %v7632_v49  ;;  %4826 = vmatpush.bf16.msrb.mxu3 %v7347_v38  ;;  %v6742_v30 = vld [vmem:[#allocation12 + $0x388] sm:$0xf]  ;;  %v6455_v16 = vor.u32 %v8537_v29, %v6454_v28 }
 0x26a   :  { %v7312_v40 = vld [vmem:[#allocation12 + $0x820] sm:$0xf0]  ;;  %4763 = vmatmul.bf16.vlgmr.msra.gmra.mxu2 %v9561_v20  ;;  %v6743_v37 = vor.u32 %v8609_v31, %v6742_v30 }
 0x26b   :  { %v8820_v43 = vld [vmem:[#allocation12 + $0xa44] sm:$0xf]  ;;  %v7315_v56 = vor.u32 %v8748_v39, %v7312_v40  ;;  %4838 = vmatpush.bf16.msra.mxu0 %v7635_v41  ;;  %v6422_v39 = vld [vmem:[#allocation12 + $0x108] sm:$0xf] }
 0x26c   :  { %v7600_v44 = vld [vmem:[#allocation12 + $0xa60] sm:$0xf0]  ;;  %v8529_v40 = vld [vmem:[#allocation12 + $0x124] sm:$0xf0] }
 0x26d   :  { %v8932_v45 = vld [vmem:[#allocation12 + $0xdc4] sm:$0xf]  ;;  %v7603_v63 = vor.u32 %v8820_v43, %v7600_v44  ;;  %4827 = vmatpush.bf16.msrb.mxu3 %v7315_v56  ;;  %v6710_v41 = vld [vmem:[#allocation12 + $0x348] sm:$0xf]  ;;  %v6423_v47 = vor.u32 %v8529_v40, %v6422_v39 }
 0x26e   :  { %v8048_v50 = vld [vmem:[#allocation12 + $0xde0] sm:$0xf0]  ;;  %v8601_v43 = vld [vmem:[#allocation12 + $0x364] sm:$0xf0] }
 0x26f   :  { %v8051_v0 = vor.u32 %v8932_v45, %v8048_v50  ;;  %v8812_v52 = vld [vmem:[#allocation12 + $0xa04] sm:$0xf]  ;;  %4839 = vmatpush.bf16.msra.mxu0 %v7603_v63  ;;  %v6711_v54 = vor.u32 %v8601_v43, %v6710_v41  ;;  %v6390_v56 = vld [vmem:[#allocation12 + $0xc8] sm:$0xf] }
 0x270   :  { %v7568_v27 = vld [vmem:[#allocation12 + $0xa20] sm:$0xf0]  ;;  %4828 = vmatmul.bf16.vlgmr.msrb.gmra.mxu3 %v9528_v17  ;;  %v6391_v63 = vor.u32 %v8521_v57, %v6390_v56  ;;  %v8809_v39 = vld [vmem:[#allocation12 + $0x9e4] sm:$0xf0] }
 0x271   :  { %v8924_v1 = vld [vmem:[#allocation12 + $0xd84] sm:$0xf]  ;;  %4846 = vmatpush.bf16.msra.mxu1 %v8051_v0  ;;  %v7571_v12 = vor.u32 %v8812_v52, %v7568_v27  ;;  %4872 = vmatpush.bf16.msra.mxu3 %v6519_v4  ;;  %v6358_v4 = vld [vmem:[#allocation12 + $0x88] sm:$0xf] }
 0x272   :  { %v8016_v5 = vld [vmem:[#allocation12 + $0xda0] sm:$0xf0]  ;;  %v7286_v56 = vld [vmem:[#allocation12 + $0x7c8] sm:$0xf] }
 0x273   :  { %v8996_v46 = vld [vmem:[#allocation12 + $0xfc4] sm:$0xf]  ;;  %v8019_v19 = vor.u32 %v8924_v1, %v8016_v5  ;;  %4840 = vmatpush.bf16.msra.mxu0 %v7571_v12  ;;  %v6679_v1 = vor.u32 %v8593_v58, %v6678_v35  ;;  %v8513_v5 = vld [vmem:[#allocation12 + $0xa4] sm:$0xf0] }
 0x274   :  { %v8304_v6 = vld [vmem:[#allocation12 + $0xfe0] sm:$0xf0]  ;;  %v6359_v60 = vor.u32 %v8513_v5, %v6358_v4  ;;  %v8745_v57 = vld [vmem:[#allocation12 + $0x7e4] sm:$0xf0] }
 0x275   :  { %v8307_v21 = vor.u32 %v8996_v46, %v8304_v6  ;;  %v8916_v22 = vld [vmem:[#allocation12 + $0xd44] sm:$0xf]  ;;  %4847 = vmatpush.bf16.msra.mxu1 %v8019_v19  ;;  %4873 = vmatpush.bf16.msra.mxu3 %v6487_v7  ;;  %v6646_v46 = vld [vmem:[#allocation12 + $0x2c8] sm:$0xf] }
 0x276   :  { %v7984_v23 = vld [vmem:[#allocation12 + $0xd60] sm:$0xf0]  ;;  %4841 = vmatmul.bf16.vlgmr.msra.gmra.mxu0 %v9537_v42  ;;  %4802 = vmatmul.bf16.vlgmr.msrb.gmra.mxu1 %v9483_v62  ;;  %v8585_v6 = vld [vmem:[#allocation12 + $0x2e4] sm:$0xf0] }
 0x277   :  { %v8988_v24 = vld [vmem:[#allocation12 + $0xf84] sm:$0xf]  ;;  %v7987_v32 = vor.u32 %v8916_v22, %v7984_v23  ;;  %4859 = vmatpush.bf16.msra.mxu2 %v8307_v21  ;;  %4885 = vmatpush.bf16.msrb.mxu0 %v6775_v25  ;;  %v6647_v18 = vor.u32 %v8585_v6, %v6646_v46  ;;  %v6326_v19 = vld [vmem:[#allocation12 + $0x48] sm:$0xf] }
 0x278   :  { %v8272_v26 = vld [vmem:[#allocation12 + $0xfa0] sm:$0xf0]  ;;  %v8505_v21 = vld [vmem:[#allocation12 + $0x64] sm:$0xf0] }
 0x279   :  { %v8275_v49 = vor.u32 %v8988_v24, %v8272_v26  ;;  %v8908_v33 = vld [vmem:[#allocation12 + $0xd04] sm:$0xf]  ;;  %4848 = vmatpush.bf16.msra.mxu1 %v7987_v32  ;;  %4874 = vmatpush.bf16.msra.mxu3 %v6455_v16  ;;  %v6614_v7 = vld [vmem:[#allocation12 + $0x288] sm:$0xf]  ;;  %v6327_v26 = vor.u32 %v8505_v21, %v6326_v19 }
 0x27a   :  { %v7952_v34 = vld [vmem:[#allocation12 + $0xd20] sm:$0xf0]  ;;  %4815 = vmatmul.bf16.vlgmr.msrb.gmra.mxu2 %v9490_v14  ;;  %v8577_v22 = vld [vmem:[#allocation12 + $0x2a4] sm:$0xf0] }
 0x27b   :  { %v8980_v36 = vld [vmem:[#allocation12 + $0xf44] sm:$0xf]  ;;  %v7955_v44 = vor.u32 %v8908_v33, %v7952_v34  ;;  %4860 = vmatpush.bf16.msra.mxu2 %v8275_v49  ;;  %4886 = vmatpush.bf16.msrb.mxu0 %v6743_v37  ;;  %v6615_v31 = vor.u32 %v8577_v22, %v6614_v7  ;;  %v6294_v32 = vld [vmem:[#allocation12 + $0x8] sm:$0xf] }
 0x27c   :  { %v8240_v38 = vld [vmem:[#allocation12 + $0xf60] sm:$0xf0]  ;;  %v8497_v49 = vld [vmem:[#allocation12 + $0x24] sm:$0xf0] }
 0x27d   :  { %v8243_v45 = vor.u32 %v8980_v36, %v8240_v38  ;;  %v8900_v48 = vld [vmem:[#allocation12 + $0xcc4] sm:$0xf]  ;;  %4849 = vmatpush.bf16.msra.mxu1 %v7955_v44  ;;  %4875 = vmatpush.bf16.msra.mxu3 %v6423_v47  ;;  %v6582_v16 = vld [vmem:[#allocation12 + $0x248] sm:$0xf]  ;;  %v6295_v41 = vor.u32 %v8497_v49, %v6294_v32 }
 0x27e   :  { %v7920_v50 = vld [vmem:[#allocation12 + $0xce0] sm:$0xf0]  ;;  %v8569_v33 = vld [vmem:[#allocation12 + $0x264] sm:$0xf0] }
 0x27f   :  { %v8972_v53 = vld [vmem:[#allocation12 + $0xf04] sm:$0xf]  ;;  %v7923_v59 = vor.u32 %v8900_v48, %v7920_v50  ;;  %4861 = vmatpush.bf16.msra.mxu2 %v8243_v45  ;;  %4887 = vmatpush.bf16.msrb.mxu0 %v6711_v54  ;;  %v7030_v34 = vld [vmem:[#allocation12 + $0x5c8] sm:$0xf]  ;;  %v6583_v44 = vor.u32 %v8569_v33, %v6582_v16 }
 0x280   :  { %v8208_v55 = vld [vmem:[#allocation12 + $0xf20] sm:$0xf0]  ;;  %v8681_v36 = vld [vmem:[#allocation12 + $0x5e4] sm:$0xf0] }
 0x281   :  { %v8211_v61 = vor.u32 %v8972_v53, %v8208_v55  ;;  %v8892_v0 = vld [vmem:[#allocation12 + $0xc84] sm:$0xf]  ;;  %4850 = vmatpush.bf16.msra.mxu1 %v7923_v59  ;;  %4876 = vmatpush.bf16.msra.mxu3 %v6391_v63  ;;  %v7542_v38 = vld [vmem:[#allocation12 + $0x9c8] sm:$0xf]  ;;  %v7031_v45 = vor.u32 %v8681_v36, %v7030_v34 }
 0x282   :  { %v7888_v52 = vld [vmem:[#allocation12 + $0xca0] sm:$0xf0]  ;;  %v6550_v48 = vld [vmem:[#allocation12 + $0x208] sm:$0xf]  ;;  %v7543_v53 = vor.u32 %v8809_v39, %v7542_v38 }
 0x283   :  { %v8964_v27 = vld [vmem:[#allocation12 + $0xec4] sm:$0xf]  ;;  %v7891_v9 = vor.u32 %v8892_v0, %v7888_v52  ;;  %4862 = vmatpush.bf16.msra.mxu2 %v8211_v61  ;;  %4888 = vmatpush.bf16.msrb.mxu0 %v6679_v1  ;;  %v8561_v50 = vld [vmem:[#allocation12 + $0x224] sm:$0xf0] }
 0x284   :  { %v8176_v3 = vld [vmem:[#allocation12 + $0xee0] sm:$0xf0]  ;;  %v6998_v54 = vld [vmem:[#allocation12 + $0x588] sm:$0xf]  ;;  %v6551_v0 = vor.u32 %v8561_v50, %v6550_v48 }
 0x285   :  { %v8179_v10 = vor.u32 %v8964_v27, %v8176_v3  ;;  %v8884_v11 = vld [vmem:[#allocation12 + $0xc44] sm:$0xf]  ;;  %4851 = vmatpush.bf16.msra.mxu1 %v7891_v9  ;;  %4877 = vmatpush.bf16.msra.mxu3 %v6359_v60  ;;  %v8673_v55 = vld [vmem:[#allocation12 + $0x5a4] sm:$0xf0]  ;;  %v7287_v27 = vor.u32 %v8745_v57, %v7286_v56 }
 0x286   :  { %v7856_v13 = vld [vmem:[#allocation12 + $0xc60] sm:$0xf0]  ;;  %v7510_v35 = vld [vmem:[#allocation12 + $0x988] sm:$0xf]  ;;  %v6999_v52 = vor.u32 %v8673_v55, %v6998_v54 }
 0x287   :  { %v8956_v15 = vld [vmem:[#allocation12 + $0xe84] sm:$0xf]  ;;  %v7859_v23 = vor.u32 %v8884_v11, %v7856_v13  ;;  %4863 = vmatpush.bf16.msra.mxu2 %v8179_v10  ;;  %4889 = vmatpush.bf16.msrb.mxu0 %v6647_v18  ;;  %v8801_v58 = vld [vmem:[#allocation12 + $0x9a4] sm:$0xf0] }
 0x288   :  { %v8144_v12 = vld [vmem:[#allocation12 + $0xea0] sm:$0xf0]  ;;  %v7798_v61 = vld [vmem:[#allocation12 + $0xbc8] sm:$0xf]  ;;  %v7511_v1 = vor.u32 %v8801_v58, %v7510_v35 }
 0x289   :  { %v8876_v24 = vld [vmem:[#allocation12 + $0xc04] sm:$0xf]  ;;  %v8147_v25 = vor.u32 %v8956_v15, %v8144_v12  ;;  %4852 = vmatpush.bf16.msra.mxu1 %v7859_v23  ;;  %4878 = vmatpush.bf16.msra.mxu3 %v6327_v26  ;;  %v8873_v63 = vld [vmem:[#allocation12 + $0xbe4] sm:$0xf0] }
 0x28a   :  { %v7824_v28 = vld [vmem:[#allocation12 + $0xc20] sm:$0xf0]  ;;  %v6966_v3 = vld [vmem:[#allocation12 + $0x548] sm:$0xf]  ;;  %v7799_v46 = vor.u32 %v8873_v63, %v7798_v61 }
 0x28b   :  { %v8948_v29 = vld [vmem:[#allocation12 + $0xe44] sm:$0xf]  ;;  %v7827_v37 = vor.u32 %v8876_v24, %v7824_v28  ;;  %4864 = vmatpush.bf16.msra.mxu2 %v8147_v25  ;;  %4890 = vmatpush.bf16.msrb.mxu0 %v6615_v31  ;;  %v8665_v4 = vld [vmem:[#allocation12 + $0x564] sm:$0xf0] }
 0x28c   :  { %v8112_v30 = vld [vmem:[#allocation12 + $0xe60] sm:$0xf0]  ;;  %v7254_v5 = vld [vmem:[#allocation12 + $0x788] sm:$0xf]  ;;  %v6967_v13 = vor.u32 %v8665_v4, %v6966_v3 }
 0x28d   :  { %v8115_v40 = vor.u32 %v8948_v29, %v8112_v30  ;;  %v8940_v43 = vld [vmem:[#allocation12 + $0xe04] sm:$0xf]  ;;  %4853 = vmatpush.bf16.msra.mxu1 %v7827_v37  ;;  %4879 = vmatpush.bf16.msra.mxu3 %v6295_v41  ;;  %v8737_v6 = vld [vmem:[#allocation12 + $0x7a4] sm:$0xf0] }
 0x28e   :  { %v8080_v47 = vld [vmem:[#allocation12 + $0xe20] sm:$0xf0]  ;;  %v7478_v9 = vld [vmem:[#allocation12 + $0x948] sm:$0xf]  ;;  %v7255_v15 = vor.u32 %v8737_v6, %v7254_v5 }
 0x28f   :  { %4865 = vmatpush.bf16.msra.mxu2 %v8115_v40  ;;  %v8083_v59 = vor.u32 %v8940_v43, %v8080_v47  ;;  %4891 = vmatpush.bf16.msrb.mxu0 %v6583_v44  ;;  %v8793_v10 = vld [vmem:[#allocation12 + $0x964] sm:$0xf0] }
 0x290   :  { %4854 = vmatmul.bf16.vlgmr.msra.gmra.mxu1 %v9556_v2  ;;  %4880 = vmatmul.bf16.vlgmr.msra.gmra.mxu3 %v9454_v51  ;;  %v7766_v60 = vld [vmem:[#allocation12 + $0xb88] sm:$0xf]  ;;  %v7479_v18 = vor.u32 %v8793_v10, %v7478_v9 }
 0x291   :  { %4898 = vmatpush.bf16.msrb.mxu1 %v7031_v45  ;;  %4924 = vmatpush.bf16.msrb.mxu3 %v7543_v53  ;;  %v8865_v11 = vld [vmem:[#allocation12 + $0xba4] sm:$0xf0] }
 0x292   :  { %v6934_v12 = vld [vmem:[#allocation12 + $0x508] sm:$0xf]  ;;  %v7767_v7 = vor.u32 %v8865_v11, %v7766_v60 }
 0x293   :  { %4866 = vmatpush.bf16.msra.mxu2 %v8083_v59  ;;  %4892 = vmatpush.bf16.msrb.mxu0 %v6551_v0  ;;  %v8657_v19 = vld [vmem:[#allocation12 + $0x524] sm:$0xf0] }
 0x294   :  { %v7222_v21 = vld [vmem:[#allocation12 + $0x748] sm:$0xf]  ;;  %v6935_v28 = vor.u32 %v8657_v19, %v6934_v12 }
 0x295   :  { %4899 = vmatpush.bf16.msrb.mxu1 %v6999_v52  ;;  %4925 = vmatpush.bf16.msrb.mxu3 %v7511_v1  ;;  %v8729_v22 = vld [vmem:[#allocation12 + $0x764] sm:$0xf0] }
 0x296   :  { %4867 = vmatmul.bf16.vlgmr.msra.gmra.mxu2 %v9561_v20  ;;  %v7446_v23 = vld [vmem:[#allocation12 + $0x908] sm:$0xf]  ;;  %4893 = vmatmul.bf16.vlgmr.msrb.gmra.mxu0 %v9466_v8  ;;  %v7223_v29 = vor.u32 %v8729_v22, %v7222_v21  ;;  %v8549_v22 = vld [vmem:[#allocation12 + $0x1cc] sm:$0xf] }
 0x297   :  { %4911 = vmatpush.bf16.msrb.mxu2 %v7287_v27  ;;  %4937 = vmatpush.bf16.msra.mxu0 %v7799_v46  ;;  %v8785_v24 = vld [vmem:[#allocation12 + $0x924] sm:$0xf0] }
 0x298   :  { %v7734_v25 = vld [vmem:[#allocation12 + $0xb48] sm:$0xf]  ;;  %v7447_v30 = vor.u32 %v8785_v24, %v7446_v23  ;;  %v6520_v23 = vld [vmem:[#allocation12 + $0x1e8] sm:$0xf0] }
 0x299   :  { %v8857_v26 = vld [vmem:[#allocation12 + $0xb64] sm:$0xf0]  ;;  %4900 = vmatpush.bf16.msrb.mxu1 %v6967_v13  ;;  %4926 = vmatpush.bf16.msrb.mxu3 %v7479_v18 }
 0x29a   :  { %v6902_v31 = vld [vmem:[#allocation12 + $0x4c8] sm:$0xf]  ;;  %v7735_v16 = vor.u32 %v8857_v26, %v7734_v25 }
 0x29b   :  { %4912 = vmatpush.bf16.msrb.mxu2 %v7255_v15  ;;  %v8649_v32 = vld [vmem:[#allocation12 + $0x4e4] sm:$0xf0]  ;;  %4938 = vmatpush.bf16.msra.mxu0 %v7767_v7 }
 0x29c   :  { %v7190_v49 = vld [vmem:[#allocation12 + $0x708] sm:$0xf]  ;;  %v6903_v39 = vor.u32 %v8649_v32, %v6902_v31 }
 0x29d   :  { %v8721_v33 = vld [vmem:[#allocation12 + $0x724] sm:$0xf0]  ;;  %4901 = vmatpush.bf16.msrb.mxu1 %v6935_v28  ;;  %4927 = vmatpush.bf16.msrb.mxu3 %v7447_v30 }
 0x29e   :  { %v7414_v34 = vld [vmem:[#allocation12 + $0x8c8] sm:$0xf]  ;;  %v7191_v40 = vor.u32 %v8721_v33, %v7190_v49  ;;  %v6523_v49 = vor.u32 %v8549_v22, %v6520_v23  ;;  %v6392_v22 = vld [vmem:[#allocation12 + $0xe8] sm:$0xf0] }
 0x29f   :  { %v8777_v36 = vld [vmem:[#allocation12 + $0x8e4] sm:$0xf0]  ;;  %4913 = vmatpush.bf16.msrb.mxu2 %v7223_v29  ;;  %4939 = vmatpush.bf16.msra.mxu0 %v7735_v16  ;;  %v8589_v23 = vld [vmem:[#allocation12 + $0x30c] sm:$0xf] }
 0x2a0   :  { %v7702_v37 = vld [vmem:[#allocation12 + $0xb08] sm:$0xf]  ;;  %v7415_v41 = vor.u32 %v8777_v36, %v7414_v34 }
 0x2a1   :  { %v8849_v38 = vld [vmem:[#allocation12 + $0xb24] sm:$0xf0]  ;;  %4902 = vmatpush.bf16.msrb.mxu1 %v6903_v39 }
 0x2a2   :  { %v6870_v43 = vld [vmem:[#allocation12 + $0x488] sm:$0xf]  ;;  %v7703_v47 = vor.u32 %v8849_v38, %v7702_v37  ;;  %4928 = vmatpush.bf16.msrb.mxu3 %v7415_v41  ;;  %v8541_v37 = vld [vmem:[#allocation12 + $0x18c] sm:$0xf] }
 0x2a3   :  { %v8641_v44 = vld [vmem:[#allocation12 + $0x4a4] sm:$0xf0]  ;;  %4914 = vmatpush.bf16.msrb.mxu2 %v7191_v40  ;;  %v6488_v38 = vld [vmem:[#allocation12 + $0x1a8] sm:$0xf0] }
 0x2a4   :  { %v7158_v45 = vld [vmem:[#allocation12 + $0x6c8] sm:$0xf]  ;;  %v6871_v56 = vor.u32 %v8641_v44, %v6870_v43  ;;  %4940 = vmatpush.bf16.msra.mxu0 %v7703_v47  ;;  %v8613_v40 = vld [vmem:[#allocation12 + $0x3cc] sm:$0xf]  ;;  %v6491_v47 = vor.u32 %v8541_v37, %v6488_v38 }
 0x2a5   :  { %v8713_v48 = vld [vmem:[#allocation12 + $0x6e4] sm:$0xf0]  ;;  %v6776_v41 = vld [vmem:[#allocation12 + $0x3e8] sm:$0xf0] }
 0x2a6   :  { %v7382_v50 = vld [vmem:[#allocation12 + $0x888] sm:$0xf]  ;;  %v7159_v57 = vor.u32 %v8713_v48, %v7158_v45  ;;  %4903 = vmatpush.bf16.msrb.mxu1 %v6871_v56  ;;  %v8533_v56 = vld [vmem:[#allocation12 + $0x14c] sm:$0xf] }
 0x2a7   :  { %v8769_v53 = vld [vmem:[#allocation12 + $0x8a4] sm:$0xf0]  ;;  %v6648_v37 = vld [vmem:[#allocation12 + $0x2e8] sm:$0xf0] }
 0x2a8   :  { %v7670_v54 = vld [vmem:[#allocation12 + $0xac8] sm:$0xf]  ;;  %v7383_v35 = vor.u32 %v8769_v53, %v7382_v50  ;;  %4915 = vmatpush.bf16.msrb.mxu2 %v7159_v57  ;;  %v6456_v57 = vld [vmem:[#allocation12 + $0x168] sm:$0xf0] }
 0x2a9   :  { %v8841_v55 = vld [vmem:[#allocation12 + $0xae4] sm:$0xf0] }
 0x2aa   :  { %v6838_v58 = vld [vmem:[#allocation12 + $0x448] sm:$0xf]  ;;  %v7671_v63 = vor.u32 %v8841_v55, %v7670_v54  ;;  %4929 = vmatpush.bf16.msrb.mxu3 %v7383_v35  ;;  %v6779_v54 = vor.u32 %v8613_v40, %v6776_v41  ;;  %v8605_v35 = vld [vmem:[#allocation12 + $0x38c] sm:$0xf] }
 0x2ab   :  { %v8633_v59 = vld [vmem:[#allocation12 + $0x464] sm:$0xf0] }
 0x2ac   :  { %v7126_v61 = vld [vmem:[#allocation12 + $0x688] sm:$0xf]  ;;  %v6839_v4 = vor.u32 %v8633_v59, %v6838_v58  ;;  %4941 = vmatpush.bf16.msra.mxu0 %v7671_v63  ;;  %v6744_v58 = vld [vmem:[#allocation12 + $0x3a8] sm:$0xf0]  ;;  %v6459_v63 = vor.u32 %v8533_v56, %v6456_v57 }
 0x2ad   :  { %v8705_v0 = vld [vmem:[#allocation12 + $0x6a4] sm:$0xf0]  ;;  %v6616_v56 = vld [vmem:[#allocation12 + $0x2a8] sm:$0xf0] }
 0x2ae   :  { %v7350_v52 = vld [vmem:[#allocation12 + $0x848] sm:$0xf]  ;;  %v7127_v46 = vor.u32 %v8705_v0, %v7126_v61  ;;  %4904 = vmatpush.bf16.msrb.mxu1 %v6839_v4  ;;  %v8525_v4 = vld [vmem:[#allocation12 + $0x10c] sm:$0xf] }
 0x2af   :  { %v8761_v27 = vld [vmem:[#allocation12 + $0x864] sm:$0xf0] }
 0x2b0   :  { %v7638_v1 = vld [vmem:[#allocation12 + $0xa88] sm:$0xf]  ;;  %v7351_v6 = vor.u32 %v8761_v27, %v7350_v52  ;;  %4916 = vmatpush.bf16.msrb.mxu2 %v7127_v46  ;;  %v9576_v46 = vpop.f32.mrf.mxu0 }
 0x2b1   :  { %v8833_v3 = vld [vmem:[#allocation12 + $0xaa4] sm:$0xf0] }
 0x2b2   :  { %v6806_v5 = vld [vmem:[#allocation12 + $0x408] sm:$0xf]  ;;  %v7639_v11 = vor.u32 %v8833_v3, %v7638_v1  ;;  %4930 = vmatpush.bf16.msrb.mxu3 %v7351_v6  ;;  %v6747_v1 = vor.u32 %v8605_v35, %v6744_v58  ;;  %v8597_v6 = vld [vmem:[#allocation12 + $0x34c] sm:$0xf] }
 0x2b3   :  { %v8625_v9 = vld [vmem:[#allocation12 + $0x424] sm:$0xf0] }
 0x2b4   :  { %v7094_v10 = vld [vmem:[#allocation12 + $0x648] sm:$0xf]  ;;  %v6807_v7 = vor.u32 %v8625_v9, %v6806_v5  ;;  %4942 = vmatpush.bf16.msra.mxu0 %v7639_v11  ;;  %v6424_v5 = vld [vmem:[#allocation12 + $0x128] sm:$0xf0]  ;;  %v9578_v11 = vpop.f32.mrf.mxu3 }
 0x2b5   :  { %v8697_v60 = vld [vmem:[#allocation12 + $0x664] sm:$0xf0]  ;;  %v6712_v9 = vld [vmem:[#allocation12 + $0x368] sm:$0xf0] }
 0x2b6   :  { %v7318_v13 = vld [vmem:[#allocation12 + $0x808] sm:$0xf]  ;;  %v7095_v24 = vor.u32 %v8697_v60, %v7094_v10  ;;  %4905 = vmatpush.bf16.msrb.mxu1 %v6807_v7  ;;  %v8517_v7 = vld [vmem:[#allocation12 + $0xcc] sm:$0xf] }
 0x2b7   :  { %v8753_v15 = vld [vmem:[#allocation12 + $0x824] sm:$0xf0] }
 0x2b8   :  { %v7606_v18 = vld [vmem:[#allocation12 + $0xa48] sm:$0xf]  ;;  %v7319_v25 = vor.u32 %v8753_v15, %v7318_v13  ;;  %4917 = vmatpush.bf16.msrb.mxu2 %v7095_v24  ;;  %v6427_v13 = vor.u32 %v8525_v4, %v6424_v5  ;;  %v6680_v24 = vld [vmem:[#allocation12 + $0x328] sm:$0xf0] }
 0x2b9   :  { %v8825_v12 = vld [vmem:[#allocation12 + $0xa64] sm:$0xf0]  ;;  %4906 = vmatmul.bf16.vlgmr.msrb.gmra.mxu1 %v9483_v62  ;;  %v6584_v4 = vld [vmem:[#allocation12 + $0x268] sm:$0xf0] }
 0x2ba   :  { %v8054_v19 = vld [vmem:[#allocation12 + $0xdc8] sm:$0xf]  ;;  %v7607_v28 = vor.u32 %v8825_v12, %v7606_v18  ;;  %4931 = vmatpush.bf16.msrb.mxu3 %v7319_v25  ;;  %v8677_v5 = vld [vmem:[#allocation12 + $0x5cc] sm:$0xf] }
 0x2bb   :  { %v8937_v21 = vld [vmem:[#allocation12 + $0xde4] sm:$0xf0] }
 0x2bc   :  { %v7062_v26 = vld [vmem:[#allocation12 + $0x608] sm:$0xf]  ;;  %v8055_v29 = vor.u32 %v8937_v21, %v8054_v19  ;;  %4943 = vmatpush.bf16.msra.mxu0 %v7607_v28  ;;  %v6715_v19 = vor.u32 %v8597_v6, %v6712_v9  ;;  %v6395_v28 = vor.u32 %v8517_v7, %v6392_v22  ;;  %v4675_v40 = vpop.f32.mrf.mxu3  ;;  %v7032_v6 = vld [vmem:[#allocation12 + $0x5e8] sm:$0xf0] }
 0x2bd   :  { %v8689_v30 = vld [vmem:[#allocation12 + $0x624] sm:$0xf0]  ;;  %4932 = vmatmul.bf16.vlgmr.msrb.gmra.mxu3 %v9528_v17  ;;  %v8557_v7 = vld [vmem:[#allocation12 + $0x20c] sm:$0xf] }
 0x2be   :  { %v7574_v31 = vld [vmem:[#allocation12 + $0xa08] sm:$0xf]  ;;  %v7063_v39 = vor.u32 %v8689_v30, %v7062_v26  ;;  %4950 = vmatpush.bf16.msra.mxu1 %v8055_v29  ;;  %4976 = vmatpush.bf16.msra.mxu3 %v6523_v49  ;;  %v6552_v22 = vld [vmem:[#allocation12 + $0x228] sm:$0xf0] }
 0x2bf   :  { %v8817_v32 = vld [vmem:[#allocation12 + $0xa24] sm:$0xf0]  ;;  %v6968_v40 = vld [vmem:[#allocation12 + $0x568] sm:$0xf0] }
 0x2c0   :  { %v8022_v16 = vld [vmem:[#allocation12 + $0xd88] sm:$0xf]  ;;  %v7575_v43 = vor.u32 %v8817_v32, %v7574_v31  ;;  %4918 = vmatpush.bf16.msrb.mxu2 %v7063_v39  ;;  %v6683_v32 = vor.u32 %v8589_v23, %v6680_v24 }
 0x2c1   :  { %v8929_v33 = vld [vmem:[#allocation12 + $0xda4] sm:$0xf0] }
 0x2c2   :  { %v8310_v34 = vld [vmem:[#allocation12 + $0xfc8] sm:$0xf]  ;;  %v8023_v44 = vor.u32 %v8929_v33, %v8022_v16  ;;  %4944 = vmatpush.bf16.msra.mxu0 %v7575_v43  ;;  %4977 = vmatpush.bf16.msra.mxu3 %v6491_v47  ;;  %v8509_v16 = vld [vmem:[#allocation12 + $0x8c] sm:$0xf] }
 0x2c3   :  { %v9001_v36 = vld [vmem:[#allocation12 + $0xfe4] sm:$0xf0]  ;;  %4919 = vmatmul.bf16.vlgmr.msrb.gmra.mxu2 %v9490_v14  ;;  %v6360_v33 = vld [vmem:[#allocation12 + $0xa8] sm:$0xf0] }
 0x2c4   :  { %v8311_v45 = vor.u32 %v9001_v36, %v8310_v34  ;;  %v7990_v48 = vld [vmem:[#allocation12 + $0xd48] sm:$0xf]  ;;  %4951 = vmatpush.bf16.msra.mxu1 %v8023_v44  ;;  %v4688_v34 = vpop.f32.mrf.mxu0  ;;  %v8581_v36 = vld [vmem:[#allocation12 + $0x2cc] sm:$0xf]  ;;  %v6363_v41 = vor.u32 %v8509_v16, %v6360_v33 }
 0x2c5   :  { %v8921_v50 = vld [vmem:[#allocation12 + $0xd64] sm:$0xf0]  ;;  %4945 = vmatmul.bf16.vlgmr.msra.gmra.mxu0 %v9537_v42  ;;  %v6651_v47 = vor.u32 %v8581_v36, %v6648_v37  ;;  %v8869_v16 = vld [vmem:[#allocation12 + $0xbcc] sm:$0xf]  ;;  %v6555_v34 = vor.u32 %v8557_v7, %v6552_v22 }
 0x2c6   :  { %v8278_v53 = vld [vmem:[#allocation12 + $0xf88] sm:$0xf]  ;;  %v7991_v59 = vor.u32 %v8921_v50, %v7990_v48  ;;  %4963 = vmatpush.bf16.msra.mxu2 %v8311_v45  ;;  %4989 = vmatpush.bf16.msrb.mxu0 %v6779_v54  ;;  %v8501_v50 = vld [vmem:[#allocation12 + $0x4c] sm:$0xf]  ;;  %v9580_v54 = vpop.f32.mrf.mxu1 }
 0x2c7   :  { %v8993_v55 = vld [vmem:[#allocation12 + $0xfa4] sm:$0xf0]  ;;  %4978 = vmatpush.bf16.msra.mxu3 %v6459_v63  ;;  %v7800_v33 = vld [vmem:[#allocation12 + $0xbe8] sm:$0xf0] }
 0x2c8   :  { %v8279_v61 = vor.u32 %v8993_v55, %v8278_v53  ;;  %v7958_v0 = vld [vmem:[#allocation12 + $0xd08] sm:$0xf]  ;;  %4952 = vmatpush.bf16.msra.mxu1 %v7991_v59  ;;  %v6328_v53 = vld [vmem:[#allocation12 + $0x68] sm:$0xf0] }
 0x2c9   :  { %v8913_v52 = vld [vmem:[#allocation12 + $0xd24] sm:$0xf0]  ;;  %v8573_v55 = vld [vmem:[#allocation12 + $0x28c] sm:$0xf]  ;;  %v6331_v59 = vor.u32 %v8501_v50, %v6328_v53 }
 0x2ca   :  { %v8246_v27 = vld [vmem:[#allocation12 + $0xf48] sm:$0xf]  ;;  %v7959_v10 = vor.u32 %v8913_v52, %v7958_v0  ;;  %4964 = vmatpush.bf16.msra.mxu2 %v8279_v61  ;;  %4990 = vmatpush.bf16.msrb.mxu0 %v6747_v1  ;;  %v6619_v52 = vor.u32 %v8573_v55, %v6616_v56  ;;  %v6296_v1 = vld [vmem:[#allocation12 + $0x28] sm:$0xf0] }
 0x2cb   :  { %v8985_v3 = vld [vmem:[#allocation12 + $0xf64] sm:$0xf0]  ;;  %4979 = vmatpush.bf16.msra.mxu3 %v6427_v13  ;;  %v7768_v50 = vld [vmem:[#allocation12 + $0xba8] sm:$0xf0] }
 0x2cc   :  { %v8247_v60 = vor.u32 %v8985_v3, %v8246_v27  ;;  %v7926_v15 = vld [vmem:[#allocation12 + $0xcc8] sm:$0xf]  ;;  %4953 = vmatpush.bf16.msra.mxu1 %v7959_v10  ;;  %v8493_v27 = vld [vmem:[#allocation12 + $0xc] sm:$0xf] }
 0x2cd   :  { %v8905_v18 = vld [vmem:[#allocation12 + $0xce4] sm:$0xf0]  ;;  %v8565_v3 = vld [vmem:[#allocation12 + $0x24c] sm:$0xf] }
 0x2ce   :  { %v8214_v12 = vld [vmem:[#allocation12 + $0xf08] sm:$0xf]  ;;  %v7927_v25 = vor.u32 %v8905_v18, %v7926_v15  ;;  %4965 = vmatpush.bf16.msra.mxu2 %v8247_v60  ;;  %4991 = vmatpush.bf16.msrb.mxu0 %v6715_v19  ;;  %v8805_v10 = vld [vmem:[#allocation12 + $0x9cc] sm:$0xf]  ;;  %v6299_v15 = vor.u32 %v8493_v27, %v6296_v1  ;;  %v7035_v19 = vor.u32 %v8677_v5, %v7032_v6  ;;  %v4701_v24 = vpop.f32.mrf.mxu1 }
 0x2cf   :  { %v8977_v21 = vld [vmem:[#allocation12 + $0xf24] sm:$0xf0]  ;;  %4980 = vmatpush.bf16.msra.mxu3 %v6395_v28  ;;  %v7544_v60 = vld [vmem:[#allocation12 + $0x9e8] sm:$0xf0] }
 0x2d0   :  { %v8215_v26 = vor.u32 %v8977_v21, %v8214_v12  ;;  %v7894_v29 = vld [vmem:[#allocation12 + $0xc88] sm:$0xf]  ;;  %4954 = vmatpush.bf16.msra.mxu1 %v7927_v25  ;;  %v6587_v12 = vor.u32 %v8565_v3, %v6584_v4  ;;  %v7547_v23 = vor.u32 %v8805_v10, %v7544_v60  ;;  %v8669_v25 = vld [vmem:[#allocation12 + $0x58c] sm:$0xf] }
 0x2d1   :  { %v8897_v30 = vld [vmem:[#allocation12 + $0xca4] sm:$0xf0]  ;;  %v8741_v28 = vld [vmem:[#allocation12 + $0x7cc] sm:$0xf] }
 0x2d2   :  { %v8182_v31 = vld [vmem:[#allocation12 + $0xec8] sm:$0xf]  ;;  %v7895_v38 = vor.u32 %v8897_v30, %v7894_v29  ;;  %4966 = vmatpush.bf16.msra.mxu2 %v8215_v26  ;;  %4992 = vmatpush.bf16.msrb.mxu0 %v6683_v32  ;;  %v7000_v26 = vld [vmem:[#allocation12 + $0x5a8] sm:$0xf0] }
 0x2d3   :  { %v8969_v49 = vld [vmem:[#allocation12 + $0xee4] sm:$0xf0]  ;;  %4981 = vmatpush.bf16.msra.mxu3 %v6363_v41  ;;  %v7288_v29 = vld [vmem:[#allocation12 + $0x7e8] sm:$0xf0]  ;;  %v7003_v36 = vor.u32 %v8669_v25, %v7000_v26 }
 0x2d4   :  { %v8183_v39 = vor.u32 %v8969_v49, %v8182_v31  ;;  %v7862_v43 = vld [vmem:[#allocation12 + $0xc48] sm:$0xf]  ;;  %4955 = vmatpush.bf16.msra.mxu1 %v7895_v38  ;;  %v8797_v30 = vld [vmem:[#allocation12 + $0x98c] sm:$0xf]  ;;  %v9582_v49 = vpop.f32.mrf.mxu2  ;;  %v7291_v37 = vor.u32 %v8741_v28, %v7288_v29 }
 0x2d5   :  { %v8889_v44 = vld [vmem:[#allocation12 + $0xc64] sm:$0xf0]  ;;  %v7512_v31 = vld [vmem:[#allocation12 + $0x9a8] sm:$0xf0] }
 0x2d6   :  { %v8150_v45 = vld [vmem:[#allocation12 + $0xe88] sm:$0xf]  ;;  %v7863_v57 = vor.u32 %v8889_v44, %v7862_v43  ;;  %4967 = vmatpush.bf16.msra.mxu2 %v8183_v39  ;;  %4993 = vmatpush.bf16.msrb.mxu0 %v6651_v47  ;;  %v7515_v38 = vor.u32 %v8797_v30, %v7512_v31  ;;  %v8661_v39 = vld [vmem:[#allocation12 + $0x54c] sm:$0xf]  ;;  %v7803_v43 = vor.u32 %v8869_v16, %v7800_v33 }
 0x2d7   :  { %v8961_v48 = vld [vmem:[#allocation12 + $0xea4] sm:$0xf0]  ;;  %4982 = vmatpush.bf16.msra.mxu3 %v6331_v59  ;;  %v8733_v41 = vld [vmem:[#allocation12 + $0x78c] sm:$0xf]  ;;  %v6971_v53 = vor.u32 %v8661_v39, %v6968_v40 }
 0x2d8   :  { %v7830_v35 = vld [vmem:[#allocation12 + $0xc08] sm:$0xf]  ;;  %v8151_v58 = vor.u32 %v8961_v48, %v8150_v45  ;;  %4956 = vmatpush.bf16.msra.mxu1 %v7863_v57  ;;  %v7256_v44 = vld [vmem:[#allocation12 + $0x7a8] sm:$0xf0] }
 0x2d9   :  { %v8881_v61 = vld [vmem:[#allocation12 + $0xc24] sm:$0xf0]  ;;  %v8789_v45 = vld [vmem:[#allocation12 + $0x94c] sm:$0xf]  ;;  %v7259_v55 = vor.u32 %v8733_v41, %v7256_v44 }
 0x2da   :  { %v8118_v63 = vld [vmem:[#allocation12 + $0xe48] sm:$0xf]  ;;  %v7831_v9 = vor.u32 %v8881_v61, %v7830_v35  ;;  %4968 = vmatpush.bf16.msra.mxu2 %v8151_v58  ;;  %4994 = vmatpush.bf16.msrb.mxu0 %v6619_v52  ;;  %v7480_v47 = vld [vmem:[#allocation12 + $0x968] sm:$0xf0] }
 0x2db   :  { %v8953_v0 = vld [vmem:[#allocation12 + $0xe64] sm:$0xf0]  ;;  %4983 = vmatpush.bf16.msra.mxu3 %v6299_v15  ;;  %v8861_v48 = vld [vmem:[#allocation12 + $0xb8c] sm:$0xf]  ;;  %v7483_v56 = vor.u32 %v8789_v45, %v7480_v47 }
 0x2dc   :  { %v8119_v13 = vor.u32 %v8953_v0, %v8118_v63  ;;  %v8086_v18 = vld [vmem:[#allocation12 + $0xe08] sm:$0xf]  ;;  %4957 = vmatpush.bf16.msra.mxu1 %v7831_v9  ;;  %v8653_v57 = vld [vmem:[#allocation12 + $0x50c] sm:$0xf]  ;;  %v7771_v59 = vor.u32 %v8861_v48, %v7768_v50  ;;  %v4714_v52 = vpop.f32.mrf.mxu2 }
 0x2dd   :  { %v8945_v21 = vld [vmem:[#allocation12 + $0xe24] sm:$0xf0]  ;;  %v6936_v35 = vld [vmem:[#allocation12 + $0x528] sm:$0xf0] }
 0x2de   :  { %4969 = vmatpush.bf16.msra.mxu2 %v8119_v13  ;;  %v8087_v32 = vor.u32 %v8945_v21, %v8086_v18  ;;  %4995 = vmatpush.bf16.msrb.mxu0 %v6587_v12  ;;  %v8725_v58 = vld [vmem:[#allocation12 + $0x74c] sm:$0xf]  ;;  %v6939_v3 = vor.u32 %v8653_v57, %v6936_v35  ;;  %v9588_v13 = vpop.f32.mrf.mxu0 }
 0x2df   :  { %5028 = vmatpush.bf16.msrb.mxu3 %v7547_v23  ;;  %4958 = vmatmul.bf16.vlgmr.msra.gmra.mxu1 %v9556_v2  ;;  %v7224_v61 = vld [vmem:[#allocation12 + $0x768] sm:$0xf0] }
 0x2e0   :  { %5002 = vmatpush.bf16.msrb.mxu1 %v7035_v19  ;;  %4984 = vmatmul.bf16.vlgmr.msra.gmra.mxu3 %v9454_v51  ;;  %v8781_v63 = vld [vmem:[#allocation12 + $0x90c] sm:$0xf]  ;;  %v7227_v4 = vor.u32 %v8725_v58, %v7224_v61  ;;  %v9590_v19 = vpop.f32.mrf.mxu3 }
 0x2e1   :  { %v7448_v0 = vld [vmem:[#allocation12 + $0x928] sm:$0xf0] }
 0x2e2   :  { %4970 = vmatpush.bf16.msra.mxu2 %v8087_v32  ;;  %4996 = vmatpush.bf16.msrb.mxu0 %v6555_v34  ;;  %v8853_v27 = vld [vmem:[#allocation12 + $0xb4c] sm:$0xf]  ;;  %v7451_v5 = vor.u32 %v8781_v63, %v7448_v0  ;;  %v9592_v34 = vld [vmem:[#allocation13] sm:$0xff] }
 0x2e3   :  { %5029 = vmatpush.bf16.msrb.mxu3 %v7515_v38  ;;  %v7736_v1 = vld [vmem:[#allocation12 + $0xb68] sm:$0xf0] }
 0x2e4   :  { %5003 = vmatpush.bf16.msrb.mxu1 %v7003_v36  ;;  %v8645_v6 = vld [vmem:[#allocation12 + $0x4cc] sm:$0xf]  ;;  %v7739_v60 = vor.u32 %v8853_v27, %v7736_v1 }
 0x2e5   :  { %4971 = vmatmul.bf16.vlgmr.msra.gmra.mxu2 %v9561_v20  ;;  %4997 = vmatmul.bf16.vlgmr.msrb.gmra.mxu0 %v9466_v8  ;;  %v6904_v9 = vld [vmem:[#allocation12 + $0x4e8] sm:$0xf0] }
 0x2e6   :  { %5015 = vmatpush.bf16.msrb.mxu2 %v7291_v37  ;;  %5041 = vmatpush.bf16.msra.mxu0 %v7803_v43  ;;  %v8717_v10 = vld [vmem:[#allocation12 + $0x70c] sm:$0xf]  ;;  %v6907_v22 = vor.u32 %v8645_v6, %v6904_v9  ;;  %v4740_v44 = vpop.f32.mrf.mxu0 }
 0x2e7   :  { %5030 = vmatpush.bf16.msrb.mxu3 %v7483_v56  ;;  %v7192_v15 = vld [vmem:[#allocation12 + $0x728] sm:$0xf0]  ;;  %v2088_v56 = vperm.slane %v9592_v34, 0 }
 0x2e8   :  { %5004 = vmatpush.bf16.msrb.mxu1 %v6971_v53  ;;  %v8773_v18 = vld [vmem:[#allocation12 + $0x8cc] sm:$0xf]  ;;  %v7195_v23 = vor.u32 %v8717_v10, %v7192_v15  ;;  %v4727_v50 = vpop.f32.mrf.mxu3  ;;  %v6526_v10 = vld [vmem:[#allocation12 + $0x1d0] sm:$0xf] }
 0x2e9   :  { %v7416_v12 = vld [vmem:[#allocation12 + $0x8e8] sm:$0xf0] }
 0x2ea   :  { %5016 = vmatpush.bf16.msrb.mxu2 %v7259_v55  ;;  %5042 = vmatpush.bf16.msra.mxu0 %v7771_v59  ;;  %v8845_v21 = vld [vmem:[#allocation12 + $0xb0c] sm:$0xf]  ;;  %v7419_v24 = vor.u32 %v8773_v18, %v7416_v12 }
 0x2eb   :  { %v7704_v7 = vld [vmem:[#allocation12 + $0xb28] sm:$0xf0]  ;;  %5031 = vmatpush.bf16.msrb.mxu3 %v7451_v5 }
 0x2ec   :  { %5005 = vmatpush.bf16.msrb.mxu1 %v6939_v3  ;;  %v8637_v25 = vld [vmem:[#allocation12 + $0x48c] sm:$0xf]  ;;  %v7707_v29 = vor.u32 %v8845_v21, %v7704_v7 }
 0x2ed   :  { %v6872_v26 = vld [vmem:[#allocation12 + $0x4a8] sm:$0xf0] }
 0x2ee   :  { %5017 = vmatpush.bf16.msrb.mxu2 %v7227_v4  ;;  %v8709_v28 = vld [vmem:[#allocation12 + $0x6cc] sm:$0xf]  ;;  %5043 = vmatpush.bf16.msra.mxu0 %v7739_v60  ;;  %v6875_v36 = vor.u32 %v8637_v25, %v6872_v26  ;;  %v8554_v60 = vld [vmem:[#allocation12 + $0x1ec] sm:$0xf0]  ;;  %v4674_v26 = vadd.f32 %v9578_v11, %v2088_v56 }
 0x2ef   :  { %v7160_v30 = vld [vmem:[#allocation12 + $0x6e8] sm:$0xf0]  ;;  %5032 = vmatpush.bf16.msrb.mxu3 %v7419_v24  ;;  %v8538_v56 = vld [vmem:[#allocation12 + $0x16c] sm:$0xf0] }
 0x2f0   :  { %v8765_v31 = vld [vmem:[#allocation12 + $0x88c] sm:$0xf]  ;;  %5006 = vmatpush.bf16.msrb.mxu1 %v6907_v22  ;;  %v7163_v37 = vor.u32 %v8709_v28, %v7160_v30  ;;  %v9595_v22 = vpop.f32.mrf.mxu0  ;;  %v6527_v28 = vor.u32 %v8554_v60, %v6526_v10  ;;  %v4687_v11 = vadd.f32 %v9576_v46, %v4674_v26  ;;  %v8602_v60 = vld [vmem:[#allocation12 + $0x36c] sm:$0xf0] }
 0x2f1   :  { %v7384_v32 = vld [vmem:[#allocation12 + $0x8a8] sm:$0xf0]  ;;  %v6398_v26 = vld [vmem:[#allocation12 + $0xd0] sm:$0xf] }
 0x2f2   :  { %v8837_v16 = vld [vmem:[#allocation12 + $0xacc] sm:$0xf]  ;;  %5018 = vmatpush.bf16.msrb.mxu2 %v7195_v23  ;;  %v7387_v38 = vor.u32 %v8765_v31, %v7384_v32  ;;  %5044 = vmatpush.bf16.msra.mxu0 %v7707_v29  ;;  %v9598_v29 = vpop.f32.mrf.mxu3 }
 0x2f3   :  { %v7672_v33 = vld [vmem:[#allocation12 + $0xae8] sm:$0xf0] }
 0x2f4   :  { %v8629_v39 = vld [vmem:[#allocation12 + $0x44c] sm:$0xf]  ;;  %v7675_v43 = vor.u32 %v8837_v16, %v7672_v33  ;;  %5007 = vmatpush.bf16.msrb.mxu1 %v6875_v36  ;;  %5033 = vmatpush.bf16.msrb.mxu3 %v7387_v38  ;;  %v6494_v33 = vld [vmem:[#allocation12 + $0x190] sm:$0xf] }
 0x2f5   :  { %v6840_v40 = vld [vmem:[#allocation12 + $0x468] sm:$0xf0]  ;;  %v8546_v36 = vld [vmem:[#allocation12 + $0x1ac] sm:$0xf0] }
 0x2f6   :  { %v8701_v41 = vld [vmem:[#allocation12 + $0x68c] sm:$0xf]  ;;  %v6843_v57 = vor.u32 %v8629_v39, %v6840_v40  ;;  %5019 = vmatpush.bf16.msrb.mxu2 %v7163_v37  ;;  %5045 = vmatpush.bf16.msra.mxu0 %v7675_v43  ;;  %v6782_v38 = vld [vmem:[#allocation12 + $0x3d0] sm:$0xf]  ;;  %v6495_v44 = vor.u32 %v8546_v36, %v6494_v33 }
 0x2f7   :  { %v7128_v45 = vld [vmem:[#allocation12 + $0x6a8] sm:$0xf0]  ;;  %v8618_v39 = vld [vmem:[#allocation12 + $0x3ec] sm:$0xf0] }
 0x2f8   :  { %v8757_v47 = vld [vmem:[#allocation12 + $0x84c] sm:$0xf]  ;;  %v7131_v58 = vor.u32 %v8701_v41, %v7128_v45  ;;  %5008 = vmatpush.bf16.msrb.mxu1 %v6843_v57  ;;  %v6783_v50 = vor.u32 %v8618_v39, %v6782_v38  ;;  %v4700_v57 = vadd.f32 %v9580_v54, %v4687_v11 }
 0x2f9   :  { %v7352_v48 = vld [vmem:[#allocation12 + $0x868] sm:$0xf0] }
 0x2fa   :  { %v8829_v53 = vld [vmem:[#allocation12 + $0xa8c] sm:$0xf]  ;;  %v7355_v59 = vor.u32 %v8757_v47, %v7352_v48  ;;  %5020 = vmatpush.bf16.msrb.mxu2 %v7131_v58  ;;  %v8610_v58 = vld [vmem:[#allocation12 + $0x3ac] sm:$0xf0] }
 0x2fb   :  { %v7640_v55 = vld [vmem:[#allocation12 + $0xaa8] sm:$0xf0] }
 0x2fc   :  { %v8621_v35 = vld [vmem:[#allocation12 + $0x40c] sm:$0xf]  ;;  %v7643_v52 = vor.u32 %v8829_v53, %v7640_v55  ;;  %5034 = vmatpush.bf16.msrb.mxu3 %v7355_v59  ;;  %v6462_v55 = vld [vmem:[#allocation12 + $0x150] sm:$0xf]  ;;  %v4751_v59 = vpop.f32.mrf.mxu1 }
 0x2fd   :  { %v6808_v61 = vld [vmem:[#allocation12 + $0x428] sm:$0xf0] }
 0x2fe   :  { %v8693_v63 = vld [vmem:[#allocation12 + $0x64c] sm:$0xf]  ;;  %v6811_v9 = vor.u32 %v8621_v35, %v6808_v61  ;;  %5046 = vmatpush.bf16.msra.mxu0 %v7643_v52  ;;  %v6750_v35 = vld [vmem:[#allocation12 + $0x390] sm:$0xf]  ;;  %v4792_v61 = vpop.f32.mrf.mxu0  ;;  %v6463_v52 = vor.u32 %v8538_v56, %v6462_v55 }
 0x2ff   :  { %v7096_v0 = vld [vmem:[#allocation12 + $0x668] sm:$0xf0]  ;;  %v6751_v54 = vor.u32 %v8610_v58, %v6750_v35 }
 0x300   :  { %v8749_v27 = vld [vmem:[#allocation12 + $0x80c] sm:$0xf]  ;;  %v7099_v15 = vor.u32 %v8693_v63, %v7096_v0  ;;  %5009 = vmatpush.bf16.msrb.mxu1 %v6811_v9  ;;  %v4713_v63 = vadd.f32 %v9582_v49, %v4700_v57  ;;  %v8530_v9 = vld [vmem:[#allocation12 + $0x12c] sm:$0xf0] }
 0x301   :  { %v7320_v1 = vld [vmem:[#allocation12 + $0x828] sm:$0xf0]  ;;  %v6718_v49 = vld [vmem:[#allocation12 + $0x350] sm:$0xf] }
 0x302   :  { %v8821_v3 = vld [vmem:[#allocation12 + $0xa4c] sm:$0xf]  ;;  %v7323_v18 = vor.u32 %v8749_v27, %v7320_v1  ;;  %5021 = vmatpush.bf16.msrb.mxu2 %v7099_v15  ;;  %v4779_v27 = vpop.f32.mrf.mxu3  ;;  %v4726_v10 = vadd.f32 %v9590_v19, %v4713_v63 }
 0x303   :  { %v7608_v4 = vld [vmem:[#allocation12 + $0xa68] sm:$0xf0]  ;;  %5010 = vmatmul.bf16.vlgmr.msrb.gmra.mxu1 %v9483_v62  ;;  %v6622_v27 = vld [vmem:[#allocation12 + $0x290] sm:$0xf] }
 0x304   :  { %v8933_v5 = vld [vmem:[#allocation12 + $0xdcc] sm:$0xf]  ;;  %v7611_v21 = vor.u32 %v8821_v3, %v7608_v4  ;;  %5035 = vmatpush.bf16.msrb.mxu3 %v7323_v18  ;;  %v4739_v19 = vadd.f32 %v9588_v13, %v4726_v10  ;;  %v4764_v13 = vpop.f32.mrf.mxu2 }
 0x305   :  { %v8056_v6 = vld [vmem:[#allocation12 + $0xde8] sm:$0xf0] }
 0x306   :  { %v8685_v12 = vld [vmem:[#allocation12 + $0x60c] sm:$0xf]  ;;  %v8059_v7 = vor.u32 %v8933_v5, %v8056_v6  ;;  %5047 = vmatpush.bf16.msra.mxu0 %v7611_v21  ;;  %v6430_v6 = vld [vmem:[#allocation12 + $0x110] sm:$0xf]  ;;  %v9609_v33 = vpop.f32.mrf.mxu0  ;;  %v4752_v36 = vadd.f32 %v4751_v59, %v4739_v19 }
 0x307   :  { %v7064_v23 = vld [vmem:[#allocation12 + $0x628] sm:$0xf0]  ;;  %5036 = vmatmul.bf16.vlgmr.msrb.gmra.mxu3 %v9528_v17  ;;  %v7550_v19 = vld [vmem:[#allocation12 + $0x9d0] sm:$0xf] }
 0x308   :  { %v8813_v24 = vld [vmem:[#allocation12 + $0xa0c] sm:$0xf]  ;;  %v7067_v37 = vor.u32 %v8685_v12, %v7064_v23  ;;  %5054 = vmatpush.bf16.msra.mxu1 %v8059_v7  ;;  %5080 = vmatpush.bf16.msra.mxu3 %v6527_v28  ;;  %v6431_v12 = vor.u32 %v8530_v9, %v6430_v6  ;;  %v8522_v28 = vld [vmem:[#allocation12 + $0xec] sm:$0xf0] }
 0x309   :  { %v7576_v25 = vld [vmem:[#allocation12 + $0xa28] sm:$0xf0]  ;;  %v6399_v38 = vor.u32 %v8522_v28, %v6398_v26  ;;  %v8682_v26 = vld [vmem:[#allocation12 + $0x5ec] sm:$0xf0] }
 0x30a   :  { %v8925_v30 = vld [vmem:[#allocation12 + $0xd8c] sm:$0xf]  ;;  %v7579_v40 = vor.u32 %v8813_v24, %v7576_v25  ;;  %5022 = vmatpush.bf16.msrb.mxu2 %v7067_v37  ;;  %v6719_v24 = vor.u32 %v8602_v60, %v6718_v49  ;;  %v9611_v39 = vpop.f32.mrf.mxu3 }
 0x30b   :  { %v8024_v31 = vld [vmem:[#allocation12 + $0xda8] sm:$0xf0] }
 0x30c   :  { %v8997_v32 = vld [vmem:[#allocation12 + $0xfcc] sm:$0xf]  ;;  %v8027_v41 = vor.u32 %v8925_v30, %v8024_v31  ;;  %5048 = vmatpush.bf16.msra.mxu0 %v7579_v40  ;;  %5081 = vmatpush.bf16.msra.mxu3 %v6495_v44  ;;  %v6686_v30 = vld [vmem:[#allocation12 + $0x310] sm:$0xf] }
 0x30d   :  { %v8312_v16 = vld [vmem:[#allocation12 + $0xfe8] sm:$0xf0]  ;;  %5023 = vmatmul.bf16.vlgmr.msrb.gmra.mxu2 %v9490_v14  ;;  %v8594_v31 = vld [vmem:[#allocation12 + $0x32c] sm:$0xf0] }
 0x30e   :  { %v8315_v43 = vor.u32 %v8997_v32, %v8312_v16  ;;  %v8917_v45 = vld [vmem:[#allocation12 + $0xd4c] sm:$0xf]  ;;  %5055 = vmatpush.bf16.msra.mxu1 %v8027_v41  ;;  %v4753_v16 = vpop.f32.mrf.mxu1 }
 0x30f   :  { %v7992_v47 = vld [vmem:[#allocation12 + $0xd68] sm:$0xf0]  ;;  %5049 = vmatmul.bf16.vlgmr.msra.gmra.mxu0 %v9537_v42 }
 0x310   :  { %v8989_v48 = vld [vmem:[#allocation12 + $0xf8c] sm:$0xf]  ;;  %v7995_v46 = vor.u32 %v8917_v45, %v7992_v47  ;;  %5067 = vmatpush.bf16.msra.mxu2 %v8315_v43  ;;  %5093 = vmatpush.bf16.msrb.mxu0 %v6783_v50  ;;  %v6687_v43 = vor.u32 %v8594_v31, %v6686_v30  ;;  %v6366_v45 = vld [vmem:[#allocation12 + $0x90] sm:$0xf] }
 0x311   :  { %v8280_v53 = vld [vmem:[#allocation12 + $0xfa8] sm:$0xf0]  ;;  %5082 = vmatpush.bf16.msra.mxu3 %v6463_v52  ;;  %v8514_v47 = vld [vmem:[#allocation12 + $0xac] sm:$0xf0] }
 0x312   :  { %v8283_v0 = vor.u32 %v8989_v48, %v8280_v53  ;;  %v8909_v1 = vld [vmem:[#allocation12 + $0xd0c] sm:$0xf]  ;;  %5056 = vmatpush.bf16.msra.mxu1 %v7995_v46  ;;  %v4765_v48 = vadd.f32 %v4764_v13, %v4752_v36  ;;  %v6654_v50 = vld [vmem:[#allocation12 + $0x2d0] sm:$0xf]  ;;  %v6367_v58 = vor.u32 %v8514_v47, %v6366_v45  ;;  %v4831_v49 = vpop.f32.mrf.mxu3 }
 0x313   :  { %v7960_v3 = vld [vmem:[#allocation12 + $0xd28] sm:$0xf0]  ;;  %v8586_v53 = vld [vmem:[#allocation12 + $0x2ec] sm:$0xf0] }
 0x314   :  { %v8981_v4 = vld [vmem:[#allocation12 + $0xf4c] sm:$0xf]  ;;  %v7963_v15 = vor.u32 %v8909_v1, %v7960_v3  ;;  %5068 = vmatpush.bf16.msra.mxu2 %v8283_v0  ;;  %5094 = vmatpush.bf16.msrb.mxu0 %v6751_v54  ;;  %v8332_v57 = vmul.f32 -1.442695, %v4765_v48  ;;  %v6655_v61 = vor.u32 %v8586_v53, %v6654_v50  ;;  %v6334_v0 = vld [vmem:[#allocation12 + $0x50] sm:$0xf] }
 0x315   :  { %v8248_v5 = vld [vmem:[#allocation12 + $0xf68] sm:$0xf0]  ;;  %5083 = vmatpush.bf16.msra.mxu3 %v6431_v12  ;;  %v8506_v52 = vld [vmem:[#allocation12 + $0x6c] sm:$0xf0]  ;;  %v2089_v3 = vperm.slane %v9592_v34, 1 }
 0x316   :  { %v8251_v18 = vor.u32 %v8981_v4, %v8248_v5  ;;  %v8901_v21 = vld [vmem:[#allocation12 + $0xccc] sm:$0xf]  ;;  %5057 = vmatpush.bf16.msra.mxu1 %v7963_v15  ;;  %9063 = vpow2.f32 %v8332_v57  ;;  %v8578_v1 = vld [vmem:[#allocation12 + $0x2ac] sm:$0xf0]  ;;  %v9614_v54 = vpop.f32.mrf.mxu1  ;;  %v4844_v5 = vpop.f32.mrf.mxu0  ;;  %v6335_v10 = vor.u32 %v8506_v52, %v6334_v0 }
 0x317   :  { %v7928_v7 = vld [vmem:[#allocation12 + $0xce8] sm:$0xf0]  ;;  %v6623_v12 = vor.u32 %v8578_v1, %v6622_v27  ;;  %v6590_v34 = vld [vmem:[#allocation12 + $0x250] sm:$0xf] }
 0x318   :  { %v8973_v23 = vld [vmem:[#allocation12 + $0xf0c] sm:$0xf]  ;;  %v7931_v32 = vor.u32 %v8901_v21, %v7928_v7  ;;  %5069 = vmatpush.bf16.msra.mxu2 %v8251_v18  ;;  %5095 = vmatpush.bf16.msrb.mxu0 %v6719_v24  ;;  %v4766_v21 = vpop.f32.mrf.mxu2  ;;  %v6302_v7 = vld [vmem:[#allocation12 + $0x10] sm:$0xf] }
 0x319   :  { %v8216_v25 = vld [vmem:[#allocation12 + $0xf28] sm:$0xf0]  ;;  %5084 = vmatpush.bf16.msra.mxu3 %v6399_v38  ;;  %v8570_v24 = vld [vmem:[#allocation12 + $0x26c] sm:$0xf0]  ;;  %v4778_v38 = vadd.f32 %v9598_v29, %v2089_v3 }
 0x31a   :  { %v8219_v37 = vor.u32 %v8973_v23, %v8216_v25  ;;  %v8893_v40 = vld [vmem:[#allocation12 + $0xc8c] sm:$0xf]  ;;  %5058 = vmatpush.bf16.msra.mxu1 %v7931_v32  ;;  %v8498_v23 = vld [vmem:[#allocation12 + $0x2c] sm:$0xf0] }
 0x31b   :  { %v7896_v41 = vld [vmem:[#allocation12 + $0xca8] sm:$0xf0]  ;;  %v7038_v25 = vld [vmem:[#allocation12 + $0x5d0] sm:$0xf]  ;;  %v6303_v16 = vor.u32 %v8498_v23, %v6302_v7 }
 0x31c   :  { %v8965_v11 = vld [vmem:[#allocation12 + $0xecc] sm:$0xf]  ;;  %v7899_v55 = vor.u32 %v8893_v40, %v7896_v41  ;;  %5070 = vmatpush.bf16.msra.mxu2 %v8219_v37  ;;  %5096 = vmatpush.bf16.msrb.mxu0 %v6687_v43  ;;  %v8810_v30 = vld [vmem:[#allocation12 + $0x9ec] sm:$0xf0]  ;;  %v9064_v31 = vpop.eup %9063  ;;  %v6591_v41 = vor.u32 %v8570_v24, %v6590_v34 }
 0x31d   :  { %v8184_v44 = vld [vmem:[#allocation12 + $0xee8] sm:$0xf0]  ;;  %5085 = vmatpush.bf16.msra.mxu3 %v6367_v58  ;;  %v9617_v40 = vadd.f32 1.0, %v9064_v31  ;;  %v6558_v43 = vld [vmem:[#allocation12 + $0x210] sm:$0xf]  ;;  %v4791_v58 = vadd.f32 %v9595_v22, %v4778_v38 }
 0x31e   :  { %v8885_v56 = vld [vmem:[#allocation12 + $0xc4c] sm:$0xf]  ;;  %v8187_v35 = vor.u32 %v8965_v11, %v8184_v44  ;;  %5059 = vmatpush.bf16.msra.mxu1 %v7899_v55  ;;  %v7039_v11 = vor.u32 %v8682_v26, %v7038_v25  ;;  %v8562_v13 = vld [vmem:[#allocation12 + $0x22c] sm:$0xf0]  ;;  %v7551_v44 = vor.u32 %v8810_v30, %v7550_v19  ;;  %v4805_v50 = vpop.f32.mrf.mxu1 }
 0x31f   :  { %v7864_v46 = vld [vmem:[#allocation12 + $0xc68] sm:$0xf0]  ;;  %v7006_v45 = vld [vmem:[#allocation12 + $0x590] sm:$0xf]  ;;  %9065 = vrcp.f32 %v9617_v40  ;;  %v4804_v3 = vadd.f32 %v9614_v54, %v4791_v58  ;;  %vm5533_vm13 = vweird.f32 %v9617_v40  ;;  %v9644_v58 = vpop.f32.mrf.mxu0 }
 0x320   :  { %v8957_v59 = vld [vmem:[#allocation12 + $0xe8c] sm:$0xf]  ;;  %v7867_v4 = vor.u32 %v8885_v56, %v7864_v46  ;;  %5071 = vmatpush.bf16.msra.mxu2 %v8187_v35  ;;  %5097 = vmatpush.bf16.msrb.mxu0 %v6655_v61  ;;  %v8674_v47 = vld [vmem:[#allocation12 + $0x5ac] sm:$0xf0]  ;;  %v6559_v46 = vor.u32 %v8562_v13, %v6558_v43  ;;  %v4816_v61 = vpop.f32.mrf.mxu2  ;;  %v5537_v43 = vand.u32 2147483647, %v9617_v40 }
 0x321   :  { %v8152_v63 = vld [vmem:[#allocation12 + $0xea8] sm:$0xf0]  ;;  %5086 = vmatpush.bf16.msra.mxu3 %v6335_v10  ;;  %v7294_v48 = vld [vmem:[#allocation12 + $0x7d0] sm:$0xf] }
 0x322   :  { %v8877_v6 = vld [vmem:[#allocation12 + $0xc0c] sm:$0xf]  ;;  %v8155_v9 = vor.u32 %v8957_v59, %v8152_v63  ;;  %5060 = vmatpush.bf16.msra.mxu1 %v7867_v4  ;;  %v8746_v53 = vld [vmem:[#allocation12 + $0x7ec] sm:$0xf0]  ;;  %v7007_v59 = vor.u32 %v8674_v47, %v7006_v45  ;;  %vm5538_vm15 = vcmp.eq.f32.partialorder %v5537_v43, 8.507059e+37 }
 0x323   :  { %v7832_v60 = vld [vmem:[#allocation12 + $0xc28] sm:$0xf0]  ;;  %v7518_v55 = vld [vmem:[#allocation12 + $0x990] sm:$0xf]  ;;  %v7295_v63 = vor.u32 %v8746_v53, %v7294_v48 }
 0x324   :  { %v8949_v15 = vld [vmem:[#allocation12 + $0xe4c] sm:$0xf]  ;;  %v7835_v28 = vor.u32 %v8877_v6, %v7832_v60  ;;  %5072 = vmatpush.bf16.msra.mxu2 %v8155_v9  ;;  %5098 = vmatpush.bf16.msrb.mxu0 %v6623_v12  ;;  %v8802_v56 = vld [vmem:[#allocation12 + $0x9ac] sm:$0xf0]  ;;  %v4817_v60 = vadd.f32 %v4816_v61, %v4804_v3 }
 0x325   :  { %v8120_v18 = vld [vmem:[#allocation12 + $0xe68] sm:$0xf0]  ;;  %5087 = vmatpush.bf16.msra.mxu3 %v6303_v16  ;;  %v7806_v57 = vld [vmem:[#allocation12 + $0xbd0] sm:$0xf]  ;;  %v7519_v0 = vor.u32 %v8802_v56, %v7518_v55  ;;  %v9624_v49 = vpop.eup %9065 }
 0x326   :  { %v8123_v32 = vor.u32 %v8949_v15, %v8120_v18  ;;  %v8941_v36 = vld [vmem:[#allocation12 + $0xe0c] sm:$0xf]  ;;  %5061 = vmatpush.bf16.msra.mxu1 %v7835_v28  ;;  %v8874_v35 = vld [vmem:[#allocation12 + $0xbec] sm:$0xf0]  ;;  %v5529_v12 = vmul.f32 %v9624_v49, %v9617_v40  ;;  %v4855_v25 = vpop.f32.mrf.mxu1  ;;  %v4830_v16 = vadd.f32 %v9611_v39, %v4817_v60  ;;  %vm5534_vm12 = vweird.f32 %v9624_v49 }
 0x327   :  { %v8088_v37 = vld [vmem:[#allocation12 + $0xe28] sm:$0xf0]  ;;  %v6974_v52 = vld [vmem:[#allocation12 + $0x550] sm:$0xf]  ;;  %v7807_v4 = vor.u32 %v8874_v35, %v7806_v57  ;;  %vm9639_vm14 = vmor %vm5533_vm13, %vm5534_vm12 }
 0x328   :  { %5073 = vmatpush.bf16.msra.mxu2 %v8123_v32  ;;  %v8091_v29 = vor.u32 %v8941_v36, %v8088_v37  ;;  %5099 = vmatpush.bf16.msrb.mxu0 %v6591_v41  ;;  %v8666_v27 = vld [vmem:[#allocation12 + $0x56c] sm:$0xf0]  ;;  %v5530_v19 = vsub.f32 1.0, %v5529_v12  ;;  %v5539_v32 = vand.u32 2147483648, %v9617_v40  ;;  %v4818_v38 = vpop.f32.mrf.mxu2  ;;  %v4843_v35 = vadd.f32 %v9609_v33, %v4830_v16 }
 0x329   :  { %5132 = vmatpush.bf16.msrb.mxu3 %v7551_v44  ;;  %5062 = vmatmul.bf16.vlgmr.msra.gmra.mxu1 %v9556_v2  ;;  %v7262_v1 = vld [vmem:[#allocation12 + $0x790] sm:$0xf]  ;;  %v6975_v15 = vor.u32 %v8666_v27, %v6974_v52 }
 0x32a   :  { %5106 = vmatpush.bf16.msrb.mxu1 %v7039_v11  ;;  %5088 = vmatmul.bf16.vlgmr.msra.gmra.mxu3 %v9454_v51  ;;  %v8738_v5 = vld [vmem:[#allocation12 + $0x7ac] sm:$0xf0]  ;;  %v5531_v11 = vmul.f32 %v9624_v49, %v5530_v19  ;;  %v5540_v57 = vor.u32 1.1754944e-38, %v5539_v32 }
 0x32b   :  { %v7486_v22 = vld [vmem:[#allocation12 + $0x950] sm:$0xf]  ;;  %v7263_v54 = vor.u32 %v8738_v5, %v7262_v1 }
 0x32c   :  { %v8794_v6 = vld [vmem:[#allocation12 + $0x96c] sm:$0xf0]  ;;  %5074 = vmatpush.bf16.msra.mxu2 %v8091_v29  ;;  %5100 = vmatpush.bf16.msrb.mxu0 %v6559_v46  ;;  %v5532_v53 = vadd.f32 %v9624_v49, %v5531_v11 }
 0x32d   :  { %v7774_v9 = vld [vmem:[#allocation12 + $0xb90] sm:$0xf]  ;;  %5133 = vmatpush.bf16.msrb.mxu3 %v7519_v0  ;;  %v7487_v21 = vor.u32 %v8794_v6, %v7486_v22  ;;  %v9649_v0 = vpop.f32.mrf.mxu3 }
 0x32e   :  { %v8866_v10 = vld [vmem:[#allocation12 + $0xbac] sm:$0xf0]  ;;  %5107 = vmatpush.bf16.msrb.mxu1 %v7007_v59  ;;  %v5536_v40 = vsel %vm9639_vm14, %v9624_v49, %v5532_v53  ;;  %v4857_v3 = vpop.f32.mrf.mxu1  ;;  %v8550_v53 = vld [vmem:[#allocation12 + $0x1d4] sm:$0xf] }
 0x32f   :  { %v6942_v18 = vld [vmem:[#allocation12 + $0x510] sm:$0xf]  ;;  %5075 = vmatmul.bf16.vlgmr.msra.gmra.mxu2 %v9561_v20  ;;  %v7775_v24 = vor.u32 %v8866_v10, %v7774_v9  ;;  %5101 = vmatmul.bf16.vlgmr.msrb.gmra.mxu0 %v9466_v8  ;;  %v5541_v1 = vsel %vm5538_vm15, %v5540_v57, %v5536_v40  ;;  %v4856_v10 = vadd.f32 %v4855_v25, %v4843_v35 }
 0x330   :  { %5119 = vmatpush.bf16.msrb.mxu2 %v7295_v63  ;;  %v8658_v7 = vld [vmem:[#allocation12 + $0x52c] sm:$0xf0]  ;;  %5145 = vmatpush.bf16.msra.mxu0 %v7807_v4  ;;  %5648 = vst [vmem:[%s9808_s9] sm:$0xff] %v5541_v1 }
 0x331   :  { %v7230_v23 = vld [vmem:[#allocation12 + $0x750] sm:$0xf]  ;;  %v6943_v36 = vor.u32 %v8658_v7, %v6942_v18  ;;  %5134 = vmatpush.bf16.msrb.mxu3 %v7487_v21  ;;  %v4868_v18 = vpop.f32.mrf.mxu2 }
 0x332   :  { %v8730_v34 = vld [vmem:[#allocation12 + $0x76c] sm:$0xf0]  ;;  %5108 = vmatpush.bf16.msrb.mxu1 %v6975_v15 }
 0x333   :  { %v7454_v26 = vld [vmem:[#allocation12 + $0x910] sm:$0xf]  ;;  %v7231_v37 = vor.u32 %v8730_v34, %v7230_v23  ;;  %v4869_v23 = vadd.f32 %v4868_v18, %v4856_v10  ;;  %v8614_v10 = vld [vmem:[#allocation12 + $0x3d4] sm:$0xf] }
 0x334   :  { %v8786_v28 = vld [vmem:[#allocation12 + $0x92c] sm:$0xf0]  ;;  %5120 = vmatpush.bf16.msrb.mxu2 %v7263_v54  ;;  %5146 = vmatpush.bf16.msra.mxu0 %v7775_v24 }
 0x335   :  { %v7742_v30 = vld [vmem:[#allocation12 + $0xb50] sm:$0xf]  ;;  %v7455_v13 = vor.u32 %v8786_v28, %v7454_v26  ;;  %v8333_v25 = vmul.f32 -1.442695, %v4869_v23 }
 0x336   :  { %v8858_v31 = vld [vmem:[#allocation12 + $0xb6c] sm:$0xf0]  ;;  %5109 = vmatpush.bf16.msrb.mxu1 %v6943_v36 }
 0x337   :  { %v6910_v41 = vld [vmem:[#allocation12 + $0x4d0] sm:$0xf]  ;;  %v7743_v47 = vor.u32 %v8858_v31, %v7742_v30  ;;  %5135 = vmatpush.bf16.msrb.mxu3 %v7455_v13  ;;  %v4896_v30 = vpop.f32.mrf.mxu0  ;;  %9067 = vpow2.f32 %v8333_v25 }
 0x338   :  { %v8650_v44 = vld [vmem:[#allocation12 + $0x4ec] sm:$0xf0]  ;;  %5121 = vmatpush.bf16.msrb.mxu2 %v7231_v37  ;;  %v4883_v37 = vpop.f32.mrf.mxu3 }
 0x339   :  { %v7198_v45 = vld [vmem:[#allocation12 + $0x710] sm:$0xf]  ;;  %v6911_v46 = vor.u32 %v8650_v44, %v6910_v41  ;;  %5147 = vmatpush.bf16.msra.mxu0 %v7743_v47  ;;  %v4870_v57 = vpop.f32.mrf.mxu2 }
 0x33a   :  { %v8722_v48 = vld [vmem:[#allocation12 + $0x72c] sm:$0xf0] }
 0x33b   :  { %v7422_v39 = vld [vmem:[#allocation12 + $0x8d0] sm:$0xf]  ;;  %v7199_v61 = vor.u32 %v8722_v48, %v7198_v45  ;;  %5110 = vmatpush.bf16.msrb.mxu1 %v6911_v46 }
 0x33c   :  { %v8778_v50 = vld [vmem:[#allocation12 + $0x8ec] sm:$0xf0] }
 0x33d   :  { %v7710_v55 = vld [vmem:[#allocation12 + $0xb10] sm:$0xf]  ;;  %v7423_v63 = vor.u32 %v8778_v50, %v7422_v39  ;;  %5122 = vmatpush.bf16.msrb.mxu2 %v7199_v61  ;;  %v9068_v3 = vpop.eup %9067 }
 0x33e   :  { %v8850_v56 = vld [vmem:[#allocation12 + $0xb2c] sm:$0xf0] }
 0x33f   :  { %v6878_v59 = vld [vmem:[#allocation12 + $0x490] sm:$0xf]  ;;  %v7711_v33 = vor.u32 %v8850_v56, %v7710_v55  ;;  %5136 = vmatpush.bf16.msrb.mxu3 %v7423_v63  ;;  %v6528_v55 = vld [vmem:[#allocation12 + $0x1f0] sm:$0xf0] }
 0x340   :  { %v8642_v52 = vld [vmem:[#allocation12 + $0x4ac] sm:$0xf0] }
 0x341   :  { %v7166_v27 = vld [vmem:[#allocation12 + $0x6d0] sm:$0xf]  ;;  %v6879_v49 = vor.u32 %v8642_v52, %v6878_v59  ;;  %5148 = vmatpush.bf16.msra.mxu0 %v7711_v33  ;;  %v6531_v52 = vor.u32 %v8550_v53, %v6528_v55 }
 0x342   :  { %v8714_v4 = vld [vmem:[#allocation12 + $0x6ec] sm:$0xf0] }
 0x343   :  { %v7390_v5 = vld [vmem:[#allocation12 + $0x890] sm:$0xf]  ;;  %v7167_v60 = vor.u32 %v8714_v4, %v7166_v27  ;;  %5111 = vmatpush.bf16.msrb.mxu1 %v6879_v49  ;;  %v6784_v49 = vld [vmem:[#allocation12 + $0x3f0] sm:$0xf0] }
 0x344   :  { %v8770_v22 = vld [vmem:[#allocation12 + $0x8ac] sm:$0xf0]  ;;  %v6787_v23 = vor.u32 %v8614_v10, %v6784_v49 }
 0x345   :  { %v7678_v6 = vld [vmem:[#allocation12 + $0xad0] sm:$0xf]  ;;  %v7391_v15 = vor.u32 %v8770_v22, %v7390_v5  ;;  %5123 = vmatpush.bf16.msrb.mxu2 %v7167_v60  ;;  %v8542_v5 = vld [vmem:[#allocation12 + $0x194] sm:$0xf] }
 0x346   :  { %v8842_v9 = vld [vmem:[#allocation12 + $0xaec] sm:$0xf0]  ;;  %v6496_v22 = vld [vmem:[#allocation12 + $0x1b0] sm:$0xf0] }
 0x347   :  { %v6846_v12 = vld [vmem:[#allocation12 + $0x450] sm:$0xf]  ;;  %v7679_v7 = vor.u32 %v8842_v9, %v7678_v6  ;;  %5137 = vmatpush.bf16.msrb.mxu3 %v7391_v15  ;;  %v9654_v6 = vadd.f32 1.0, %v9068_v3 }
 0x348   :  { %v8634_v54 = vld [vmem:[#allocation12 + $0x46c] sm:$0xf0] }
 0x349   :  { %v7134_v21 = vld [vmem:[#allocation12 + $0x690] sm:$0xf]  ;;  %v6847_v31 = vor.u32 %v8634_v54, %v6846_v12  ;;  %5149 = vmatpush.bf16.msra.mxu0 %v7679_v7  ;;  %9069 = vrcp.f32 %v9654_v6  ;;  %v6499_v12 = vor.u32 %v8542_v5, %v6496_v22  ;;  %v9668_v5 = vpop.f32.mrf.mxu3  ;;  %vm5548_vm1 = vweird.f32 %v9654_v6 }
 0x34a   :  { %v8706_v34 = vld [vmem:[#allocation12 + $0x6ac] sm:$0xf0] }
 0x34b   :  { %v7358_v24 = vld [vmem:[#allocation12 + $0x850] sm:$0xf]  ;;  %v7135_v16 = vor.u32 %v8706_v34, %v7134_v21  ;;  %5112 = vmatpush.bf16.msrb.mxu1 %v6847_v31 }
 0x34c   :  { %v8762_v26 = vld [vmem:[#allocation12 + $0x86c] sm:$0xf0] }
 0x34d   :  { %v7646_v28 = vld [vmem:[#allocation12 + $0xa90] sm:$0xf]  ;;  %v7359_v36 = vor.u32 %v8762_v26, %v7358_v24  ;;  %5124 = vmatpush.bf16.msrb.mxu2 %v7135_v16  ;;  %v8534_v24 = vld [vmem:[#allocation12 + $0x154] sm:$0xf] }
 0x34e   :  { %v8834_v19 = vld [vmem:[#allocation12 + $0xaac] sm:$0xf0]  ;;  %v6464_v26 = vld [vmem:[#allocation12 + $0x170] sm:$0xf0] }
 0x34f   :  { %v6814_v32 = vld [vmem:[#allocation12 + $0x410] sm:$0xf]  ;;  %v7647_v43 = vor.u32 %v8834_v19, %v7646_v28  ;;  %5138 = vmatpush.bf16.msrb.mxu3 %v7359_v36  ;;  %v8606_v28 = vld [vmem:[#allocation12 + $0x394] sm:$0xf]  ;;  %v6467_v31 = vor.u32 %v8534_v24, %v6464_v26 }
 0x350   :  { %v8626_v38 = vld [vmem:[#allocation12 + $0x42c] sm:$0xf0]  ;;  %v6752_v19 = vld [vmem:[#allocation12 + $0x3b0] sm:$0xf0] }
 0x351   :  { %v7102_v41 = vld [vmem:[#allocation12 + $0x650] sm:$0xf]  ;;  %v6815_v50 = vor.u32 %v8626_v38, %v6814_v32  ;;  %5150 = vmatpush.bf16.msra.mxu0 %v7647_v43  ;;  %v6755_v37 = vor.u32 %v8606_v28, %v6752_v19  ;;  %v9660_v38 = vpop.f32.mrf.mxu1  ;;  %v6432_v43 = vld [vmem:[#allocation12 + $0x130] sm:$0xf0]  ;;  %v9672_v19 = vpop.f32.mrf.mxu2 }
 0x352   :  { %v8698_v11 = vld [vmem:[#allocation12 + $0x66c] sm:$0xf0] }
 0x353   :  { %v7326_v13 = vld [vmem:[#allocation12 + $0x810] sm:$0xf]  ;;  %v7103_v56 = vor.u32 %v8698_v11, %v7102_v41  ;;  %5113 = vmatpush.bf16.msrb.mxu1 %v6815_v50  ;;  %v8526_v11 = vld [vmem:[#allocation12 + $0x114] sm:$0xf] }
 0x354   :  { %v8754_v44 = vld [vmem:[#allocation12 + $0x82c] sm:$0xf0]  ;;  %v6435_v53 = vor.u32 %v8526_v11, %v6432_v43  ;;  %v6624_v11 = vld [vmem:[#allocation12 + $0x2b0] sm:$0xf0] }
 0x355   :  { %v7614_v45 = vld [vmem:[#allocation12 + $0xa50] sm:$0xf]  ;;  %v7327_v29 = vor.u32 %v8754_v44, %v7326_v13  ;;  %5125 = vmatpush.bf16.msrb.mxu2 %v7103_v56  ;;  %v9070_v13 = vpop.eup %9069  ;;  %v8598_v44 = vld [vmem:[#allocation12 + $0x354] sm:$0xf] }
 0x356   :  { %v8826_v47 = vld [vmem:[#allocation12 + $0xa6c] sm:$0xf0]  ;;  %5114 = vmatmul.bf16.vlgmr.msrb.gmra.mxu1 %v9483_v62  ;;  %vm5549_vm0 = vweird.f32 %v9070_v13 }
 0x357   :  { %v8062_v48 = vld [vmem:[#allocation12 + $0xdd0] sm:$0xf]  ;;  %v7615_v46 = vor.u32 %v8826_v47, %v7614_v45  ;;  %5139 = vmatpush.bf16.msrb.mxu3 %v7327_v29  ;;  %v6720_v45 = vld [vmem:[#allocation12 + $0x370] sm:$0xf0]  ;;  %v5544_v47 = vmul.f32 %v9070_v13, %v9654_v6  ;;  %vm5550_vm2 = vmor %vm5548_vm1, %vm5549_vm0 }
 0x358   :  { %v8938_v39 = vld [vmem:[#allocation12 + $0xdec] sm:$0xf0] }
 0x359   :  { %v7070_v35 = vld [vmem:[#allocation12 + $0x610] sm:$0xf]  ;;  %v8063_v59 = vor.u32 %v8938_v39, %v8062_v48  ;;  %5151 = vmatpush.bf16.msra.mxu0 %v7615_v46  ;;  %v5545_v57 = vsub.f32 1.0, %v5544_v47  ;;  %v8518_v46 = vld [vmem:[#allocation12 + $0xd4] sm:$0xf] }
 0x35a   :  { %v8690_v40 = vld [vmem:[#allocation12 + $0x62c] sm:$0xf0]  ;;  %5140 = vmatmul.bf16.vlgmr.msrb.gmra.mxu3 %v9528_v17 }
 0x35b   :  { %v7582_v61 = vld [vmem:[#allocation12 + $0xa10] sm:$0xf]  ;;  %v7071_v9 = vor.u32 %v8690_v40, %v7070_v35  ;;  %5158 = vmatpush.bf16.msra.mxu1 %v8063_v59  ;;  %5184 = vmatpush.bf16.msra.mxu3 %v6531_v52  ;;  %v6723_v35 = vor.u32 %v8598_v44, %v6720_v45  ;;  %v6400_v59 = vld [vmem:[#allocation12 + $0xf0] sm:$0xf0]  ;;  %v5554_v40 = vand.u32 2147483648, %v9654_v6  ;;  %v5546_v52 = vmul.f32 %v9070_v13, %v5545_v57 }
 0x35c   :  { %v8818_v63 = vld [vmem:[#allocation12 + $0xa2c] sm:$0xf0]  ;;  %v8566_v57 = vld [vmem:[#allocation12 + $0x254] sm:$0xf] }
 0x35d   :  { %v8030_v27 = vld [vmem:[#allocation12 + $0xd90] sm:$0xf]  ;;  %v7583_v60 = vor.u32 %v8818_v63, %v7582_v61  ;;  %5126 = vmatpush.bf16.msrb.mxu2 %v7071_v9  ;;  %v8590_v61 = vld [vmem:[#allocation12 + $0x314] sm:$0xf]  ;;  %v5547_v49 = vadd.f32 %v9070_v13, %v5546_v52 }
 0x35e   :  { %v8930_v1 = vld [vmem:[#allocation12 + $0xdac] sm:$0xf0]  ;;  %v6688_v63 = vld [vmem:[#allocation12 + $0x330] sm:$0xf0] }
 0x35f   :  { %v8318_v33 = vld [vmem:[#allocation12 + $0xfd0] sm:$0xf]  ;;  %v8031_v15 = vor.u32 %v8930_v1, %v8030_v27  ;;  %5152 = vmatpush.bf16.msra.mxu0 %v7583_v60  ;;  %5185 = vmatpush.bf16.msra.mxu3 %v6499_v12  ;;  %v5552_v27 = vand.u32 2147483647, %v9654_v6  ;;  %v9666_v1 = vpop.f32.mrf.mxu0  ;;  %v6691_v60 = vor.u32 %v8590_v61, %v6688_v63  ;;  %v8510_v12 = vld [vmem:[#allocation12 + $0x94] sm:$0xf] }
 0x360   :  { %v9002_v4 = vld [vmem:[#allocation12 + $0xfec] sm:$0xf0]  ;;  %5127 = vmatmul.bf16.vlgmr.msrb.gmra.mxu2 %v9490_v14  ;;  %v8806_v52 = vld [vmem:[#allocation12 + $0x9d4] sm:$0xf] }
 0x361   :  { %v8319_v18 = vor.u32 %v9002_v4, %v8318_v33  ;;  %v7998_v54 = vld [vmem:[#allocation12 + $0xd50] sm:$0xf]  ;;  %5159 = vmatpush.bf16.msra.mxu1 %v8031_v15  ;;  %v6403_v4 = vor.u32 %v8518_v46, %v6400_v59  ;;  %v4909_v15 = vpop.f32.mrf.mxu1  ;;  %vm5553_vm3 = vcmp.eq.f32.partialorder %v5552_v27, 8.507059e+37  ;;  %v8678_v46 = vld [vmem:[#allocation12 + $0x5d4] sm:$0xf] }
 0x362   :  { %v8922_v21 = vld [vmem:[#allocation12 + $0xd6c] sm:$0xf0]  ;;  %5153 = vmatmul.bf16.vlgmr.msra.gmra.mxu0 %v9537_v42  ;;  %v7040_v59 = vld [vmem:[#allocation12 + $0x5f0] sm:$0xf0] }
 0x363   :  { %v8286_v7 = vld [vmem:[#allocation12 + $0xf90] sm:$0xf]  ;;  %v7999_v25 = vor.u32 %v8922_v21, %v7998_v54  ;;  %5171 = vmatpush.bf16.msra.mxu2 %v8319_v18  ;;  %5197 = vmatpush.bf16.msrb.mxu0 %v6787_v23  ;;  %v6368_v54 = vld [vmem:[#allocation12 + $0xb0] sm:$0xf0]  ;;  %v5555_v21 = vor.u32 1.1754944e-38, %v5554_v40  ;;  %v9677_v40 = vld [vmem:[#allocation13] sm:$0xff] }
 0x364   :  { %v8994_v34 = vld [vmem:[#allocation12 + $0xfac] sm:$0xf0]  ;;  %5186 = vmatpush.bf16.msra.mxu3 %v6467_v31  ;;  %v6656_v23 = vld [vmem:[#allocation12 + $0x2f0] sm:$0xf0]  ;;  %v2090_v61 = vperm.slane %v9677_v40, 2 }
 0x365   :  { %v8287_v30 = vor.u32 %v8994_v34, %v8286_v7  ;;  %v7966_v32 = vld [vmem:[#allocation12 + $0xd10] sm:$0xf]  ;;  %5160 = vmatpush.bf16.msra.mxu1 %v7999_v25  ;;  %v8582_v7 = vld [vmem:[#allocation12 + $0x2d4] sm:$0xf]  ;;  %v5551_v34 = vsel %vm5550_vm2, %v9070_v13, %v5547_v49  ;;  %v6371_v25 = vor.u32 %v8510_v12, %v6368_v54 }
 0x366   :  { %v8914_v16 = vld [vmem:[#allocation12 + $0xd2c] sm:$0xf0]  ;;  %v5556_v28 = vsel %vm5553_vm3, %v5555_v21, %v5551_v34  ;;  %v7552_v27 = vld [vmem:[#allocation12 + $0x9f0] sm:$0xf0] }
 0x367   :  { %v8254_v36 = vld [vmem:[#allocation12 + $0xf50] sm:$0xf]  ;;  %v7967_v48 = vor.u32 %v8914_v16, %v7966_v32  ;;  %5172 = vmatpush.bf16.msra.mxu2 %v8287_v30  ;;  %5198 = vmatpush.bf16.msrb.mxu0 %v6755_v37  ;;  %5649 = vst [vmem:[%s9808_s9 + $0x8] sm:$0xff] %v5556_v28  ;;  %v6659_v16 = vor.u32 %v8582_v7, %v6656_v23  ;;  %v6336_v37 = vld [vmem:[#allocation12 + $0x70] sm:$0xf0]  ;;  %v4948_v43 = vpop.f32.mrf.mxu0 }
 0x368   :  { %v8986_v41 = vld [vmem:[#allocation12 + $0xf6c] sm:$0xf0]  ;;  %5187 = vmatpush.bf16.msra.mxu3 %v6435_v53  ;;  %v6560_v15 = vld [vmem:[#allocation12 + $0x230] sm:$0xf0]  ;;  %v4882_v7 = vadd.f32 %v9649_v0, %v2090_v61 }
 0x369   :  { %v7934_v39 = vld [vmem:[#allocation12 + $0xcd0] sm:$0xf]  ;;  %v8255_v50 = vor.u32 %v8986_v41, %v8254_v36  ;;  %5161 = vmatpush.bf16.msra.mxu1 %v7967_v48  ;;  %v8502_v36 = vld [vmem:[#allocation12 + $0x54] sm:$0xf]  ;;  %v4935_v48 = vpop.f32.mrf.mxu3 }
 0x36a   :  { %v8906_v55 = vld [vmem:[#allocation12 + $0xcec] sm:$0xf0]  ;;  %v8574_v41 = vld [vmem:[#allocation12 + $0x294] sm:$0xf]  ;;  %v6339_v47 = vor.u32 %v8502_v36, %v6336_v37  ;;  %v4895_v37 = vadd.f32 %v9644_v58, %v4882_v7 }
 0x36b   :  { %v8222_v56 = vld [vmem:[#allocation12 + $0xf10] sm:$0xf]  ;;  %v7935_v33 = vor.u32 %v8906_v55, %v7934_v39  ;;  %5173 = vmatpush.bf16.msra.mxu2 %v8255_v50  ;;  %5199 = vmatpush.bf16.msrb.mxu0 %v6723_v35  ;;  %v6627_v55 = vor.u32 %v8574_v41, %v6624_v11  ;;  %v6592_v35 = vld [vmem:[#allocation12 + $0x270] sm:$0xf0] }
 0x36c   :  { %v8978_v29 = vld [vmem:[#allocation12 + $0xf2c] sm:$0xf0]  ;;  %5188 = vmatpush.bf16.msra.mxu3 %v6403_v4  ;;  %v8670_v12 = vld [vmem:[#allocation12 + $0x594] sm:$0xf] }
 0x36d   :  { %v8223_v3 = vor.u32 %v8978_v29, %v8222_v56  ;;  %v7902_v22 = vld [vmem:[#allocation12 + $0xc90] sm:$0xf]  ;;  %5162 = vmatpush.bf16.msra.mxu1 %v7935_v33  ;;  %v8494_v56 = vld [vmem:[#allocation12 + $0x14] sm:$0xf] }
 0x36e   :  { %v8898_v9 = vld [vmem:[#allocation12 + $0xcac] sm:$0xf0]  ;;  %v6304_v29 = vld [vmem:[#allocation12 + $0x30] sm:$0xf0] }
 0x36f   :  { %v8190_v10 = vld [vmem:[#allocation12 + $0xed0] sm:$0xf]  ;;  %v7903_v24 = vor.u32 %v8898_v9, %v7902_v22  ;;  %5174 = vmatpush.bf16.msra.mxu2 %v8223_v3  ;;  %5200 = vmatpush.bf16.msrb.mxu0 %v6691_v60  ;;  %v4922_v3 = vpop.f32.mrf.mxu2  ;;  %v6307_v4 = vor.u32 %v8494_v56, %v6304_v29  ;;  %v6595_v9 = vor.u32 %v8566_v57, %v6592_v35  ;;  %v8558_v60 = vld [vmem:[#allocation12 + $0x214] sm:$0xf]  ;;  %v4959_v57 = vpop.f32.mrf.mxu1 }
 0x370   :  { %v8970_v18 = vld [vmem:[#allocation12 + $0xeec] sm:$0xf0]  ;;  %5189 = vmatpush.bf16.msra.mxu3 %v6371_v25  ;;  %v7008_v54 = vld [vmem:[#allocation12 + $0x5b0] sm:$0xf0]  ;;  %v6563_v25 = vor.u32 %v8558_v60, %v6560_v15 }
 0x371   :  { %v7870_v26 = vld [vmem:[#allocation12 + $0xc50] sm:$0xf]  ;;  %v8191_v6 = vor.u32 %v8970_v18, %v8190_v10  ;;  %5163 = vmatpush.bf16.msra.mxu1 %v7903_v24  ;;  %v7043_v10 = vor.u32 %v8678_v46, %v7040_v59  ;;  %v7555_v18 = vor.u32 %v8806_v52, %v7552_v27  ;;  %v8742_v21 = vld [vmem:[#allocation12 + $0x7d4] sm:$0xf]  ;;  %v9691_v7 = vpop.f32.mrf.mxu3 }
 0x372   :  { %v8890_v30 = vld [vmem:[#allocation12 + $0xc6c] sm:$0xf0]  ;;  %v7296_v23 = vld [vmem:[#allocation12 + $0x7f0] sm:$0xf0] }
 0x373   :  { %v8158_v31 = vld [vmem:[#allocation12 + $0xe90] sm:$0xf]  ;;  %v7871_v13 = vor.u32 %v8890_v30, %v7870_v26  ;;  %5175 = vmatpush.bf16.msra.mxu2 %v8191_v6  ;;  %5201 = vmatpush.bf16.msrb.mxu0 %v6659_v16  ;;  %v8798_v34 = vld [vmem:[#allocation12 + $0x994] sm:$0xf]  ;;  %v7011_v30 = vor.u32 %v8670_v12, %v7008_v54 }
 0x374   :  { %v8962_v32 = vld [vmem:[#allocation12 + $0xeac] sm:$0xf0]  ;;  %5190 = vmatpush.bf16.msra.mxu3 %v6339_v47  ;;  %v7520_v24 = vld [vmem:[#allocation12 + $0x9b0] sm:$0xf0]  ;;  %v4908_v47 = vadd.f32 %v9660_v38, %v4895_v37 }
 0x375   :  { %v7838_v44 = vld [vmem:[#allocation12 + $0xc10] sm:$0xf]  ;;  %v8159_v45 = vor.u32 %v8962_v32, %v8158_v31  ;;  %5164 = vmatpush.bf16.msra.mxu1 %v7871_v13  ;;  %v8870_v28 = vld [vmem:[#allocation12 + $0xbd4] sm:$0xf]  ;;  %v7299_v31 = vor.u32 %v8742_v21, %v7296_v23  ;;  %v7523_v32 = vor.u32 %v8798_v34, %v7520_v24 }
 0x376   :  { %v8882_v39 = vld [vmem:[#allocation12 + $0xc2c] sm:$0xf0]  ;;  %v7808_v6 = vld [vmem:[#allocation12 + $0xbf0] sm:$0xf0]  ;;  %v4921_v56 = vadd.f32 %v9672_v19, %v4908_v47 }
 0x377   :  { %v8126_v50 = vld [vmem:[#allocation12 + $0xe50] sm:$0xf]  ;;  %v7839_v63 = vor.u32 %v8882_v39, %v7838_v44  ;;  %5176 = vmatpush.bf16.msra.mxu2 %v8159_v45  ;;  %5202 = vmatpush.bf16.msrb.mxu0 %v6627_v55  ;;  %v8662_v16 = vld [vmem:[#allocation12 + $0x554] sm:$0xf]  ;;  %v7811_v41 = vor.u32 %v8870_v28, %v7808_v6  ;;  %v4961_v28 = vpop.f32.mrf.mxu1  ;;  %v4972_v37 = vpop.f32.mrf.mxu2 }
 0x378   :  { %v8954_v53 = vld [vmem:[#allocation12 + $0xe6c] sm:$0xf0]  ;;  %5191 = vmatpush.bf16.msra.mxu3 %v6307_v4  ;;  %v6976_v0 = vld [vmem:[#allocation12 + $0x570] sm:$0xf0]  ;;  %v4934_v4 = vadd.f32 %v9668_v5, %v4921_v56 }
 0x379   :  { %v8127_v33 = vor.u32 %v8954_v53, %v8126_v50  ;;  %v8094_v22 = vld [vmem:[#allocation12 + $0xe10] sm:$0xf]  ;;  %5165 = vmatpush.bf16.msra.mxu1 %v7839_v63  ;;  %v8734_v36 = vld [vmem:[#allocation12 + $0x794] sm:$0xf]  ;;  %v6979_v48 = vor.u32 %v8662_v16, %v6976_v0 }
 0x37a   :  { %v8946_v49 = vld [vmem:[#allocation12 + $0xe2c] sm:$0xf0]  ;;  %v7264_v11 = vld [vmem:[#allocation12 + $0x7b0] sm:$0xf0]  ;;  %v4947_v24 = vadd.f32 %v9666_v1, %v4934_v4 }
 0x37b   :  { %5177 = vmatpush.bf16.msra.mxu2 %v8127_v33  ;;  %v8095_v26 = vor.u32 %v8946_v49, %v8094_v22  ;;  %5203 = vmatpush.bf16.msrb.mxu0 %v6595_v9  ;;  %v8790_v43 = vld [vmem:[#allocation12 + $0x954] sm:$0xf]  ;;  %v7267_v39 = vor.u32 %v8734_v36, %v7264_v11 }
 0x37c   :  { %5236 = vmatpush.bf16.msrb.mxu3 %v7555_v18  ;;  %5166 = vmatmul.bf16.vlgmr.msra.gmra.mxu1 %v9556_v2  ;;  %v7488_v13 = vld [vmem:[#allocation12 + $0x970] sm:$0xf0]  ;;  %v9689_v18 = vpop.f32.mrf.mxu0  ;;  %v4960_v16 = vadd.f32 %v4959_v57, %v4947_v24 }
 0x37d   :  { %5210 = vmatpush.bf16.msrb.mxu1 %v7043_v10  ;;  %5192 = vmatmul.bf16.vlgmr.msra.gmra.mxu3 %v9454_v51  ;;  %v8862_v44 = vld [vmem:[#allocation12 + $0xb94] sm:$0xf]  ;;  %v7491_v50 = vor.u32 %v8790_v43, %v7488_v13 }
 0x37e   :  { %v7776_v45 = vld [vmem:[#allocation12 + $0xbb0] sm:$0xf0]  ;;  %v4973_v1 = vadd.f32 %v4972_v37, %v4960_v16 }
 0x37f   :  { %5178 = vmatpush.bf16.msra.mxu2 %v8095_v26  ;;  %5204 = vmatpush.bf16.msrb.mxu0 %v6563_v25  ;;  %v8654_v53 = vld [vmem:[#allocation12 + $0x514] sm:$0xf]  ;;  %v7779_v29 = vor.u32 %v8862_v44, %v7776_v45 }
 0x380   :  { %5237 = vmatpush.bf16.msrb.mxu3 %v7523_v32  ;;  %v6944_v58 = vld [vmem:[#allocation12 + $0x530] sm:$0xf0] }
 0x381   :  { %5211 = vmatpush.bf16.msrb.mxu1 %v7011_v30  ;;  %v8726_v55 = vld [vmem:[#allocation12 + $0x754] sm:$0xf]  ;;  %v6947_v63 = vor.u32 %v8654_v53, %v6944_v58  ;;  %v8334_v53 = vmul.f32 -1.442695, %v4973_v1 }
 0x382   :  { %5179 = vmatmul.bf16.vlgmr.msra.gmra.mxu2 %v9561_v20  ;;  %v7232_v35 = vld [vmem:[#allocation12 + $0x770] sm:$0xf0]  ;;  %5205 = vmatmul.bf16.vlgmr.msrb.gmra.mxu0 %v9466_v8 }
 0x383   :  { %5223 = vmatpush.bf16.msrb.mxu2 %v7299_v31  ;;  %5249 = vmatpush.bf16.msra.mxu0 %v7811_v41  ;;  %v8782_v46 = vld [vmem:[#allocation12 + $0x914] sm:$0xf]  ;;  %v7235_v52 = vor.u32 %v8726_v55, %v7232_v35  ;;  %v4987_v35 = vpop.f32.mrf.mxu3  ;;  %9071 = vpow2.f32 %v8334_v53  ;;  %v8611_v53 = vld [vmem:[#allocation12 + $0x3b4] sm:$0xf0] }
 0x384   :  { %v7456_v38 = vld [vmem:[#allocation12 + $0x930] sm:$0xf0]  ;;  %5238 = vmatpush.bf16.msrb.mxu3 %v7491_v50  ;;  %v5000_v58 = vpop.f32.mrf.mxu0 }
 0x385   :  { %v8854_v59 = vld [vmem:[#allocation12 + $0xb54] sm:$0xf]  ;;  %5212 = vmatpush.bf16.msrb.mxu1 %v6979_v48  ;;  %v7459_v27 = vor.u32 %v8782_v46, %v7456_v38 }
 0x386   :  { %v7744_v61 = vld [vmem:[#allocation12 + $0xb70] sm:$0xf0] }
 0x387   :  { %5224 = vmatpush.bf16.msrb.mxu2 %v7267_v39  ;;  %v8646_v33 = vld [vmem:[#allocation12 + $0x4d4] sm:$0xf]  ;;  %5250 = vmatpush.bf16.msra.mxu0 %v7779_v29  ;;  %v7747_v22 = vor.u32 %v8854_v59, %v7744_v61 }
 0x388   :  { %v6912_v19 = vld [vmem:[#allocation12 + $0x4f0] sm:$0xf0]  ;;  %5239 = vmatpush.bf16.msrb.mxu3 %v7459_v27 }
 0x389   :  { %v8718_v3 = vld [vmem:[#allocation12 + $0x714] sm:$0xf]  ;;  %5213 = vmatpush.bf16.msrb.mxu1 %v6947_v63  ;;  %v6915_v12 = vor.u32 %v8646_v33, %v6912_v19 }
 0x38a   :  { %v7200_v9 = vld [vmem:[#allocation12 + $0x730] sm:$0xf0] }
 0x38b   :  { %v8774_v10 = vld [vmem:[#allocation12 + $0x8d4] sm:$0xf]  ;;  %5225 = vmatpush.bf16.msrb.mxu2 %v7235_v52  ;;  %v7203_v54 = vor.u32 %v8718_v3, %v7200_v9  ;;  %5251 = vmatpush.bf16.msra.mxu0 %v7747_v22  ;;  %v6534_v22 = vld [vmem:[#allocation12 + $0x1d8] sm:$0xf] }
 0x38c   :  { %v7424_v49 = vld [vmem:[#allocation12 + $0x8f0] sm:$0xf0]  ;;  %v8555_v9 = vld [vmem:[#allocation12 + $0x1f4] sm:$0xf0] }
 0x38d   :  { %v8846_v60 = vld [vmem:[#allocation12 + $0xb14] sm:$0xf]  ;;  %v7427_v21 = vor.u32 %v8774_v10, %v7424_v49  ;;  %5214 = vmatpush.bf16.msrb.mxu1 %v6915_v12  ;;  %v4974_v49 = vpop.f32.mrf.mxu2 }
 0x38e   :  { %v7712_v15 = vld [vmem:[#allocation12 + $0xb30] sm:$0xf0] }
 0x38f   :  { %v8638_v23 = vld [vmem:[#allocation12 + $0x494] sm:$0xf]  ;;  %v7715_v26 = vor.u32 %v8846_v60, %v7712_v15  ;;  %5226 = vmatpush.bf16.msrb.mxu2 %v7203_v54  ;;  %5240 = vmatpush.bf16.msrb.mxu3 %v7427_v21 }
 0x390   :  { %v6880_v34 = vld [vmem:[#allocation12 + $0x4b0] sm:$0xf0] }
 0x391   :  { %v8710_v5 = vld [vmem:[#allocation12 + $0x6d4] sm:$0xf]  ;;  %v6883_v0 = vor.u32 %v8638_v23, %v6880_v34  ;;  %5252 = vmatpush.bf16.msra.mxu0 %v7715_v26 }
 0x392   :  { %v7168_v6 = vld [vmem:[#allocation12 + $0x6f0] sm:$0xf0] }
 0x393   :  { %v8766_v25 = vld [vmem:[#allocation12 + $0x894] sm:$0xf]  ;;  %v7171_v36 = vor.u32 %v8710_v5, %v7168_v6  ;;  %5215 = vmatpush.bf16.msrb.mxu1 %v6883_v0  ;;  %v6535_v5 = vor.u32 %v8555_v9, %v6534_v22  ;;  %v9072_v6 = vpop.eup %9071  ;;  %v6790_v0 = vld [vmem:[#allocation12 + $0x3d8] sm:$0xf] }
 0x394   :  { %v7392_v30 = vld [vmem:[#allocation12 + $0x8b0] sm:$0xf0] }
 0x395   :  { %v8838_v31 = vld [vmem:[#allocation12 + $0xad4] sm:$0xf]  ;;  %v7395_v41 = vor.u32 %v8766_v25, %v7392_v30  ;;  %5227 = vmatpush.bf16.msrb.mxu2 %v7171_v36  ;;  %v6502_v30 = vld [vmem:[#allocation12 + $0x198] sm:$0xf] }
 0x396   :  { %v7680_v32 = vld [vmem:[#allocation12 + $0xaf0] sm:$0xf0]  ;;  %v8619_v36 = vld [vmem:[#allocation12 + $0x3f4] sm:$0xf0] }
 0x397   :  { %v8630_v11 = vld [vmem:[#allocation12 + $0x454] sm:$0xf]  ;;  %v7683_v44 = vor.u32 %v8838_v31, %v7680_v32  ;;  %5241 = vmatpush.bf16.msrb.mxu3 %v7395_v41  ;;  %v8547_v31 = vld [vmem:[#allocation12 + $0x1b4] sm:$0xf0]  ;;  %v9694_v32 = vadd.f32 1.0, %v9072_v6 }
 0x398   :  { %v6848_v43 = vld [vmem:[#allocation12 + $0x470] sm:$0xf0] }
 0x399   :  { %v8702_v13 = vld [vmem:[#allocation12 + $0x694] sm:$0xf]  ;;  %v6851_v55 = vor.u32 %v8630_v11, %v6848_v43  ;;  %5253 = vmatpush.bf16.msra.mxu0 %v7683_v44  ;;  %9073 = vrcp.f32 %v9694_v32  ;;  %v6503_v43 = vor.u32 %v8547_v31, %v6502_v30  ;;  %v9708_v31 = vpop.f32.mrf.mxu3  ;;  %vm5563_vm5 = vweird.f32 %v9694_v32 }
 0x39a   :  { %v7136_v45 = vld [vmem:[#allocation12 + $0x6b0] sm:$0xf0] }
 0x39b   :  { %v8758_v47 = vld [vmem:[#allocation12 + $0x854] sm:$0xf]  ;;  %v7139_v29 = vor.u32 %v8702_v13, %v7136_v45  ;;  %5216 = vmatpush.bf16.msrb.mxu1 %v6851_v55  ;;  %v6791_v45 = vor.u32 %v8619_v36, %v6790_v0 }
 0x39c   :  { %v7360_v48 = vld [vmem:[#allocation12 + $0x870] sm:$0xf0] }
 0x39d   :  { %v8830_v39 = vld [vmem:[#allocation12 + $0xa94] sm:$0xf]  ;;  %v7363_v57 = vor.u32 %v8758_v47, %v7360_v48  ;;  %5228 = vmatpush.bf16.msrb.mxu2 %v7139_v29  ;;  %v6470_v48 = vld [vmem:[#allocation12 + $0x158] sm:$0xf] }
 0x39e   :  { %v7648_v50 = vld [vmem:[#allocation12 + $0xab0] sm:$0xf0] }
 0x39f   :  { %v8622_v56 = vld [vmem:[#allocation12 + $0x414] sm:$0xf]  ;;  %v7651_v61 = vor.u32 %v8830_v39, %v7648_v50  ;;  %5242 = vmatpush.bf16.msrb.mxu3 %v7363_v57  ;;  %v8539_v39 = vld [vmem:[#allocation12 + $0x174] sm:$0xf0] }
 0x3a0   :  { %v6816_v46 = vld [vmem:[#allocation12 + $0x430] sm:$0xf0]  ;;  %v6758_v50 = vld [vmem:[#allocation12 + $0x398] sm:$0xf] }
 0x3a1   :  { %v8694_v38 = vld [vmem:[#allocation12 + $0x654] sm:$0xf]  ;;  %v6819_v4 = vor.u32 %v8622_v56, %v6816_v46  ;;  %5254 = vmatpush.bf16.msra.mxu0 %v7651_v61  ;;  %v6471_v56 = vor.u32 %v8539_v39, %v6470_v48  ;;  %v6759_v46 = vor.u32 %v8611_v53, %v6758_v50  ;;  %v6438_v61 = vld [vmem:[#allocation12 + $0x118] sm:$0xf] }
 0x3a2   :  { %v7104_v59 = vld [vmem:[#allocation12 + $0x670] sm:$0xf0] }
 0x3a3   :  { %v8750_v63 = vld [vmem:[#allocation12 + $0x814] sm:$0xf]  ;;  %v7107_v10 = vor.u32 %v8694_v38, %v7104_v59  ;;  %5217 = vmatpush.bf16.msrb.mxu1 %v6819_v4  ;;  %v9700_v38 = vpop.f32.mrf.mxu1 }
 0x3a4   :  { %v7328_v52 = vld [vmem:[#allocation12 + $0x830] sm:$0xf0] }
 0x3a5   :  { %v8822_v27 = vld [vmem:[#allocation12 + $0xa54] sm:$0xf]  ;;  %v7331_v60 = vor.u32 %v8750_v63, %v7328_v52  ;;  %5229 = vmatpush.bf16.msrb.mxu2 %v7107_v10  ;;  %v8531_v63 = vld [vmem:[#allocation12 + $0x134] sm:$0xf0]  ;;  %v9074_v52 = vpop.eup %9073 }
 0x3a6   :  { %v7616_v33 = vld [vmem:[#allocation12 + $0xa70] sm:$0xf0]  ;;  %5218 = vmatmul.bf16.vlgmr.msrb.gmra.mxu1 %v9483_v62  ;;  %v6439_v9 = vor.u32 %v8531_v63, %v6438_v61  ;;  %vm5564_vm4 = vweird.f32 %v9074_v52  ;;  %v6630_v61 = vld [vmem:[#allocation12 + $0x298] sm:$0xf] }
 0x3a7   :  { %v8934_v19 = vld [vmem:[#allocation12 + $0xdd4] sm:$0xf]  ;;  %v7619_v12 = vor.u32 %v8822_v27, %v7616_v33  ;;  %5243 = vmatpush.bf16.msrb.mxu3 %v7331_v60  ;;  %v6726_v27 = vld [vmem:[#allocation12 + $0x358] sm:$0xf]  ;;  %vm5565_vm6 = vmor %vm5563_vm5, %vm5564_vm4 }
 0x3a8   :  { %v8064_v3 = vld [vmem:[#allocation12 + $0xdf0] sm:$0xf0]  ;;  %v8603_v33 = vld [vmem:[#allocation12 + $0x374] sm:$0xf0] }
 0x3a9   :  { %v8686_v15 = vld [vmem:[#allocation12 + $0x614] sm:$0xf]  ;;  %v8067_v54 = vor.u32 %v8934_v19, %v8064_v3  ;;  %5255 = vmatpush.bf16.msra.mxu0 %v7619_v12  ;;  %v5559_v19 = vmul.f32 %v9074_v52, %v9694_v32  ;;  %v6727_v12 = vor.u32 %v8603_v33, %v6726_v27  ;;  %v8579_v63 = vld [vmem:[#allocation12 + $0x2b4] sm:$0xf0] }
 0x3aa   :  { %v7072_v21 = vld [vmem:[#allocation12 + $0x630] sm:$0xf0]  ;;  %5244 = vmatmul.bf16.vlgmr.msrb.gmra.mxu3 %v9528_v17 }
 0x3ab   :  { %v8814_v23 = vld [vmem:[#allocation12 + $0xa14] sm:$0xf]  ;;  %v7075_v16 = vor.u32 %v8686_v15, %v7072_v21  ;;  %5262 = vmatpush.bf16.msra.mxu1 %v8067_v54  ;;  %5288 = vmatpush.bf16.msra.mxu3 %v6535_v5  ;;  %v5560_v15 = vsub.f32 1.0, %v5559_v19  ;;  %v6406_v54 = vld [vmem:[#allocation12 + $0xd8] sm:$0xf] }
 0x3ac   :  { %v7584_v34 = vld [vmem:[#allocation12 + $0xa30] sm:$0xf0]  ;;  %v8523_v21 = vld [vmem:[#allocation12 + $0xf4] sm:$0xf0] }
 0x3ad   :  { %v8926_v24 = vld [vmem:[#allocation12 + $0xd94] sm:$0xf]  ;;  %v7587_v37 = vor.u32 %v8814_v23, %v7584_v34  ;;  %5230 = vmatpush.bf16.msrb.mxu2 %v7075_v16  ;;  %v5569_v23 = vand.u32 2147483648, %v9694_v32  ;;  %v6694_v34 = vld [vmem:[#allocation12 + $0x318] sm:$0xf]  ;;  %v6407_v30 = vor.u32 %v8523_v21, %v6406_v54 }
 0x3ae   :  { %v8032_v26 = vld [vmem:[#allocation12 + $0xdb0] sm:$0xf0]  ;;  %v8595_v5 = vld [vmem:[#allocation12 + $0x334] sm:$0xf0] }
 0x3af   :  { %v8998_v28 = vld [vmem:[#allocation12 + $0xfd4] sm:$0xf]  ;;  %v8035_v41 = vor.u32 %v8926_v24, %v8032_v26  ;;  %5256 = vmatpush.bf16.msra.mxu0 %v7587_v37  ;;  %5289 = vmatpush.bf16.msra.mxu3 %v6503_v43  ;;  %v5561_v24 = vmul.f32 %v9074_v52, %v5560_v15  ;;  %v5567_v26 = vand.u32 2147483647, %v9694_v32  ;;  %v8499_v15 = vld [vmem:[#allocation12 + $0x34] sm:$0xf0] }
 0x3b0   :  { %v8320_v25 = vld [vmem:[#allocation12 + $0xff0] sm:$0xf0]  ;;  %5231 = vmatmul.bf16.vlgmr.msrb.gmra.mxu2 %v9490_v14  ;;  %v8571_v54 = vld [vmem:[#allocation12 + $0x274] sm:$0xf0] }
 0x3b1   :  { %v8323_v11 = vor.u32 %v8998_v28, %v8320_v25  ;;  %v8918_v13 = vld [vmem:[#allocation12 + $0xd54] sm:$0xf]  ;;  %5263 = vmatpush.bf16.msra.mxu1 %v8035_v41  ;;  %v9706_v28 = vpop.f32.mrf.mxu0  ;;  %v5562_v37 = vadd.f32 %v9074_v52, %v5561_v24  ;;  %v6695_v41 = vor.u32 %v8595_v5, %v6694_v34  ;;  %vm5568_vm7 = vcmp.eq.f32.partialorder %v5567_v26, 8.507059e+37  ;;  %v7046_v21 = vld [vmem:[#allocation12 + $0x5d8] sm:$0xf] }
 0x3b2   :  { %v8000_v1 = vld [vmem:[#allocation12 + $0xd70] sm:$0xf0]  ;;  %5257 = vmatmul.bf16.vlgmr.msra.gmra.mxu0 %v9537_v42  ;;  %v2091_v34 = vperm.slane %v9677_v40, 3  ;;  %v7558_v24 = vld [vmem:[#allocation12 + $0x9d8] sm:$0xf] }
 0x3b3   :  { %v8990_v44 = vld [vmem:[#allocation12 + $0xf94] sm:$0xf]  ;;  %v8003_v58 = vor.u32 %v8918_v13, %v8000_v1  ;;  %5275 = vmatpush.bf16.msra.mxu2 %v8323_v11  ;;  %5301 = vmatpush.bf16.msrb.mxu0 %v6791_v45  ;;  %v5013_v11 = vpop.f32.mrf.mxu1  ;;  %v6374_v13 = vld [vmem:[#allocation12 + $0x98] sm:$0xf]  ;;  %v5566_v48 = vsel %vm5565_vm6, %v9074_v52, %v5562_v37 }
 0x3b4   :  { %v8288_v47 = vld [vmem:[#allocation12 + $0xfb0] sm:$0xf0]  ;;  %5290 = vmatpush.bf16.msra.mxu3 %v6471_v56  ;;  %v8515_v1 = vld [vmem:[#allocation12 + $0xb4] sm:$0xf0] }
 0x3b5   :  { %v8291_v55 = vor.u32 %v8990_v44, %v8288_v47  ;;  %v8910_v29 = vld [vmem:[#allocation12 + $0xd14] sm:$0xf]  ;;  %5264 = vmatpush.bf16.msra.mxu1 %v8003_v58  ;;  %v5570_v44 = vor.u32 1.1754944e-38, %v5569_v23  ;;  %v6662_v45 = vld [vmem:[#allocation12 + $0x2d8] sm:$0xf]  ;;  %v9712_v58 = vpop.f32.mrf.mxu2 }
 0x3b6   :  { %v7968_v57 = vld [vmem:[#allocation12 + $0xd30] sm:$0xf0]  ;;  %v8587_v47 = vld [vmem:[#allocation12 + $0x2f4] sm:$0xf0] }
 0x3b7   :  { %v8982_v35 = vld [vmem:[#allocation12 + $0xf54] sm:$0xf]  ;;  %v7971_v3 = vor.u32 %v8910_v29, %v7968_v57  ;;  %5276 = vmatpush.bf16.msra.mxu2 %v8291_v55  ;;  %5302 = vmatpush.bf16.msrb.mxu0 %v6759_v46  ;;  %v5571_v53 = vsel %vm5568_vm7, %v5570_v44, %v5566_v48  ;;  %v6375_v55 = vor.u32 %v8515_v1, %v6374_v13  ;;  %v6342_v46 = vld [vmem:[#allocation12 + $0x58] sm:$0xf] }
 0x3b8   :  { %v8256_v59 = vld [vmem:[#allocation12 + $0xf70] sm:$0xf0]  ;;  %5291 = vmatpush.bf16.msra.mxu3 %v6439_v9  ;;  %5650 = vst [vmem:[%s9808_s9 + $0x10] sm:$0xff] %v5571_v53  ;;  %v8683_v23 = vld [vmem:[#allocation12 + $0x5f4] sm:$0xf0]  ;;  %v4986_v44 = vadd.f32 %v9691_v7, %v2091_v34 }
 0x3b9   :  { %v8902_v4 = vld [vmem:[#allocation12 + $0xcd4] sm:$0xf]  ;;  %v8259_v22 = vor.u32 %v8982_v35, %v8256_v59  ;;  %5265 = vmatpush.bf16.msra.mxu1 %v7971_v3  ;;  %v6663_v35 = vor.u32 %v8587_v47, %v6662_v45  ;;  %v8507_v59 = vld [vmem:[#allocation12 + $0x74] sm:$0xf0]  ;;  %v5052_v52 = vpop.f32.mrf.mxu0 }
 0x3ba   :  { %v7936_v10 = vld [vmem:[#allocation12 + $0xcf0] sm:$0xf0]  ;;  %v6343_v3 = vor.u32 %v8507_v59, %v6342_v46  ;;  %v8811_v26 = vld [vmem:[#allocation12 + $0x9f4] sm:$0xf0]  ;;  %v4999_v46 = vadd.f32 %v9689_v18, %v4986_v44 }
 0x3bb   :  { %v8974_v49 = vld [vmem:[#allocation12 + $0xf14] sm:$0xf]  ;;  %v7939_v6 = vor.u32 %v8902_v4, %v7936_v10  ;;  %5277 = vmatpush.bf16.msra.mxu2 %v8259_v22  ;;  %5303 = vmatpush.bf16.msrb.mxu0 %v6727_v12  ;;  %v5039_v4 = vpop.f32.mrf.mxu3  ;;  %v6598_v12 = vld [vmem:[#allocation12 + $0x258] sm:$0xf] }
 0x3bc   :  { %v8224_v60 = vld [vmem:[#allocation12 + $0xf30] sm:$0xf0]  ;;  %5292 = vmatpush.bf16.msra.mxu3 %v6407_v30  ;;  %v8563_v11 = vld [vmem:[#allocation12 + $0x234] sm:$0xf0] }
 0x3bd   :  { %v8227_v25 = vor.u32 %v8974_v49, %v8224_v60  ;;  %v8894_v16 = vld [vmem:[#allocation12 + $0xc94] sm:$0xf]  ;;  %5266 = vmatpush.bf16.msra.mxu1 %v7939_v6  ;;  %v6631_v49 = vor.u32 %v8579_v63, %v6630_v61  ;;  %v6310_v60 = vld [vmem:[#allocation12 + $0x18] sm:$0xf] }
 0x3be   :  { %v7904_v0 = vld [vmem:[#allocation12 + $0xcb0] sm:$0xf0]  ;;  %v6311_v30 = vor.u32 %v8499_v15, %v6310_v60  ;;  %v7014_v13 = vld [vmem:[#allocation12 + $0x598] sm:$0xf]  ;;  %v5063_v15 = vpop.f32.mrf.mxu1 }
 0x3bf   :  { %v8966_v36 = vld [vmem:[#allocation12 + $0xed4] sm:$0xf]  ;;  %v7907_v39 = vor.u32 %v8894_v16, %v7904_v0  ;;  %5278 = vmatpush.bf16.msra.mxu2 %v8227_v25  ;;  %5304 = vmatpush.bf16.msrb.mxu0 %v6695_v41  ;;  %v5026_v25 = vpop.f32.mrf.mxu2  ;;  %v6599_v0 = vor.u32 %v8571_v54, %v6598_v12  ;;  %v6566_v41 = vld [vmem:[#allocation12 + $0x218] sm:$0xf] }
 0x3c0   :  { %v8192_v43 = vld [vmem:[#allocation12 + $0xef0] sm:$0xf0]  ;;  %5293 = vmatpush.bf16.msra.mxu3 %v6375_v55  ;;  %v8675_v1 = vld [vmem:[#allocation12 + $0x5b4] sm:$0xf0] }
 0x3c1   :  { %v8886_v50 = vld [vmem:[#allocation12 + $0xc54] sm:$0xf]  ;;  %v8195_v32 = vor.u32 %v8966_v36, %v8192_v43  ;;  %5267 = vmatpush.bf16.msra.mxu1 %v7907_v39  ;;  %v7047_v36 = vor.u32 %v8683_v23, %v7046_v21  ;;  %v7559_v43 = vor.u32 %v8811_v26, %v7558_v24  ;;  %v7302_v40 = vld [vmem:[#allocation12 + $0x7d8] sm:$0xf]  ;;  %v7015_v55 = vor.u32 %v8675_v1, %v7014_v13 }
 0x3c2   :  { %v7872_v56 = vld [vmem:[#allocation12 + $0xc70] sm:$0xf0]  ;;  %v8747_v45 = vld [vmem:[#allocation12 + $0x7f4] sm:$0xf0] }
 0x3c3   :  { %v8958_v29 = vld [vmem:[#allocation12 + $0xe94] sm:$0xf]  ;;  %v7875_v27 = vor.u32 %v8886_v50, %v7872_v56  ;;  %5279 = vmatpush.bf16.msra.mxu2 %v8195_v32  ;;  %5305 = vmatpush.bf16.msrb.mxu0 %v6663_v35  ;;  %v7526_v47 = vld [vmem:[#allocation12 + $0x998] sm:$0xf]  ;;  %v6567_v32 = vor.u32 %v8563_v11, %v6566_v41  ;;  %v7303_v56 = vor.u32 %v8747_v45, %v7302_v40  ;;  %v9727_v11 = vpop.f32.mrf.mxu0  ;;  %v9729_v40 = vpop.f32.mrf.mxu3 }
 0x3c4   :  { %v8160_v57 = vld [vmem:[#allocation12 + $0xeb0] sm:$0xf0]  ;;  %5294 = vmatpush.bf16.msra.mxu3 %v6343_v3  ;;  %v8803_v48 = vld [vmem:[#allocation12 + $0x9b4] sm:$0xf0] }
 0x3c5   :  { %v8878_v33 = vld [vmem:[#allocation12 + $0xc14] sm:$0xf]  ;;  %v8163_v19 = vor.u32 %v8958_v29, %v8160_v57  ;;  %5268 = vmatpush.bf16.msra.mxu1 %v7875_v27  ;;  %v7814_v50 = vld [vmem:[#allocation12 + $0xbd8] sm:$0xf]  ;;  %v7527_v29 = vor.u32 %v8803_v48, %v7526_v47 }
 0x3c6   :  { %v7840_v22 = vld [vmem:[#allocation12 + $0xc30] sm:$0xf0]  ;;  %v8875_v53 = vld [vmem:[#allocation12 + $0xbf4] sm:$0xf0] }
 0x3c7   :  { %v8950_v9 = vld [vmem:[#allocation12 + $0xe54] sm:$0xf]  ;;  %v7843_v5 = vor.u32 %v8878_v33, %v7840_v22  ;;  %5280 = vmatpush.bf16.msra.mxu2 %v8163_v19  ;;  %5306 = vmatpush.bf16.msrb.mxu0 %v6631_v49  ;;  %v6982_v57 = vld [vmem:[#allocation12 + $0x558] sm:$0xf]  ;;  %v7815_v59 = vor.u32 %v8875_v53, %v7814_v50  ;;  %v5012_v19 = vadd.f32 %v9700_v38, %v4999_v46 }
 0x3c8   :  { %v8128_v10 = vld [vmem:[#allocation12 + $0xe70] sm:$0xf0]  ;;  %5295 = vmatpush.bf16.msra.mxu3 %v6311_v30  ;;  %v8667_v7 = vld [vmem:[#allocation12 + $0x574] sm:$0xf0] }
 0x3c9   :  { %v8131_v6 = vor.u32 %v8950_v9, %v8128_v10  ;;  %v8942_v16 = vld [vmem:[#allocation12 + $0xe14] sm:$0xf]  ;;  %5269 = vmatpush.bf16.msra.mxu1 %v7843_v5  ;;  %v7270_v35 = vld [vmem:[#allocation12 + $0x798] sm:$0xf]  ;;  %v6983_v3 = vor.u32 %v8667_v7, %v6982_v57  ;;  %v5025_v49 = vadd.f32 %v9712_v58, %v5012_v19 }
 0x3ca   :  { %v8096_v37 = vld [vmem:[#allocation12 + $0xe30] sm:$0xf0]  ;;  %v8739_v61 = vld [vmem:[#allocation12 + $0x7b4] sm:$0xf0] }
 0x3cb   :  { %5281 = vmatpush.bf16.msra.mxu2 %v8131_v6  ;;  %v8099_v39 = vor.u32 %v8942_v16, %v8096_v37  ;;  %5307 = vmatpush.bf16.msrb.mxu0 %v6599_v0  ;;  %v7494_v63 = vld [vmem:[#allocation12 + $0x958] sm:$0xf]  ;;  %v7271_v4 = vor.u32 %v8739_v61, %v7270_v35  ;;  %v5038_v25 = vadd.f32 %v9708_v31, %v5025_v49  ;;  %v5076_v35 = vpop.f32.mrf.mxu2 }
 0x3cc   :  { %5340 = vmatpush.bf16.msrb.mxu3 %v7559_v43  ;;  %5270 = vmatmul.bf16.vlgmr.msra.gmra.mxu1 %v9556_v2  ;;  %v8795_v52 = vld [vmem:[#allocation12 + $0x974] sm:$0xf0] }
 0x3cd   :  { %5314 = vmatpush.bf16.msrb.mxu1 %v7047_v36  ;;  %5296 = vmatmul.bf16.vlgmr.msra.gmra.mxu3 %v9454_v51  ;;  %v7782_v27 = vld [vmem:[#allocation12 + $0xb98] sm:$0xf]  ;;  %v7495_v22 = vor.u32 %v8795_v52, %v7494_v63  ;;  %v5051_v47 = vadd.f32 %v9706_v28, %v5038_v25  ;;  %v8551_v25 = vld [vmem:[#allocation12 + $0x1dc] sm:$0xf] }
 0x3ce   :  { %v8867_v33 = vld [vmem:[#allocation12 + $0xbb4] sm:$0xf0] }
 0x3cf   :  { %5282 = vmatpush.bf16.msra.mxu2 %v8099_v39  ;;  %5308 = vmatpush.bf16.msrb.mxu0 %v6567_v32  ;;  %v6950_v9 = vld [vmem:[#allocation12 + $0x518] sm:$0xf]  ;;  %v7783_v60 = vor.u32 %v8867_v33, %v7782_v27  ;;  %v5065_v39 = vpop.f32.mrf.mxu1 }
 0x3d0   :  { %5341 = vmatpush.bf16.msrb.mxu3 %v7527_v29  ;;  %v8659_v18 = vld [vmem:[#allocation12 + $0x534] sm:$0xf0]  ;;  %v5064_v29 = vadd.f32 %v5063_v15, %v5051_v47  ;;  %v5091_v15 = vpop.f32.mrf.mxu3 }
 0x3d1   :  { %5315 = vmatpush.bf16.msrb.mxu1 %v7015_v55  ;;  %v7238_v10 = vld [vmem:[#allocation12 + $0x758] sm:$0xf]  ;;  %v6951_v34 = vor.u32 %v8659_v18, %v6950_v9  ;;  %v5104_v9 = vpop.f32.mrf.mxu0 }
 0x3d2   :  { %5283 = vmatmul.bf16.vlgmr.msra.gmra.mxu2 %v9561_v20  ;;  %v8731_v12 = vld [vmem:[#allocation12 + $0x774] sm:$0xf0]  ;;  %5309 = vmatmul.bf16.vlgmr.msrb.gmra.mxu0 %v9466_v8  ;;  %v5077_v28 = vadd.f32 %v5076_v35, %v5064_v29  ;;  %v8615_v29 = vld [vmem:[#allocation12 + $0x3dc] sm:$0xf] }
 0x3d3   :  { %5327 = vmatpush.bf16.msrb.mxu2 %v7303_v56  ;;  %5353 = vmatpush.bf16.msra.mxu0 %v7815_v59  ;;  %v7462_v54 = vld [vmem:[#allocation12 + $0x918] sm:$0xf]  ;;  %v7239_v5 = vor.u32 %v8731_v12, %v7238_v10 }
 0x3d4   :  { %v8787_v38 = vld [vmem:[#allocation12 + $0x934] sm:$0xf0]  ;;  %5342 = vmatpush.bf16.msrb.mxu3 %v7495_v22  ;;  %v8335_v22 = vmul.f32 -1.442695, %v5077_v28 }
 0x3d5   :  { %v7750_v21 = vld [vmem:[#allocation12 + $0xb58] sm:$0xf]  ;;  %5316 = vmatpush.bf16.msrb.mxu1 %v6983_v3  ;;  %v7463_v24 = vor.u32 %v8787_v38, %v7462_v54 }
 0x3d6   :  { %v8859_v23 = vld [vmem:[#allocation12 + $0xb74] sm:$0xf0]  ;;  %9075 = vpow2.f32 %v8335_v22 }
 0x3d7   :  { %5328 = vmatpush.bf16.msrb.mxu2 %v7271_v4  ;;  %v6918_v26 = vld [vmem:[#allocation12 + $0x4d8] sm:$0xf]  ;;  %5354 = vmatpush.bf16.msra.mxu0 %v7783_v60  ;;  %v7751_v30 = vor.u32 %v8859_v23, %v7750_v21 }
 0x3d8   :  { %v8651_v58 = vld [vmem:[#allocation12 + $0x4f4] sm:$0xf0]  ;;  %5343 = vmatpush.bf16.msrb.mxu3 %v7463_v24 }
 0x3d9   :  { %v7206_v6 = vld [vmem:[#allocation12 + $0x718] sm:$0xf]  ;;  %5317 = vmatpush.bf16.msrb.mxu1 %v6951_v34  ;;  %v6919_v43 = vor.u32 %v8651_v58, %v6918_v26 }
 0x3da   :  { %v8723_v16 = vld [vmem:[#allocation12 + $0x734] sm:$0xf0] }
 0x3db   :  { %v7430_v0 = vld [vmem:[#allocation12 + $0x8d8] sm:$0xf]  ;;  %5329 = vmatpush.bf16.msrb.mxu2 %v7239_v5  ;;  %v7207_v13 = vor.u32 %v8723_v16, %v7206_v6  ;;  %5355 = vmatpush.bf16.msra.mxu0 %v7751_v30  ;;  %v6536_v30 = vld [vmem:[#allocation12 + $0x1f8] sm:$0xf0] }
 0x3dc   :  { %v8779_v36 = vld [vmem:[#allocation12 + $0x8f4] sm:$0xf0]  ;;  %v9076_v39 = vpop.eup %9075 }
 0x3dd   :  { %v7718_v37 = vld [vmem:[#allocation12 + $0xb18] sm:$0xf]  ;;  %v7431_v1 = vor.u32 %v8779_v36, %v7430_v0  ;;  %5318 = vmatpush.bf16.msrb.mxu1 %v6919_v43  ;;  %v5078_v0 = vpop.f32.mrf.mxu2 }
 0x3de   :  { %v8851_v41 = vld [vmem:[#allocation12 + $0xb34] sm:$0xf0] }
 0x3df   :  { %v6886_v44 = vld [vmem:[#allocation12 + $0x498] sm:$0xf]  ;;  %v7719_v48 = vor.u32 %v8851_v41, %v7718_v37  ;;  %5330 = vmatpush.bf16.msrb.mxu2 %v7207_v13  ;;  %5344 = vmatpush.bf16.msrb.mxu3 %v7431_v1 }
 0x3e0   :  { %v8643_v45 = vld [vmem:[#allocation12 + $0x4b4] sm:$0xf0] }
 0x3e1   :  { %v7174_v31 = vld [vmem:[#allocation12 + $0x6d8] sm:$0xf]  ;;  %v6887_v57 = vor.u32 %v8643_v45, %v6886_v44  ;;  %5356 = vmatpush.bf16.msra.mxu0 %v7719_v48  ;;  %v6539_v45 = vor.u32 %v8551_v25, %v6536_v30 }
 0x3e2   :  { %v8715_v50 = vld [vmem:[#allocation12 + $0x6f4] sm:$0xf0] }
 0x3e3   :  { %v7398_v53 = vld [vmem:[#allocation12 + $0x898] sm:$0xf]  ;;  %v7175_v7 = vor.u32 %v8715_v50, %v7174_v31  ;;  %5319 = vmatpush.bf16.msrb.mxu1 %v6887_v57  ;;  %v6792_v57 = vld [vmem:[#allocation12 + $0x3f8] sm:$0xf0] }
 0x3e4   :  { %v8771_v32 = vld [vmem:[#allocation12 + $0x8b4] sm:$0xf0] }
 0x3e5   :  { %v7686_v55 = vld [vmem:[#allocation12 + $0xad8] sm:$0xf]  ;;  %v7399_v46 = vor.u32 %v8771_v32, %v7398_v53  ;;  %5331 = vmatpush.bf16.msrb.mxu2 %v7175_v7  ;;  %v8543_v53 = vld [vmem:[#allocation12 + $0x19c] sm:$0xf] }
 0x3e6   :  { %v8843_v56 = vld [vmem:[#allocation12 + $0xaf4] sm:$0xf0]  ;;  %v6504_v32 = vld [vmem:[#allocation12 + $0x1b8] sm:$0xf0] }
 0x3e7   :  { %v6854_v59 = vld [vmem:[#allocation12 + $0x458] sm:$0xf]  ;;  %v7687_v52 = vor.u32 %v8843_v56, %v7686_v55  ;;  %5345 = vmatpush.bf16.msrb.mxu3 %v7399_v46  ;;  %v9732_v55 = vadd.f32 1.0, %v9076_v39 }
 0x3e8   :  { %v8635_v61 = vld [vmem:[#allocation12 + $0x474] sm:$0xf0] }
 0x3e9   :  { %v7142_v63 = vld [vmem:[#allocation12 + $0x698] sm:$0xf]  ;;  %v6855_v18 = vor.u32 %v8635_v61, %v6854_v59  ;;  %5357 = vmatpush.bf16.msra.mxu0 %v7687_v52  ;;  %9077 = vrcp.f32 %v9732_v55  ;;  %v6507_v59 = vor.u32 %v8543_v53, %v6504_v32  ;;  %v6795_v52 = vor.u32 %v8615_v29, %v6792_v57  ;;  %v9746_v53 = vpop.f32.mrf.mxu3 }
 0x3ea   :  { %v8707_v27 = vld [vmem:[#allocation12 + $0x6b4] sm:$0xf0]  ;;  %vm5578_vm9 = vweird.f32 %v9732_v55 }
 0x3eb   :  { %v7366_v33 = vld [vmem:[#allocation12 + $0x858] sm:$0xf]  ;;  %v7143_v49 = vor.u32 %v8707_v27, %v7142_v63  ;;  %5320 = vmatpush.bf16.msrb.mxu1 %v6855_v18 }
 0x3ec   :  { %v8763_v19 = vld [vmem:[#allocation12 + $0x874] sm:$0xf0] }
 0x3ed   :  { %v7654_v3 = vld [vmem:[#allocation12 + $0xa98] sm:$0xf]  ;;  %v7367_v60 = vor.u32 %v8763_v19, %v7366_v33  ;;  %5332 = vmatpush.bf16.msrb.mxu2 %v7143_v49  ;;  %v8535_v33 = vld [vmem:[#allocation12 + $0x15c] sm:$0xf] }
 0x3ee   :  { %v8835_v4 = vld [vmem:[#allocation12 + $0xab4] sm:$0xf0]  ;;  %v6472_v19 = vld [vmem:[#allocation12 + $0x178] sm:$0xf0] }
 0x3ef   :  { %v6822_v10 = vld [vmem:[#allocation12 + $0x418] sm:$0xf]  ;;  %v7655_v21 = vor.u32 %v8835_v4, %v7654_v3  ;;  %5346 = vmatpush.bf16.msrb.mxu3 %v7367_v60  ;;  %v8607_v3 = vld [vmem:[#allocation12 + $0x39c] sm:$0xf]  ;;  %v6475_v18 = vor.u32 %v8535_v33, %v6472_v19 }
 0x3f0   :  { %v8627_v12 = vld [vmem:[#allocation12 + $0x434] sm:$0xf0]  ;;  %v6760_v4 = vld [vmem:[#allocation12 + $0x3b8] sm:$0xf0] }
 0x3f1   :  { %v7110_v54 = vld [vmem:[#allocation12 + $0x658] sm:$0xf]  ;;  %v6823_v6 = vor.u32 %v8627_v12, %v6822_v10  ;;  %5358 = vmatpush.bf16.msra.mxu0 %v7655_v21  ;;  %v6763_v15 = vor.u32 %v8607_v3, %v6760_v4  ;;  %v9738_v12 = vpop.f32.mrf.mxu1  ;;  %v6440_v21 = vld [vmem:[#allocation12 + $0x138] sm:$0xf0]  ;;  %v9750_v4 = vpop.f32.mrf.mxu2 }
 0x3f2   :  { %v8699_v38 = vld [vmem:[#allocation12 + $0x674] sm:$0xf0] }
 0x3f3   :  { %v7334_v23 = vld [vmem:[#allocation12 + $0x818] sm:$0xf]  ;;  %v7111_v16 = vor.u32 %v8699_v38, %v7110_v54  ;;  %5321 = vmatpush.bf16.msrb.mxu1 %v6823_v6  ;;  %v8527_v38 = vld [vmem:[#allocation12 + $0x11c] sm:$0xf] }
 0x3f4   :  { %v8755_v34 = vld [vmem:[#allocation12 + $0x834] sm:$0xf0]  ;;  %v6443_v25 = vor.u32 %v8527_v38, %v6440_v21  ;;  %v6632_v38 = vld [vmem:[#allocation12 + $0x2b8] sm:$0xf0] }
 0x3f5   :  { %v7622_v5 = vld [vmem:[#allocation12 + $0xa58] sm:$0xf]  ;;  %v7335_v36 = vor.u32 %v8755_v34, %v7334_v23  ;;  %5333 = vmatpush.bf16.msrb.mxu2 %v7111_v16  ;;  %v9078_v23 = vpop.eup %9077  ;;  %v8599_v34 = vld [vmem:[#allocation12 + $0x35c] sm:$0xf] }
 0x3f6   :  { %v8827_v24 = vld [vmem:[#allocation12 + $0xa74] sm:$0xf0]  ;;  %5322 = vmatmul.bf16.vlgmr.msrb.gmra.mxu1 %v9483_v62  ;;  %vm5579_vm8 = vweird.f32 %v9078_v23 }
 0x3f7   :  { %v8070_v26 = vld [vmem:[#allocation12 + $0xdd8] sm:$0xf]  ;;  %v7623_v41 = vor.u32 %v8827_v24, %v7622_v5  ;;  %5347 = vmatpush.bf16.msrb.mxu3 %v7335_v36  ;;  %v6728_v5 = vld [vmem:[#allocation12 + $0x378] sm:$0xf0]  ;;  %v5574_v24 = vmul.f32 %v9078_v23, %v9732_v55  ;;  %vm5580_vm10 = vmor %vm5578_vm9, %vm5579_vm8 }
 0x3f8   :  { %v8939_v58 = vld [vmem:[#allocation12 + $0xdf4] sm:$0xf0] }
 0x3f9   :  { %v7078_v37 = vld [vmem:[#allocation12 + $0x618] sm:$0xf]  ;;  %v8071_v43 = vor.u32 %v8939_v58, %v8070_v26  ;;  %5359 = vmatpush.bf16.msra.mxu0 %v7623_v41  ;;  %v5575_v36 = vsub.f32 1.0, %v5574_v24  ;;  %v8519_v41 = vld [vmem:[#allocation12 + $0xdc] sm:$0xf] }
 0x3fa   :  { %v8691_v13 = vld [vmem:[#allocation12 + $0x634] sm:$0xf0]  ;;  %5348 = vmatmul.bf16.vlgmr.msrb.gmra.mxu3 %v9528_v17 }
 0x3fb   :  { %v7590_v1 = vld [vmem:[#allocation12 + $0xa18] sm:$0xf]  ;;  %v7079_v56 = vor.u32 %v8691_v13, %v7078_v37  ;;  %5366 = vmatpush.bf16.msra.mxu1 %v8071_v43  ;;  %5392 = vmatpush.bf16.msra.mxu3 %v6539_v45  ;;  %v6731_v37 = vor.u32 %v8599_v34, %v6728_v5  ;;  %v6408_v43 = vld [vmem:[#allocation12 + $0xf8] sm:$0xf0]  ;;  %v5584_v13 = vand.u32 2147483648, %v9732_v55  ;;  %v5576_v45 = vmul.f32 %v9078_v23, %v5575_v36 }
 0x3fc   :  { %v8819_v44 = vld [vmem:[#allocation12 + $0xa34] sm:$0xf0]  ;;  %v8567_v36 = vld [vmem:[#allocation12 + $0x25c] sm:$0xf] }
 0x3fd   :  { %v8038_v31 = vld [vmem:[#allocation12 + $0xd98] sm:$0xf]  ;;  %v7591_v7 = vor.u32 %v8819_v44, %v7590_v1  ;;  %5334 = vmatpush.bf16.msrb.mxu2 %v7079_v56  ;;  %v8591_v1 = vld [vmem:[#allocation12 + $0x31c] sm:$0xf]  ;;  %v5577_v57 = vadd.f32 %v9078_v23, %v5576_v45 }
 0x3fe   :  { %v8931_v47 = vld [vmem:[#allocation12 + $0xdb4] sm:$0xf0]  ;;  %v6696_v44 = vld [vmem:[#allocation12 + $0x338] sm:$0xf0] }
 0x3ff   :  { %v8326_v48 = vld [vmem:[#allocation12 + $0xfd8] sm:$0xf]  ;;  %v8039_v35 = vor.u32 %v8931_v47, %v8038_v31  ;;  %5360 = vmatpush.bf16.msra.mxu0 %v7591_v7  ;;  %5393 = vmatpush.bf16.msra.mxu3 %v6507_v59  ;;  %v5582_v31 = vand.u32 2147483647, %v9732_v55  ;;  %v9744_v47 = vpop.f32.mrf.mxu0  ;;  %v6699_v7 = vor.u32 %v8591_v1, %v6696_v44  ;;  %v8511_v59 = vld [vmem:[#allocation12 + $0x9c] sm:$0xf] }
 0x400   :  { %v9003_v50 = vld [vmem:[#allocation12 + $0xff4] sm:$0xf0]  ;;  %5335 = vmatmul.bf16.vlgmr.msrb.gmra.mxu2 %v9490_v14  ;;  %v8807_v45 = vld [vmem:[#allocation12 + $0x9dc] sm:$0xf] }
 0x401   :  { %v8327_v46 = vor.u32 %v9003_v50, %v8326_v48  ;;  %v8006_v61 = vld [vmem:[#allocation12 + $0xd58] sm:$0xf]  ;;  %5367 = vmatpush.bf16.msra.mxu1 %v8039_v35  ;;  %v6411_v50 = vor.u32 %v8519_v41, %v6408_v43  ;;  %v5117_v35 = vpop.f32.mrf.mxu1  ;;  %vm5583_vm11 = vcmp.eq.f32.partialorder %v5582_v31, 8.507059e+37  ;;  %v8679_v41 = vld [vmem:[#allocation12 + $0x5dc] sm:$0xf] }
 0x402   :  { %v8923_v63 = vld [vmem:[#allocation12 + $0xd74] sm:$0xf0]  ;;  %5361 = vmatmul.bf16.vlgmr.msra.gmra.mxu0 %v9537_v42  ;;  %v7048_v43 = vld [vmem:[#allocation12 + $0x5f8] sm:$0xf0] }
 0x403   :  { %v8294_v28 = vld [vmem:[#allocation12 + $0xf98] sm:$0xf]  ;;  %v8007_v22 = vor.u32 %v8923_v63, %v8006_v61  ;;  %5379 = vmatpush.bf16.msra.mxu2 %v8327_v46  ;;  %5405 = vmatpush.bf16.msrb.mxu0 %v6795_v52  ;;  %v6376_v61 = vld [vmem:[#allocation12 + $0xb8] sm:$0xf0]  ;;  %v5585_v63 = vor.u32 1.1754944e-38, %v5584_v13  ;;  %v9755_v13 = vld [vmem:[#allocation13] sm:$0xff] }
 0x404   :  { %v8995_v27 = vld [vmem:[#allocation12 + $0xfb4] sm:$0xf0]  ;;  %5394 = vmatpush.bf16.msra.mxu3 %v6475_v18  ;;  %v6664_v52 = vld [vmem:[#allocation12 + $0x2f8] sm:$0xf0]  ;;  %v2092_v1 = vperm.slane %v9755_v13, 4 }
 0x405   :  { %v8295_v9 = vor.u32 %v8995_v27, %v8294_v28  ;;  %v7974_v10 = vld [vmem:[#allocation12 + $0xd18] sm:$0xf]  ;;  %5368 = vmatpush.bf16.msra.mxu1 %v8007_v22  ;;  %v8583_v28 = vld [vmem:[#allocation12 + $0x2dc] sm:$0xf]  ;;  %v5581_v27 = vsel %vm5580_vm10, %v9078_v23, %v5577_v57  ;;  %v6379_v22 = vor.u32 %v8511_v59, %v6376_v61 }
 0x406   :  { %v8915_v49 = vld [vmem:[#allocation12 + $0xd34] sm:$0xf0]  ;;  %v5586_v3 = vsel %vm5583_vm11, %v5585_v63, %v5581_v27  ;;  %v7560_v31 = vld [vmem:[#allocation12 + $0x9f8] sm:$0xf0] }
 0x407   :  { %v8262_v60 = vld [vmem:[#allocation12 + $0xf58] sm:$0xf]  ;;  %v7975_v26 = vor.u32 %v8915_v49, %v7974_v10  ;;  %5380 = vmatpush.bf16.msra.mxu2 %v8295_v9  ;;  %5406 = vmatpush.bf16.msrb.mxu0 %v6763_v15  ;;  %5651 = vst [vmem:[%s9808_s9 + $0x18] sm:$0xff] %v5586_v3  ;;  %v6667_v49 = vor.u32 %v8583_v28, %v6664_v52  ;;  %v6344_v15 = vld [vmem:[#allocation12 + $0x78] sm:$0xf0]  ;;  %v5156_v21 = vpop.f32.mrf.mxu0 }
 0x408   :  { %v8987_v54 = vld [vmem:[#allocation12 + $0xf74] sm:$0xf0]  ;;  %5395 = vmatpush.bf16.msra.mxu3 %v6443_v25  ;;  %v6568_v35 = vld [vmem:[#allocation12 + $0x238] sm:$0xf0]  ;;  %v5090_v28 = vadd.f32 %v9729_v40, %v2092_v1 }
 0x409   :  { %v7942_v58 = vld [vmem:[#allocation12 + $0xcd8] sm:$0xf]  ;;  %v8263_v6 = vor.u32 %v8987_v54, %v8262_v60  ;;  %5369 = vmatpush.bf16.msra.mxu1 %v7975_v26  ;;  %v8503_v60 = vld [vmem:[#allocation12 + $0x5c] sm:$0xf]  ;;  %v5143_v26 = vpop.f32.mrf.mxu3 }
 0x40a   :  { %v8907_v30 = vld [vmem:[#allocation12 + $0xcf4] sm:$0xf0]  ;;  %v8575_v54 = vld [vmem:[#allocation12 + $0x29c] sm:$0xf]  ;;  %v6347_v24 = vor.u32 %v8503_v60, %v6344_v15  ;;  %v5103_v15 = vadd.f32 %v9727_v11, %v5090_v28 }
 0x40b   :  { %v8230_v16 = vld [vmem:[#allocation12 + $0xf18] sm:$0xf]  ;;  %v7943_v48 = vor.u32 %v8907_v30, %v7942_v58  ;;  %5381 = vmatpush.bf16.msra.mxu2 %v8263_v6  ;;  %5407 = vmatpush.bf16.msrb.mxu0 %v6731_v37  ;;  %v6635_v30 = vor.u32 %v8575_v54, %v6632_v38  ;;  %v6600_v37 = vld [vmem:[#allocation12 + $0x278] sm:$0xf0] }
 0x40c   :  { %v8979_v0 = vld [vmem:[#allocation12 + $0xf34] sm:$0xf0]  ;;  %5396 = vmatpush.bf16.msra.mxu3 %v6411_v50  ;;  %v8671_v59 = vld [vmem:[#allocation12 + $0x59c] sm:$0xf] }
 0x40d   :  { %v8231_v39 = vor.u32 %v8979_v0, %v8230_v16  ;;  %v7910_v32 = vld [vmem:[#allocation12 + $0xc98] sm:$0xf]  ;;  %5370 = vmatpush.bf16.msra.mxu1 %v7943_v48  ;;  %v8495_v16 = vld [vmem:[#allocation12 + $0x1c] sm:$0xf] }
 0x40e   :  { %v8899_v56 = vld [vmem:[#allocation12 + $0xcb4] sm:$0xf0]  ;;  %v6312_v0 = vld [vmem:[#allocation12 + $0x38] sm:$0xf0] }
 0x40f   :  { %v8198_v29 = vld [vmem:[#allocation12 + $0xed8] sm:$0xf]  ;;  %v7911_v33 = vor.u32 %v8899_v56, %v7910_v32  ;;  %5382 = vmatpush.bf16.msra.mxu2 %v8231_v39  ;;  %5408 = vmatpush.bf16.msrb.mxu0 %v6699_v7  ;;  %v5130_v39 = vpop.f32.mrf.mxu2  ;;  %v6315_v50 = vor.u32 %v8495_v16, %v6312_v0  ;;  %v6603_v56 = vor.u32 %v8567_v36, %v6600_v37  ;;  %v8559_v7 = vld [vmem:[#allocation12 + $0x21c] sm:$0xf]  ;;  %v5167_v0 = vpop.f32.mrf.mxu1 }
 0x410   :  { %v8971_v46 = vld [vmem:[#allocation12 + $0xef4] sm:$0xf0]  ;;  %5397 = vmatpush.bf16.msra.mxu3 %v6379_v22  ;;  %v7016_v61 = vld [vmem:[#allocation12 + $0x5b8] sm:$0xf0]  ;;  %v6571_v22 = vor.u32 %v8559_v7, %v6568_v35  ;;  %v9767_v7 = vpop.f32.mrf.mxu0 }
 0x411   :  { %v7878_v19 = vld [vmem:[#allocation12 + $0xc58] sm:$0xf]  ;;  %v8199_v55 = vor.u32 %v8971_v46, %v8198_v29  ;;  %5371 = vmatpush.bf16.msra.mxu1 %v7911_v33  ;;  %v7051_v29 = vor.u32 %v8679_v41, %v7048_v43  ;;  %v7563_v46 = vor.u32 %v8807_v45, %v7560_v31  ;;  %v8743_v63 = vld [vmem:[#allocation12 + $0x7dc] sm:$0xf] }
 0x412   :  { %v8891_v9 = vld [vmem:[#allocation12 + $0xc74] sm:$0xf0]  ;;  %v7304_v52 = vld [vmem:[#allocation12 + $0x7f8] sm:$0xf0] }
 0x413   :  { %v8166_v18 = vld [vmem:[#allocation12 + $0xe98] sm:$0xf]  ;;  %v7879_v23 = vor.u32 %v8891_v9, %v7878_v19  ;;  %5383 = vmatpush.bf16.msra.mxu2 %v8199_v55  ;;  %5409 = vmatpush.bf16.msrb.mxu0 %v6667_v49  ;;  %v8799_v27 = vld [vmem:[#allocation12 + $0x99c] sm:$0xf]  ;;  %v7019_v9 = vor.u32 %v8671_v59, %v7016_v61  ;;  %v9769_v61 = vpop.f32.mrf.mxu3 }
 0x414   :  { %v8963_v10 = vld [vmem:[#allocation12 + $0xeb4] sm:$0xf0]  ;;  %5398 = vmatpush.bf16.msra.mxu3 %v6347_v24  ;;  %v7528_v33 = vld [vmem:[#allocation12 + $0x9b8] sm:$0xf0]  ;;  %v5116_v24 = vadd.f32 %v9738_v12, %v5103_v15 }
 0x415   :  { %v7846_v34 = vld [vmem:[#allocation12 + $0xc18] sm:$0xf]  ;;  %v8167_v5 = vor.u32 %v8963_v10, %v8166_v18  ;;  %5372 = vmatpush.bf16.msra.mxu1 %v7879_v23  ;;  %v8871_v3 = vld [vmem:[#allocation12 + $0xbdc] sm:$0xf]  ;;  %v7307_v18 = vor.u32 %v8743_v63, %v7304_v52  ;;  %v7531_v10 = vor.u32 %v8799_v27, %v7528_v33 }
 0x416   :  { %v8883_v58 = vld [vmem:[#allocation12 + $0xc34] sm:$0xf0]  ;;  %v7816_v55 = vld [vmem:[#allocation12 + $0xbf8] sm:$0xf0] }
 0x417   :  { %v8134_v6 = vld [vmem:[#allocation12 + $0xe58] sm:$0xf]  ;;  %v7847_v44 = vor.u32 %v8883_v58, %v7846_v34  ;;  %5384 = vmatpush.bf16.msra.mxu2 %v8167_v5  ;;  %5410 = vmatpush.bf16.msrb.mxu0 %v6635_v30  ;;  %v8663_v49 = vld [vmem:[#allocation12 + $0x55c] sm:$0xf]  ;;  %v7819_v54 = vor.u32 %v8871_v3, %v7816_v55  ;;  %v5169_v33 = vpop.f32.mrf.mxu1 }
 0x418   :  { %v8955_v25 = vld [vmem:[#allocation12 + $0xe74] sm:$0xf0]  ;;  %5399 = vmatpush.bf16.msra.mxu3 %v6315_v50  ;;  %v6984_v40 = vld [vmem:[#allocation12 + $0x578] sm:$0xf0] }
 0x419   :  { %v8135_v48 = vor.u32 %v8955_v25, %v8134_v6  ;;  %v8102_v32 = vld [vmem:[#allocation12 + $0xe18] sm:$0xf]  ;;  %5373 = vmatpush.bf16.msra.mxu1 %v7847_v44  ;;  %v8735_v60 = vld [vmem:[#allocation12 + $0x79c] sm:$0xf]  ;;  %v6987_v26 = vor.u32 %v8663_v49, %v6984_v40  ;;  %v5180_v40 = vpop.f32.mrf.mxu2 }
 0x41a   :  { %v8947_v57 = vld [vmem:[#allocation12 + $0xe34] sm:$0xf0]  ;;  %v7272_v38 = vld [vmem:[#allocation12 + $0x7b8] sm:$0xf0] }
 0x41b   :  { %5385 = vmatpush.bf16.msra.mxu2 %v8135_v48  ;;  %v8103_v19 = vor.u32 %v8947_v57, %v8102_v32  ;;  %5411 = vmatpush.bf16.msrb.mxu0 %v6603_v56  ;;  %v8791_v21 = vld [vmem:[#allocation12 + $0x95c] sm:$0xf]  ;;  %v7275_v58 = vor.u32 %v8735_v60, %v7272_v38 }
 0x41c   :  { %5444 = vmatpush.bf16.msrb.mxu3 %v7563_v46  ;;  %5374 = vmatmul.bf16.vlgmr.msra.gmra.mxu1 %v9556_v2  ;;  %v7496_v23 = vld [vmem:[#allocation12 + $0x978] sm:$0xf0] }
 0x41d   :  { %5418 = vmatpush.bf16.msrb.mxu1 %v7051_v29  ;;  %5400 = vmatmul.bf16.vlgmr.msra.gmra.mxu3 %v9454_v51  ;;  %v8863_v34 = vld [vmem:[#allocation12 + $0xb9c] sm:$0xf]  ;;  %v7499_v6 = vor.u32 %v8791_v21, %v7496_v23  ;;  %v5129_v51 = vadd.f32 %v9750_v4, %v5116_v24 }
 0x41e   :  { %v7784_v5 = vld [vmem:[#allocation12 + $0xbb8] sm:$0xf0] }
 0x41f   :  { %5386 = vmatpush.bf16.msra.mxu2 %v8103_v19  ;;  %5412 = vmatpush.bf16.msrb.mxu0 %v6571_v22  ;;  %v8655_v25 = vld [vmem:[#allocation12 + $0x51c] sm:$0xf]  ;;  %v7787_v16 = vor.u32 %v8863_v34, %v7784_v5  ;;  %v5142_v39 = vadd.f32 %v9746_v53, %v5129_v51 }
 0x420   :  { %5445 = vmatpush.bf16.msrb.mxu3 %v7531_v10  ;;  %v6952_v11 = vld [vmem:[#allocation12 + $0x538] sm:$0xf0] }
 0x421   :  { %5419 = vmatpush.bf16.msrb.mxu1 %v7019_v9  ;;  %v8727_v30 = vld [vmem:[#allocation12 + $0x75c] sm:$0xf]  ;;  %v6955_v1 = vor.u32 %v8655_v25, %v6952_v11  ;;  %v5155_v52 = vadd.f32 %v9744_v47, %v5142_v39  ;;  %v5182_v39 = vpop.f32.mrf.mxu2 }
 0x422   :  { %5387 = vmatmul.bf16.vlgmr.msra.gmra.mxu2 %v9561_v20  ;;  %v7240_v36 = vld [vmem:[#allocation12 + $0x778] sm:$0xf0]  ;;  %5413 = vmatmul.bf16.vlgmr.msrb.gmra.mxu0 %v9466_v8 }
 0x423   :  { %5431 = vmatpush.bf16.msrb.mxu2 %v7307_v18  ;;  %5457 = vmatpush.bf16.msra.mxu0 %v7819_v54  ;;  %v8783_v37 = vld [vmem:[#allocation12 + $0x91c] sm:$0xf]  ;;  %v7243_v44 = vor.u32 %v8727_v30, %v7240_v36  ;;  %v5168_v18 = vadd.f32 %v5167_v0, %v5155_v52 }
 0x424   :  { %v7464_v12 = vld [vmem:[#allocation12 + $0x938] sm:$0xf0]  ;;  %5446 = vmatpush.bf16.msrb.mxu3 %v7499_v6  ;;  %v5208_v6 = vpop.f32.mrf.mxu0 }
 0x425   :  { %v8855_v41 = vld [vmem:[#allocation12 + $0xb5c] sm:$0xf]  ;;  %5420 = vmatpush.bf16.msrb.mxu1 %v6987_v26  ;;  %v7467_v45 = vor.u32 %v8783_v37, %v7464_v12  ;;  %v5181_v47 = vadd.f32 %v5180_v40, %v5168_v18 }
 0x426   :  { %v7752_v43 = vld [vmem:[#allocation12 + $0xb78] sm:$0xf0] }
 0x427   :  { %5432 = vmatpush.bf16.msrb.mxu2 %v7275_v58  ;;  %v8647_v31 = vld [vmem:[#allocation12 + $0x4dc] sm:$0xf]  ;;  %5458 = vmatpush.bf16.msra.mxu0 %v7787_v16  ;;  %v7755_v50 = vor.u32 %v8855_v41, %v7752_v43  ;;  %v8336_v58 = vmul.f32 -1.442695, %v5181_v47  ;;  %v5195_v16 = vpop.f32.mrf.mxu3 }
 0x428   :  { %v6920_v4 = vld [vmem:[#allocation12 + $0x4f8] sm:$0xf0]  ;;  %5447 = vmatpush.bf16.msrb.mxu3 %v7467_v45 }
 0x429   :  { %v8719_v48 = vld [vmem:[#allocation12 + $0x71c] sm:$0xf]  ;;  %5421 = vmatpush.bf16.msrb.mxu1 %v6955_v1  ;;  %v6923_v35 = vor.u32 %v8647_v31, %v6920_v4  ;;  %9079 = vpow2.f32 %v8336_v58 }
 0x42a   :  { %v7208_v32 = vld [vmem:[#allocation12 + $0x738] sm:$0xf0] }
 0x42b   :  { %v8775_v56 = vld [vmem:[#allocation12 + $0x8dc] sm:$0xf]  ;;  %5433 = vmatpush.bf16.msrb.mxu2 %v7243_v44  ;;  %v7211_v46 = vor.u32 %v8719_v48, %v7208_v32  ;;  %5459 = vmatpush.bf16.msra.mxu0 %v7755_v50 }
 0x42c   :  { %v7432_v29 = vld [vmem:[#allocation12 + $0x8f8] sm:$0xf0] }
 0x42d   :  { %v8847_v57 = vld [vmem:[#allocation12 + $0xb1c] sm:$0xf]  ;;  %v7435_v59 = vor.u32 %v8775_v56, %v7432_v29  ;;  %5422 = vmatpush.bf16.msrb.mxu1 %v6923_v35 }
 0x42e   :  { %v7720_v8 = vld [vmem:[#allocation12 + $0xb38] sm:$0xf0] }
 0x42f   :  { %v8639_v63 = vld [vmem:[#allocation12 + $0x49c] sm:$0xf]  ;;  %v7723_v27 = vor.u32 %v8847_v57, %v7720_v8  ;;  %5434 = vmatpush.bf16.msrb.mxu2 %v7211_v46  ;;  %5448 = vmatpush.bf16.msrb.mxu3 %v7435_v59 }
 0x430   :  { %v6888_v28 = vld [vmem:[#allocation12 + $0x4b8] sm:$0xf0] }
 0x431   :  { %v8711_v53 = vld [vmem:[#allocation12 + $0x6dc] sm:$0xf]  ;;  %v6891_v10 = vor.u32 %v8639_v63, %v6888_v28  ;;  %5460 = vmatpush.bf16.msra.mxu0 %v7723_v27  ;;  %v9080_v63 = vpop.eup %9079 }
 0x432   :  { %v7176_v19 = vld [vmem:[#allocation12 + $0x6f8] sm:$0xf0]  ;;  %v5524_v52 = vadd.f32 1.0, %v9080_v63  ;;  %v2093_v63 = vperm.slane %v9755_v13, 5 }
 0x433   :  { %v8767_v3 = vld [vmem:[#allocation12 + $0x89c] sm:$0xf]  ;;  %v7179_v49 = vor.u32 %v8711_v53, %v7176_v19  ;;  %5423 = vmatpush.bf16.msrb.mxu1 %v6891_v10 }
 0x434   :  { %v7400_v55 = vld [vmem:[#allocation12 + $0x8b8] sm:$0xf0]  ;;  %9081 = vrcp.f32 %v5524_v52  ;;  %v5599_v58 = vand.u32 2147483648, %v5524_v52  ;;  %vm5593_vm13 = vweird.f32 %v5524_v52 }
 0x435   :  { %v8839_v22 = vld [vmem:[#allocation12 + $0xadc] sm:$0xf]  ;;  %v7403_v60 = vor.u32 %v8767_v3, %v7400_v55  ;;  %5435 = vmatpush.bf16.msrb.mxu2 %v7179_v49 }
 0x436   :  { %v7688_v9 = vld [vmem:[#allocation12 + $0xaf8] sm:$0xf0] }
 0x437   :  { %v8631_v15 = vld [vmem:[#allocation12 + $0x45c] sm:$0xf]  ;;  %v7691_v21 = vor.u32 %v8839_v22, %v7688_v9  ;;  %5449 = vmatpush.bf16.msrb.mxu3 %v7403_v60 }
 0x438   :  { %v6856_v54 = vld [vmem:[#allocation12 + $0x478] sm:$0xf0] }
 0x439   :  { %v8703_v38 = vld [vmem:[#allocation12 + $0x69c] sm:$0xf]  ;;  %v6859_v25 = vor.u32 %v8631_v15, %v6856_v54  ;;  %5461 = vmatpush.bf16.msra.mxu0 %v7691_v21  ;;  %v9775_v15 = vpop.f32.mrf.mxu1 }
 0x43a   :  { %v7144_v23 = vld [vmem:[#allocation12 + $0x6b8] sm:$0xf0] }
 0x43b   :  { %v8759_v34 = vld [vmem:[#allocation12 + $0x85c] sm:$0xf]  ;;  %v7147_v30 = vor.u32 %v8703_v38, %v7144_v23  ;;  %5424 = vmatpush.bf16.msrb.mxu1 %v6859_v25  ;;  %v9082_v38 = vpop.eup %9081  ;;  %v5258_v25 = vpop.f32.mrf.mxu0 }
 0x43c   :  { %v7368_v5 = vld [vmem:[#allocation12 + $0x878] sm:$0xf0]  ;;  %vm5594_vm12 = vweird.f32 %v9082_v38 }
 0x43d   :  { %v8831_v24 = vld [vmem:[#allocation12 + $0xa9c] sm:$0xf]  ;;  %v7371_v51 = vor.u32 %v8759_v34, %v7368_v5  ;;  %5436 = vmatpush.bf16.msrb.mxu2 %v7147_v30  ;;  %vm5595_vm14 = vmor %vm5593_vm13, %vm5594_vm12 }
 0x43e   :  { %v7656_v26 = vld [vmem:[#allocation12 + $0xab8] sm:$0xf0] }
 0x43f   :  { %v8623_v11 = vld [vmem:[#allocation12 + $0x41c] sm:$0xf]  ;;  %v7659_v12 = vor.u32 %v8831_v24, %v7656_v26  ;;  %5450 = vmatpush.bf16.msrb.mxu3 %v7371_v51 }
 0x440   :  { %v6824_v0 = vld [vmem:[#allocation12 + $0x438] sm:$0xf0] }
 0x441   :  { %v8695_v36 = vld [vmem:[#allocation12 + $0x65c] sm:$0xf]  ;;  %v6827_v4 = vor.u32 %v8623_v11, %v6824_v0  ;;  %5462 = vmatpush.bf16.msra.mxu0 %v7659_v12 }
 0x442   :  { %v7112_v37 = vld [vmem:[#allocation12 + $0x678] sm:$0xf0] }
 0x443   :  { %v8751_v41 = vld [vmem:[#allocation12 + $0x81c] sm:$0xf]  ;;  %v7115_v48 = vor.u32 %v8695_v36, %v7112_v37  ;;  %5425 = vmatpush.bf16.msrb.mxu1 %v6827_v4  ;;  %v5221_v36 = vpop.f32.mrf.mxu1 }
 0x444   :  { %v7336_v43 = vld [vmem:[#allocation12 + $0x838] sm:$0xf0] }
 0x445   :  { %v8823_v1 = vld [vmem:[#allocation12 + $0xa5c] sm:$0xf]  ;;  %v7339_v50 = vor.u32 %v8751_v41, %v7336_v43  ;;  %5437 = vmatpush.bf16.msrb.mxu2 %v7115_v48  ;;  %v5600_v41 = vor.u32 1.1754944e-38, %v5599_v58 }
 0x446   :  { %v7624_v44 = vld [vmem:[#allocation12 + $0xa78] sm:$0xf0]  ;;  %5426 = vmatmul.bf16.vlgmr.msrb.gmra.mxu1 %v9483_v62 }
 0x447   :  { %v8935_v45 = vld [vmem:[#allocation12 + $0xddc] sm:$0xf]  ;;  %v7627_v32 = vor.u32 %v8823_v1, %v7624_v44  ;;  %5451 = vmatpush.bf16.msrb.mxu3 %v7339_v50 }
 0x448   :  { %v8072_v31 = vld [vmem:[#allocation12 + $0xdf8] sm:$0xf0] }
 0x449   :  { %v8075_v56 = vor.u32 %v8935_v45, %v8072_v31  ;;  %v8687_v29 = vld [vmem:[#allocation12 + $0x61c] sm:$0xf]  ;;  %5463 = vmatpush.bf16.msra.mxu0 %v7627_v32  ;;  %v5232_v31 = vpop.f32.mrf.mxu2  ;;  %v5260_v32 = vpop.f32.mrf.mxu0 }
 0x44a   :  { %v7080_v57 = vld [vmem:[#allocation12 + $0x638] sm:$0xf0]  ;;  %5452 = vmatmul.bf16.vlgmr.msrb.gmra.mxu3 %v9528_v17  ;;  %v5589_v17 = vmul.f32 %v9082_v38, %v5524_v52 }
 0x44b   :  { %v8815_v8 = vld [vmem:[#allocation12 + $0xa1c] sm:$0xf]  ;;  %v7083_v27 = vor.u32 %v8687_v29, %v7080_v57  ;;  %5470 = vmatpush.bf16.msra.mxu1 %v8075_v56 }
 0x44c   :  { %v7592_v35 = vld [vmem:[#allocation12 + $0xa38] sm:$0xf0]  ;;  %v5590_v5 = vsub.f32 1.0, %v5589_v17 }
 0x44d   :  { %v8927_v46 = vld [vmem:[#allocation12 + $0xd9c] sm:$0xf]  ;;  %v7595_v33 = vor.u32 %v8815_v8, %v7592_v35  ;;  %5438 = vmatpush.bf16.msrb.mxu2 %v7083_v27 }
 0x44e   :  { %v8040_v59 = vld [vmem:[#allocation12 + $0xdb8] sm:$0xf0]  ;;  %v5591_v6 = vmul.f32 %v9082_v38, %v5590_v5 }
 0x44f   :  { %v8999_v28 = vld [vmem:[#allocation12 + $0xfdc] sm:$0xf]  ;;  %v8043_v19 = vor.u32 %v8927_v46, %v8040_v59  ;;  %5464 = vmatpush.bf16.msra.mxu0 %v7595_v33 }
 0x450   :  { %v8328_v53 = vld [vmem:[#allocation12 + $0xff8] sm:$0xf0]  ;;  %5439 = vmatmul.bf16.vlgmr.msrb.gmra.mxu2 %v9490_v14  ;;  %v5597_v14 = vand.u32 2147483647, %v5524_v52  ;;  %v5592_v0 = vadd.f32 %v9082_v38, %v5591_v6 }
 0x451   :  { %v8331_v3 = vor.u32 %v8999_v28, %v8328_v53  ;;  %v8919_v55 = vld [vmem:[#allocation12 + $0xd5c] sm:$0xf]  ;;  %5471 = vmatpush.bf16.msra.mxu1 %v8043_v19  ;;  %v5234_v52 = vpop.f32.mrf.mxu2  ;;  %v5194_v19 = vadd.f32 %v9769_v61, %v2093_v63 }
 0x452   :  { %v8008_v22 = vld [vmem:[#allocation12 + $0xd78] sm:$0xf0]  ;;  %5465 = vmatmul.bf16.vlgmr.msra.gmra.mxu0 %v9537_v42  ;;  %v5245_v42 = vpop.f32.mrf.mxu3  ;;  %v5596_v43 = vsel %vm5595_vm14, %v9082_v38, %v5592_v0  ;;  %vm5598_vm15 = vcmp.eq.f32.partialorder %v5597_v14, 8.507059e+37 }
 0x453   :  { %v8991_v9 = vld [vmem:[#allocation12 + $0xf9c] sm:$0xf]  ;;  %v8011_v10 = vor.u32 %v8919_v55, %v8008_v22  ;;  %5483 = vmatpush.bf16.msra.mxu2 %v8331_v3  ;;  %v5601_v44 = vsel %vm5598_vm15, %v5600_v41, %v5596_v43  ;;  %v5207_v55 = vadd.f32 %v9767_v7, %v5194_v19 }
 0x454   :  { %v8296_v18 = vld [vmem:[#allocation12 + $0xfb8] sm:$0xf0]  ;;  %5652 = vst [vmem:[%s9808_s9 + $0x20] sm:$0xff] %v5601_v44 }
 0x455   :  { %v8299_v49 = vor.u32 %v8991_v9, %v8296_v18  ;;  %v8911_v40 = vld [vmem:[#allocation12 + $0xd1c] sm:$0xf]  ;;  %5472 = vmatpush.bf16.msra.mxu1 %v8011_v10  ;;  %v5220_v22 = vadd.f32 %v9775_v15, %v5207_v55  ;;  %v5271_v18 = vpop.f32.mrf.mxu1 }
 0x456   :  { %v7976_v60 = vld [vmem:[#allocation12 + $0xd38] sm:$0xf0] }
 0x457   :  { %v8983_v62 = vld [vmem:[#allocation12 + $0xf5c] sm:$0xf]  ;;  %v7979_v47 = vor.u32 %v8911_v40, %v7976_v60  ;;  %5484 = vmatpush.bf16.msra.mxu2 %v8299_v49  ;;  %v5233_v9 = vadd.f32 %v5232_v31, %v5220_v22  ;;  %v5310_v49 = vpop.f32.mrf.mxu0 }
 0x458   :  { %v8264_v54 = vld [vmem:[#allocation12 + $0xf78] sm:$0xf0] }
 0x459   :  { %v8267_v21 = vor.u32 %v8983_v62, %v8264_v54  ;;  %v8903_v23 = vld [vmem:[#allocation12 + $0xcdc] sm:$0xf]  ;;  %5473 = vmatpush.bf16.msra.mxu1 %v7979_v47  ;;  %v5246_v10 = vadd.f32 %v5245_v42, %v5233_v9  ;;  %v5284_v54 = vpop.f32.mrf.mxu2 }
 0x45a   :  { %v7944_v34 = vld [vmem:[#allocation12 + $0xcf8] sm:$0xf0]  ;;  %v5247_v57 = vpop.f32.mrf.mxu3 }
 0x45b   :  { %v8975_v24 = vld [vmem:[#allocation12 + $0xf1c] sm:$0xf]  ;;  %v7947_v11 = vor.u32 %v8903_v23, %v7944_v34  ;;  %5485 = vmatpush.bf16.msra.mxu2 %v8267_v21  ;;  %v5259_v60 = vadd.f32 %v5258_v25, %v5246_v10 }
 0x45c   :  { %v8232_v26 = vld [vmem:[#allocation12 + $0xf38] sm:$0xf0] }
 0x45d   :  { %v8235_v30 = vor.u32 %v8975_v24, %v8232_v26  ;;  %v8895_v51 = vld [vmem:[#allocation12 + $0xc9c] sm:$0xf]  ;;  %5474 = vmatpush.bf16.msra.mxu1 %v7947_v11  ;;  %v5273_v62 = vpop.f32.mrf.mxu1  ;;  %v5272_v61 = vadd.f32 %v5271_v18, %v5259_v60 }
 0x45e   :  { %v7912_v16 = vld [vmem:[#allocation12 + $0xcb8] sm:$0xf0] }
 0x45f   :  { %v8967_v37 = vld [vmem:[#allocation12 + $0xedc] sm:$0xf]  ;;  %v7915_v1 = vor.u32 %v8895_v51, %v7912_v16  ;;  %5486 = vmatpush.bf16.msra.mxu2 %v8235_v30  ;;  %v5285_v38 = vadd.f32 %v5284_v54, %v5272_v61  ;;  %v5312_v47 = vpop.f32.mrf.mxu0  ;;  %v2095_v54 = vperm.slane %v9755_v13, 7 }
 0x460   :  { %v8200_v12 = vld [vmem:[#allocation12 + $0xef8] sm:$0xf0] }
 0x461   :  { %v8203_v45 = vor.u32 %v8967_v37, %v8200_v12  ;;  %v8887_v4 = vld [vmem:[#allocation12 + $0xc5c] sm:$0xf]  ;;  %5475 = vmatpush.bf16.msra.mxu1 %v7915_v1  ;;  %v8337_v17 = vmul.f32 -1.442695, %v5285_v38  ;;  %v5286_v7 = vpop.f32.mrf.mxu2  ;;  %v2094_v37 = vperm.slane %v9755_v13, 6 }
 0x462   :  { %v7880_v48 = vld [vmem:[#allocation12 + $0xc78] sm:$0xf0]  ;;  %v5297_v40 = vpop.f32.mrf.mxu3 }
 0x463   :  { %v8959_v39 = vld [vmem:[#allocation12 + $0xe9c] sm:$0xf]  ;;  %v7883_v56 = vor.u32 %v8887_v4, %v7880_v48  ;;  %5487 = vmatpush.bf16.msra.mxu2 %v8203_v45  ;;  %9083 = vpow2.f32 %v8337_v17  ;;  %v5298_v41 = vadd.f32 %v5297_v40, %v2094_v37 }
 0x464   :  { %v8168_v50 = vld [vmem:[#allocation12 + $0xeb8] sm:$0xf0] }
 0x465   :  { %v8171_v29 = vor.u32 %v8959_v39, %v8168_v50  ;;  %v8879_v8 = vld [vmem:[#allocation12 + $0xc1c] sm:$0xf]  ;;  %5476 = vmatpush.bf16.msra.mxu1 %v7883_v56  ;;  %v5311_v43 = vadd.f32 %v5310_v49, %v5298_v41 }
 0x466   :  { %v7848_v35 = vld [vmem:[#allocation12 + $0xc38] sm:$0xf0] }
 0x467   :  { %v8951_v46 = vld [vmem:[#allocation12 + $0xe5c] sm:$0xf]  ;;  %v7851_v28 = vor.u32 %v8879_v8, %v7848_v35  ;;  %5488 = vmatpush.bf16.msra.mxu2 %v8171_v29 }
 0x468   :  { %v8136_v59 = vld [vmem:[#allocation12 + $0xe78] sm:$0xf0] }
 0x469   :  { %v8139_v53 = vor.u32 %v8951_v46, %v8136_v59  ;;  %v8943_v27 = vld [vmem:[#allocation12 + $0xe1c] sm:$0xf]  ;;  %5477 = vmatpush.bf16.msra.mxu1 %v7851_v28  ;;  %v9084_v21 = vpop.eup %9083 }
 0x46a   :  { %v8104_v33 = vld [vmem:[#allocation12 + $0xe38] sm:$0xf0]  ;;  %v5525_v23 = vadd.f32 1.0, %v9084_v21 }
 0x46b   :  { %5489 = vmatpush.bf16.msra.mxu2 %v8139_v53  ;;  %v8107_v3 = vor.u32 %v8943_v27, %v8104_v33 }
 0x46c   :  { %5478 = vmatmul.bf16.vlgmr.msra.gmra.mxu1 %v9556_v2  ;;  %v5299_v2 = vpop.f32.mrf.mxu3  ;;  %9085 = vrcp.f32 %v5525_v23  ;;  %v5614_v24 = vand.u32 2147483648, %v5525_v23  ;;  %v5612_v58 = vand.u32 2147483647, %v5525_v23  ;;  %vm5608_vm1 = vweird.f32 %v5525_v23 }
 0x46e   :  { %v5615_v30 = vor.u32 1.1754944e-38, %v5614_v24  ;;  %vm5613_vm3 = vcmp.eq.f32.partialorder %v5612_v58, 8.507059e+37 }
 0x46f   :  { %5490 = vmatpush.bf16.msra.mxu2 %v8107_v3 }
 0x472   :  { %5491 = vmatmul.bf16.vlgmr.msra.gmra.mxu2 %v9561_v20  ;;  %v9086_v34 = vpop.eup %9085 }
 0x473   :  { %v5323_v15 = vpop.f32.mrf.mxu1  ;;  %v5604_v20 = vmul.f32 %v9086_v34, %v5525_v23  ;;  %vm5609_vm0 = vweird.f32 %v9086_v34 }
 0x474   :  { %vm5610_vm2 = vmor %vm5608_vm1, %vm5609_vm0  ;;  %v5324_v1 = vadd.f32 %v5323_v15, %v5311_v43 }
 0x475   :  { %v5605_v5 = vsub.f32 1.0, %v5604_v20 }
 0x477   :  { %v5606_v26 = vmul.f32 %v9086_v34, %v5605_v5 }
 0x479   :  { %v5607_v25 = vadd.f32 %v9086_v34, %v5606_v26 }
 0x47b   :  { %v5325_v11 = vpop.f32.mrf.mxu1  ;;  %v5611_v42 = vsel %vm5610_vm2, %v9086_v34, %v5607_v25 }
 0x47c   :  { %v5616_v51 = vsel %vm5613_vm3, %v5615_v30, %v5611_v42 }
 0x47d   :  { %v5349_v14 = vpop.f32.mrf.mxu3  ;;  %5653 = vst [vmem:[%s9808_s9 + $0x28] sm:$0xff] %v5616_v51 }
 0x47f   :  { %v5362_v6 = vpop.f32.mrf.mxu0 }
 0x483   :  { %v5336_v16 = vpop.f32.mrf.mxu2 }
 0x484   :  { %v5337_v44 = vadd.f32 %v5336_v16, %v5324_v1 }
 0x485   :  { %v5351_v36 = vpop.f32.mrf.mxu3 }
 0x486   :  { %v5350_v31 = vadd.f32 %v5349_v14, %v5337_v44 }
 0x487   :  { %v5364_v0 = vpop.f32.mrf.mxu0 }
 0x488   :  { %v5363_v39 = vadd.f32 %v5362_v6, %v5350_v31 }
 0x48b   :  { %v5338_v12 = vpop.f32.mrf.mxu2 }
 0x499   :  { %v5375_v45 = vpop.f32.mrf.mxu1 }
 0x49a   :  { %v5376_v32 = vadd.f32 %v5375_v45, %v5363_v39 }
 0x49f   :  { %v5414_v4 = vpop.f32.mrf.mxu0 }
 0x4a0   :  { %v5401_v48 = vpop.f32.mrf.mxu3 }
 0x4a1   :  { %v5377_v50 = vpop.f32.mrf.mxu1  ;;  %v5402_v17 = vadd.f32 %v5401_v48, %v2095_v54 }
 0x4a3   :  { %v5415_v47 = vadd.f32 %v5414_v4, %v5402_v17 }
 0x4a5   :  { %v5388_v56 = vpop.f32.mrf.mxu2 }
 0x4a6   :  { %v5389_v29 = vadd.f32 %v5388_v56, %v5376_v32 }
 0x4a7   :  { %v5416_v8 = vpop.f32.mrf.mxu0 }
 0x4a8   :  { %v8338_v57 = vmul.f32 -1.442695, %v5389_v29  ;;  %v5403_v35 = vpop.f32.mrf.mxu3 }
 0x4aa   :  { %9087 = vpow2.f32 %v8338_v57 }
 0x4ad   :  { %v5390_v46 = vpop.f32.mrf.mxu2 }
 0x4b0   :  { %v9088_v59 = vpop.eup %9087 }
 0x4b1   :  { %v5526_v63 = vadd.f32 1.0, %v9088_v59 }
 0x4b3   :  { %9089 = vrcp.f32 %v5526_v63  ;;  %v5629_v33 = vand.u32 2147483648, %v5526_v63  ;;  %v5627_v3 = vand.u32 2147483647, %v5526_v63  ;;  %vm5623_vm5 = vweird.f32 %v5526_v63 }
 0x4b5   :  { %v5630_v10 = vor.u32 1.1754944e-38, %v5629_v33  ;;  %vm5628_vm7 = vcmp.eq.f32.partialorder %v5627_v3, 8.507059e+37 }
 0x4b9   :  { %v9090_v53 = vpop.eup %9089 }
 0x4ba   :  { %v5619_v52 = vmul.f32 %v9090_v53, %v5526_v63  ;;  %vm5624_vm4 = vweird.f32 %v9090_v53 }
 0x4bb   :  { %vm5625_vm6 = vmor %vm5623_vm5, %vm5624_vm4 }
 0x4bc   :  { %v5620_v27 = vsub.f32 1.0, %v5619_v52 }
 0x4be   :  { %v5621_v19 = vmul.f32 %v9090_v53, %v5620_v27 }
 0x4c0   :  { %v5622_v9 = vadd.f32 %v9090_v53, %v5621_v19 }
 0x4c2   :  { %v5626_v49 = vsel %vm5625_vm6, %v9090_v53, %v5622_v9 }
 0x4c3   :  { %v5427_v28 = vpop.f32.mrf.mxu1  ;;  %v5631_v40 = vsel %vm5628_vm7, %v5630_v10, %v5626_v49 }
 0x4c4   :  { %5654 = vst [vmem:[%s9808_s9 + $0x30] sm:$0xff] %v5631_v40  ;;  %v5428_v2 = vadd.f32 %v5427_v28, %v5415_v47 }
 0x4cb   :  { %v5429_v18 = vpop.f32.mrf.mxu1 }
 0x4cd   :  { %v5453_v22 = vpop.f32.mrf.mxu3 }
 0x4cf   :  { %v5466_v55 = vpop.f32.mrf.mxu0 }
 0x4d3   :  { %v5440_v60 = vpop.f32.mrf.mxu2 }
 0x4d4   :  { %v5441_v7 = vadd.f32 %v5440_v60, %v5428_v2 }
 0x4d5   :  { %v5455_v61 = vpop.f32.mrf.mxu3 }
 0x4d6   :  { %v5454_v23 = vadd.f32 %v5453_v22, %v5441_v7 }
 0x4d7   :  { %v5468_v62 = vpop.f32.mrf.mxu0 }
 0x4d8   :  { %v5467_v15 = vadd.f32 %v5466_v55, %v5454_v23 }
 0x4db   :  { %v5442_v38 = vpop.f32.mrf.mxu2 }
 0x4e9   :  { %v5479_v21 = vpop.f32.mrf.mxu1 }
 0x4ea   :  { %v5480_v20 = vadd.f32 %v5479_v21, %v5467_v15 }
 0x4f1   :  { %v5481_v34 = vpop.f32.mrf.mxu1 }
 0x4f5   :  { %v5492_v5 = vpop.f32.mrf.mxu2 }
 0x4f6   :  { %v5493_v24 = vadd.f32 %v5492_v5, %v5480_v20 }
 0x4f8   :  { %v8339_v26 = vmul.f32 -1.442695, %v5493_v24 }
 0x4fa   :  { %9091 = vpow2.f32 %v8339_v26 }
 0x4fd   :  { %v5494_v58 = vpop.f32.mrf.mxu2 }
 0x500   :  { %v9092_v6 = vpop.eup %9091 }
 0x501   :  { %v5527_v14 = vadd.f32 1.0, %v9092_v6 }
 0x503   :  { %9093 = vrcp.f32 %v5527_v14  ;;  %v5644_v30 = vand.u32 2147483648, %v5527_v14  ;;  %v5642_v51 = vand.u32 2147483647, %v5527_v14  ;;  %vm5638_vm9 = vweird.f32 %v5527_v14 }
 0x505   :  { %v5645_v0 = vor.u32 1.1754944e-38, %v5644_v30  ;;  %vm5643_vm11 = vcmp.eq.f32.partialorder %v5642_v51, 8.507059e+37 }
 0x509   :  { %v9094_v25 = vpop.eup %9093 }
 0x50a   :  { %v5634_v13 = vmul.f32 %v9094_v25, %v5527_v14  ;;  %vm5639_vm8 = vweird.f32 %v9094_v25 }
 0x50b   :  { %vm5640_vm10 = vmor %vm5638_vm9, %vm5639_vm8 }
 0x50c   :  { %v5635_v11 = vsub.f32 1.0, %v5634_v13 }
 0x50e   :  { %v5636_v42 = vmul.f32 %v9094_v25, %v5635_v11 }
 0x510   :  { %v5637_v16 = vadd.f32 %v9094_v25, %v5636_v42 }
 0x512   :  { %v5641_v36 = vsel %vm5640_vm10, %v9094_v25, %v5637_v16 }
 0x513   :  { %v5646_v37 = vsel %vm5643_vm11, %v5645_v0, %v5641_v36 }
 0x514   :  { %5655 = vst [vmem:[%s9808_s9 + $0x38] sm:$0xff] %v5646_v37 }
 0x515   :  { %5660 = vsyncpa [#allocation3], 1 }
 0x516   :  { %5661 = vsyncpa [#allocation5], 1 }
 0x517   :  { %5662 = vsyncpa [#allocation8], 1 }
 0x518   :  { %5663 = vsyncpa [#allocation11], 1 }
 0x519   :  { %5664 = vsyncpa [#allocation14], 1 }

</bundles_post_ra>
